<compile_context>
chip_gen: v6e
topology: v6e:2x2x1
jax: 0.10.0
libtpu: 0.0.40
codegen_flags: <defaults>
</compile_context>

<pallas_src>
import functools

import jax
import jax.numpy as jnp
from jax.experimental import pallas as pl
from jax.experimental.pallas import tpu as pltpu


_VMEM_SPEC = pl.BlockSpec(memory_space=pltpu.MemorySpace.VMEM)


# --------------------------------------------------------------------------
# Fused Pallas kernel: all LSTM layers + Linear head + LogSoftmax(dim=1)
# --------------------------------------------------------------------------
def _make_fused_lstm_kernel(layers_size, seq_len, batch):
    """Builds the fused kernel for a fixed (static) configuration.

    Ref order (inputs):
      x2d                      : (seq_len*batch, input_size)  time-major, flattened
      per layer l:
        wih_l : (4, in_dim, H)   gate-split, pre-transposed W_ih
        whh_l : (4, H, H)        gate-split, pre-transposed W_hh
        b_l   : (4, 1, H)        gate-split (b_ih + b_hh)
      h0, c0                   : (layers, batch, H)
      wlin                     : (H, out)
      blin                     : (1, out)
    Outputs:
      logp : (batch, out),  hn : (layers, batch, H),  cn : (layers, batch, H)
    Scratch:
      y_scr : (seq_len*batch, H)   inter-layer activations (kept in VMEM)
    """

    def kernel(*refs):
        x_ref = refs[0]
        layer_refs = [refs[1 + 3 * l: 4 + 3 * l] for l in range(layers_size)]
        base = 1 + 3 * layers_size
        h0_ref, c0_ref, wlin_ref, blin_ref = refs[base: base + 4]
        logp_ref, hn_ref, cn_ref = refs[base + 4: base + 7]
        y_scr = refs[base + 7]

        # Layer-0 input, already flat (seq*batch, input_size).
        x2d = x_ref[...]
        h_last = None

        for l in range(layers_size):
            wih_ref, whh_ref, b_ref = layer_refs[l]
            is_last = (l + 1 == layers_size)

            # ---- Hoisted input projection (off the serial critical path) ----
            # One wide MXU matmul per gate over the whole sequence; gate-split so
            # the recurrence never slices a packed 4H vector along the lane axis.
            gx = [
                jnp.dot(x2d, wih_ref[g], preferred_element_type=jnp.float32)
                + b_ref[g]
                for g in range(4)
            ]  # 4 x (seq*batch, H)

            # Hoist loop-invariant recurrent weights into registers once.
            whh = [whh_ref[g] for g in range(4)]

            # ---- Serial recurrence: h/c live in registers, fully unrolled ----
            h = h0_ref[l]
            c = c0_ref[l]
            for t in range(seq_len):
                r0, r1 = t * batch, (t + 1) * batch
                i_g = jax.nn.sigmoid(
                    gx[0][r0:r1, :]
                    + jnp.dot(h, whh[0], preferred_element_type=jnp.float32))
                f_g = jax.nn.sigmoid(
                    gx[1][r0:r1, :]
                    + jnp.dot(h, whh[1], preferred_element_type=jnp.float32))
                g_g = jnp.tanh(
                    gx[2][r0:r1, :]
                    + jnp.dot(h, whh[2], preferred_element_type=jnp.float32))
                o_g = jax.nn.sigmoid(
                    gx[3][r0:r1, :]
                    + jnp.dot(h, whh[3], preferred_element_type=jnp.float32))
                c = f_g * c + i_g * g_g
                h = o_g * jnp.tanh(c)
                if not is_last:
                    # Inter-layer handoff stays in VMEM (no HBM round trip).
                    y_scr[r0:r1, :] = h

            hn_ref[l] = h
            cn_ref[l] = c
            h_last = h

            if not is_last:
                x2d = y_scr[...]

        # ---- Fused Linear head + LogSoftmax(dim=1) on final hidden state ----
        logits = jnp.dot(h_last, wlin_ref[...],
                         preferred_element_type=jnp.float32) + blin_ref[...]
        m = jnp.max(logits, axis=1, keepdims=True)
        z = logits - m
        lse = jnp.log(jnp.sum(jnp.exp(z), axis=1, keepdims=True))
        logp_ref[...] = z - lse

    return kernel


# --------------------------------------------------------------------------
# Parameter construction (torch layout) and one-time kernel-layout conversion
# --------------------------------------------------------------------------
def init_params(key, input_size, hidden_size, output_size, layers_size):
    """Deterministic init mimicking torch's uniform(-1/sqrt(H), 1/sqrt(H))."""
    bound = 1.0 / jnp.sqrt(jnp.float32(hidden_size))
    params = {"lstm": [], "linear": {}}
    for layer in range(layers_size):
        in_dim = input_size if layer == 0 else hidden_size
        key, k1, k2, k3, k4 = jax.random.split(key, 5)
        w_ih = jax.random.uniform(k1, (4 * hidden_size, in_dim),
                                  jnp.float32, -bound, bound)
        w_hh = jax.random.uniform(k2, (4 * hidden_size, hidden_size),
                                  jnp.float32, -bound, bound)
        b_ih = jax.random.uniform(k3, (4 * hidden_size,), jnp.float32, -bound, bound)
        b_hh = jax.random.uniform(k4, (4 * hidden_size,), jnp.float32, -bound, bound)
        params["lstm"].append({"w_ih": w_ih, "w_hh": w_hh,
                               "b_ih": b_ih, "b_hh": b_hh})
    key, k1, k2 = jax.random.split(key, 3)
    params["linear"]["w"] = jax.random.uniform(
        k1, (output_size, hidden_size), jnp.float32, -bound, bound)
    params["linear"]["b"] = jax.random.uniform(
        k2, (output_size,), jnp.float32, -bound, bound)
    return params


def prepare_params(params, hidden_size):
    """One-time conversion into kernel layout: pre-transposed, gate-split weights
    (torch gate order i,f,g,o) and pre-combined biases."""
    kp = {"layers": []}
    for p in params["lstm"]:
        in_dim = p["w_ih"].shape[1]
        w_ih_t = jnp.transpose(
            p["w_ih"].reshape(4, hidden_size, in_dim), (0, 2, 1))        # (4, in, H)
        w_hh_t = jnp.transpose(
            p["w_hh"].reshape(4, hidden_size, hidden_size), (0, 2, 1))   # (4, H, H)
        b = (p["b_ih"] + p["b_hh"]).reshape(4, 1, hidden_size)           # (4, 1, H)
        kp["layers"].append({"w_ih_t": w_ih_t, "w_hh_t": w_hh_t, "b": b})
    kp["w_lin_t"] = jnp.transpose(params["linear"]["w"])                 # (H, out)
    kp["b_lin"] = params["linear"]["b"].reshape(1, -1)                   # (1, out)
    return kp


# --------------------------------------------------------------------------
# Module-equivalent forward
# --------------------------------------------------------------------------
@functools.partial(jax.jit, static_argnames=("input_size", "hidden_size",
                                             "output_size", "layers_size"))
def lstm_forward(inputs, hidden, kparams, *, input_size, hidden_size,
                 output_size, layers_size):
    """
    inputs : (batch, input_size, seq_len)  -- same as the PyTorch module
    hidden : None or (h0, c0), each (layers_size, batch, hidden_size)
    returns (log_probs (batch, output_size), (h_n, c_n))
    """
    batch_size = inputs.shape[0]
    seq_len = inputs.shape[2]
    assert inputs.shape[1] == input_size, "inputs dim should match input_size"

    if hidden is None:
        hidden = (jnp.zeros((layers_size, batch_size, hidden_size), jnp.float32),
                  jnp.zeros((layers_size, batch_size, hidden_size), jnp.float32))
    h0, c0 = hidden

    # torch does `.view(seq_len, batch, input_size)` -> pure reshape of the flat
    # buffer (bug-for-bug compatible, NOT a transpose). We additionally flatten
    # (seq, batch) -> rows; still the same row-major buffer reinterpretation.
    x2d = jnp.reshape(inputs, (seq_len * batch_size, input_size)).astype(jnp.float32)

    flat_args = [x2d]
    for l in range(layers_size):
        lw = kparams["layers"][l]
        flat_args += [lw["w_ih_t"], lw["w_hh_t"], lw["b"]]
    flat_args += [h0.astype(jnp.float32), c0.astype(jnp.float32),
                  kparams["w_lin_t"], kparams["b_lin"]]

    kernel = _make_fused_lstm_kernel(layers_size, seq_len, batch_size)

    log_probs, h_n, c_n = pl.pallas_call(
        kernel,
        out_shape=(
            jax.ShapeDtypeStruct((batch_size, output_size), jnp.float32),
            jax.ShapeDtypeStruct((layers_size, batch_size, hidden_size), jnp.float32),
            jax.ShapeDtypeStruct((layers_size, batch_size, hidden_size), jnp.float32),
        ),
        in_specs=[_VMEM_SPEC] * len(flat_args),
        out_specs=(_VMEM_SPEC, _VMEM_SPEC, _VMEM_SPEC),
        scratch_shapes=[
            pltpu.VMEM((seq_len * batch_size, hidden_size), jnp.float32),
        ],
    )(*flat_args)

    return log_probs, (h_n, c_n)


if __name__ == "__main__":
    INPUT_SIZE = 8
    HIDDEN_SIZE = 32
    OUTPUT_SIZE = 16
    LAYERS_SIZE = 2
    BATCH = 2
    SEQ_LEN = 8

    key = jax.random.PRNGKey(0)
    key, pkey, xkey = jax.random.split(key, 3)
    params = init_params(pkey, INPUT_SIZE, HIDDEN_SIZE, OUTPUT_SIZE, LAYERS_SIZE)
    kparams = prepare_params(params, HIDDEN_SIZE)

    inputs = jax.random.normal(xkey, (BATCH, INPUT_SIZE, SEQ_LEN), jnp.float32)

    log_probs, (h_n, c_n) = lstm_forward(
        inputs, None, kparams,
        input_size=INPUT_SIZE, hidden_size=HIDDEN_SIZE,
        output_size=OUTPUT_SIZE, layers_size=LAYERS_SIZE)

    jax.block_until_ready((log_probs, h_n, c_n))

    assert log_probs.shape == (BATCH, OUTPUT_SIZE)
    assert h_n.shape == (LAYERS_SIZE, BATCH, HIDDEN_SIZE)
    assert c_n.shape == (LAYERS_SIZE, BATCH, HIDDEN_SIZE)
    # log-softmax rows must (approximately) sum to 1 in prob space
    assert jnp.allclose(jnp.sum(jnp.exp(log_probs), axis=1), 1.0, atol=1e-4)
    assert bool(jnp.all(jnp.isfinite(log_probs)))

    print("KERNEL_OK")
</pallas_src>

<mosaic_0001>
module attributes {stable_mosaic.version = 11 : i64} {
  func.func @kernel(%arg0: memref<16x8xf32, #tpu.memory_space<vmem>>, %arg1: memref<4x8x32xf32, #tpu.memory_space<vmem>>, %arg2: memref<4x32x32xf32, #tpu.memory_space<vmem>>, %arg3: memref<4x1x32xf32, #tpu.memory_space<vmem>>, %arg4: memref<4x32x32xf32, #tpu.memory_space<vmem>>, %arg5: memref<4x32x32xf32, #tpu.memory_space<vmem>>, %arg6: memref<4x1x32xf32, #tpu.memory_space<vmem>>, %arg7: memref<2x2x32xf32, #tpu.memory_space<vmem>>, %arg8: memref<2x2x32xf32, #tpu.memory_space<vmem>>, %arg9: memref<32x16xf32, #tpu.memory_space<vmem>>, %arg10: memref<1x16xf32, #tpu.memory_space<vmem>>, %arg11: memref<2x16xf32, #tpu.memory_space<vmem>>, %arg12: memref<2x2x32xf32, #tpu.memory_space<vmem>>, %arg13: memref<2x2x32xf32, #tpu.memory_space<vmem>>, %arg14: memref<16x32xf32, #tpu.memory_space<vmem>>) attributes {dimension_semantics = [], scalar_prefetch = 0 : i64, scratch_operands = 1 : i64, tpu.core_type = #tpu.core_type<tc>} {
    %c0 = arith.constant 0 : index
    %c0_0 = arith.constant 0 : index
    %0 = vector.load %arg0[%c0, %c0_0] : memref<16x8xf32, #tpu.memory_space<vmem>>, vector<16x8xf32>
    %c0_1 = arith.constant 0 : index
    %c0_2 = arith.constant 0 : index
    %c0_3 = arith.constant 0 : index
    %1 = vector.load %arg1[%c0_1, %c0_2, %c0_3] : memref<4x8x32xf32, #tpu.memory_space<vmem>>, vector<1x8x32xf32>
    %2 = vector.shape_cast %1 : vector<1x8x32xf32> to vector<8x32xf32>
    %cst = arith.constant dense<0.000000e+00> : vector<16x32xf32>
    %3 = tpu.matmul %0, %2, %cst {dimension_numbers = #tpu.dot_dimension_numbers<[1], [0], [0], [1], [0, 0, 1, 1], [], []>} : vector<16x8xf32>, vector<8x32xf32>, vector<16x32xf32> -> vector<16x32xf32>
    %c0_4 = arith.constant 0 : index
    %c0_5 = arith.constant 0 : index
    %c0_6 = arith.constant 0 : index
    %4 = vector.load %arg3[%c0_4, %c0_5, %c0_6] : memref<4x1x32xf32, #tpu.memory_space<vmem>>, vector<1x1x32xf32>
    %5 = vector.shape_cast %4 : vector<1x1x32xf32> to vector<1x32xf32>
    %6 = vector.broadcast %5 : vector<1x32xf32> to vector<16x32xf32>
    %7 = arith.addf %3, %6 : vector<16x32xf32>
    %c1 = arith.constant 1 : index
    %c0_7 = arith.constant 0 : index
    %c0_8 = arith.constant 0 : index
    %8 = vector.load %arg1[%c1, %c0_7, %c0_8] : memref<4x8x32xf32, #tpu.memory_space<vmem>>, vector<1x8x32xf32>
    %9 = vector.shape_cast %8 : vector<1x8x32xf32> to vector<8x32xf32>
    %cst_9 = arith.constant dense<0.000000e+00> : vector<16x32xf32>
    %10 = tpu.matmul %0, %9, %cst_9 {dimension_numbers = #tpu.dot_dimension_numbers<[1], [0], [0], [1], [0, 0, 1, 1], [], []>} : vector<16x8xf32>, vector<8x32xf32>, vector<16x32xf32> -> vector<16x32xf32>
    %c1_10 = arith.constant 1 : index
    %c0_11 = arith.constant 0 : index
    %c0_12 = arith.constant 0 : index
    %11 = vector.load %arg3[%c1_10, %c0_11, %c0_12] : memref<4x1x32xf32, #tpu.memory_space<vmem>>, vector<1x1x32xf32>
    %12 = vector.shape_cast %11 : vector<1x1x32xf32> to vector<1x32xf32>
    %13 = vector.broadcast %12 : vector<1x32xf32> to vector<16x32xf32>
    %14 = arith.addf %10, %13 : vector<16x32xf32>
    %c2 = arith.constant 2 : index
    %c0_13 = arith.constant 0 : index
    %c0_14 = arith.constant 0 : index
    %15 = vector.load %arg1[%c2, %c0_13, %c0_14] : memref<4x8x32xf32, #tpu.memory_space<vmem>>, vector<1x8x32xf32>
    %16 = vector.shape_cast %15 : vector<1x8x32xf32> to vector<8x32xf32>
    %cst_15 = arith.constant dense<0.000000e+00> : vector<16x32xf32>
    %17 = tpu.matmul %0, %16, %cst_15 {dimension_numbers = #tpu.dot_dimension_numbers<[1], [0], [0], [1], [0, 0, 1, 1], [], []>} : vector<16x8xf32>, vector<8x32xf32>, vector<16x32xf32> -> vector<16x32xf32>
    %c2_16 = arith.constant 2 : index
    %c0_17 = arith.constant 0 : index
    %c0_18 = arith.constant 0 : index
    %18 = vector.load %arg3[%c2_16, %c0_17, %c0_18] : memref<4x1x32xf32, #tpu.memory_space<vmem>>, vector<1x1x32xf32>
    %19 = vector.shape_cast %18 : vector<1x1x32xf32> to vector<1x32xf32>
    %20 = vector.broadcast %19 : vector<1x32xf32> to vector<16x32xf32>
    %21 = arith.addf %17, %20 : vector<16x32xf32>
    %c3 = arith.constant 3 : index
    %c0_19 = arith.constant 0 : index
    %c0_20 = arith.constant 0 : index
    %22 = vector.load %arg1[%c3, %c0_19, %c0_20] : memref<4x8x32xf32, #tpu.memory_space<vmem>>, vector<1x8x32xf32>
    %23 = vector.shape_cast %22 : vector<1x8x32xf32> to vector<8x32xf32>
    %cst_21 = arith.constant dense<0.000000e+00> : vector<16x32xf32>
    %24 = tpu.matmul %0, %23, %cst_21 {dimension_numbers = #tpu.dot_dimension_numbers<[1], [0], [0], [1], [0, 0, 1, 1], [], []>} : vector<16x8xf32>, vector<8x32xf32>, vector<16x32xf32> -> vector<16x32xf32>
    %c3_22 = arith.constant 3 : index
    %c0_23 = arith.constant 0 : index
    %c0_24 = arith.constant 0 : index
    %25 = vector.load %arg3[%c3_22, %c0_23, %c0_24] : memref<4x1x32xf32, #tpu.memory_space<vmem>>, vector<1x1x32xf32>
    %26 = vector.shape_cast %25 : vector<1x1x32xf32> to vector<1x32xf32>
    %27 = vector.broadcast %26 : vector<1x32xf32> to vector<16x32xf32>
    %28 = arith.addf %24, %27 : vector<16x32xf32>
    %c0_25 = arith.constant 0 : index
    %c0_26 = arith.constant 0 : index
    %c0_27 = arith.constant 0 : index
    %29 = vector.load %arg2[%c0_25, %c0_26, %c0_27] : memref<4x32x32xf32, #tpu.memory_space<vmem>>, vector<1x32x32xf32>
    %30 = vector.shape_cast %29 : vector<1x32x32xf32> to vector<32x32xf32>
    %c1_28 = arith.constant 1 : index
    %c0_29 = arith.constant 0 : index
    %c0_30 = arith.constant 0 : index
    %31 = vector.load %arg2[%c1_28, %c0_29, %c0_30] : memref<4x32x32xf32, #tpu.memory_space<vmem>>, vector<1x32x32xf32>
    %32 = vector.shape_cast %31 : vector<1x32x32xf32> to vector<32x32xf32>
    %c2_31 = arith.constant 2 : index
    %c0_32 = arith.constant 0 : index
    %c0_33 = arith.constant 0 : index
    %33 = vector.load %arg2[%c2_31, %c0_32, %c0_33] : memref<4x32x32xf32, #tpu.memory_space<vmem>>, vector<1x32x32xf32>
    %34 = vector.shape_cast %33 : vector<1x32x32xf32> to vector<32x32xf32>
    %c3_34 = arith.constant 3 : index
    %c0_35 = arith.constant 0 : index
    %c0_36 = arith.constant 0 : index
    %35 = vector.load %arg2[%c3_34, %c0_35, %c0_36] : memref<4x32x32xf32, #tpu.memory_space<vmem>>, vector<1x32x32xf32>
    %36 = vector.shape_cast %35 : vector<1x32x32xf32> to vector<32x32xf32>
    %c0_37 = arith.constant 0 : index
    %c0_38 = arith.constant 0 : index
    %c0_39 = arith.constant 0 : index
    %37 = vector.load %arg7[%c0_37, %c0_38, %c0_39] : memref<2x2x32xf32, #tpu.memory_space<vmem>>, vector<1x2x32xf32>
    %38 = vector.shape_cast %37 : vector<1x2x32xf32> to vector<2x32xf32>
    %c0_40 = arith.constant 0 : index
    %c0_41 = arith.constant 0 : index
    %c0_42 = arith.constant 0 : index
    %39 = vector.load %arg8[%c0_40, %c0_41, %c0_42] : memref<2x2x32xf32, #tpu.memory_space<vmem>>, vector<1x2x32xf32>
    %40 = vector.shape_cast %39 : vector<1x2x32xf32> to vector<2x32xf32>
    %41 = vector.extract_strided_slice %7 {offsets = [0, 0], sizes = [2, 32], strides = [1, 1]} : vector<16x32xf32> to vector<2x32xf32>
    %cst_43 = arith.constant dense<0.000000e+00> : vector<2x32xf32>
    %42 = tpu.matmul %38, %30, %cst_43 {dimension_numbers = #tpu.dot_dimension_numbers<[1], [0], [0], [1], [0, 0, 1, 1], [], []>} : vector<2x32xf32>, vector<32x32xf32>, vector<2x32xf32> -> vector<2x32xf32>
    %43 = arith.addf %41, %42 : vector<2x32xf32>
    %44 = arith.negf %43 : vector<2x32xf32>
    %45 = math.exp %44 : vector<2x32xf32>
    %cst_44 = arith.constant 1.000000e+00 : f32
    %46 = vector.broadcast %cst_44 : f32 to vector<2x32xf32>
    %47 = arith.addf %46, %45 : vector<2x32xf32>
    %48 = arith.divf %46, %47 : vector<2x32xf32>
    %49 = vector.extract_strided_slice %14 {offsets = [0, 0], sizes = [2, 32], strides = [1, 1]} : vector<16x32xf32> to vector<2x32xf32>
    %cst_45 = arith.constant dense<0.000000e+00> : vector<2x32xf32>
    %50 = tpu.matmul %38, %32, %cst_45 {dimension_numbers = #tpu.dot_dimension_numbers<[1], [0], [0], [1], [0, 0, 1, 1], [], []>} : vector<2x32xf32>, vector<32x32xf32>, vector<2x32xf32> -> vector<2x32xf32>
    %51 = arith.addf %49, %50 : vector<2x32xf32>
    %52 = arith.negf %51 : vector<2x32xf32>
    %53 = math.exp %52 : vector<2x32xf32>
    %cst_46 = arith.constant 1.000000e+00 : f32
    %54 = vector.broadcast %cst_46 : f32 to vector<2x32xf32>
    %55 = arith.addf %54, %53 : vector<2x32xf32>
    %56 = arith.divf %54, %55 : vector<2x32xf32>
    %57 = vector.extract_strided_slice %21 {offsets = [0, 0], sizes = [2, 32], strides = [1, 1]} : vector<16x32xf32> to vector<2x32xf32>
    %cst_47 = arith.constant dense<0.000000e+00> : vector<2x32xf32>
    %58 = tpu.matmul %38, %34, %cst_47 {dimension_numbers = #tpu.dot_dimension_numbers<[1], [0], [0], [1], [0, 0, 1, 1], [], []>} : vector<2x32xf32>, vector<32x32xf32>, vector<2x32xf32> -> vector<2x32xf32>
    %59 = arith.addf %57, %58 : vector<2x32xf32>
    %60 = math.tanh %59 : vector<2x32xf32>
    %61 = vector.extract_strided_slice %28 {offsets = [0, 0], sizes = [2, 32], strides = [1, 1]} : vector<16x32xf32> to vector<2x32xf32>
    %cst_48 = arith.constant dense<0.000000e+00> : vector<2x32xf32>
    %62 = tpu.matmul %38, %36, %cst_48 {dimension_numbers = #tpu.dot_dimension_numbers<[1], [0], [0], [1], [0, 0, 1, 1], [], []>} : vector<2x32xf32>, vector<32x32xf32>, vector<2x32xf32> -> vector<2x32xf32>
    %63 = arith.addf %61, %62 : vector<2x32xf32>
    %64 = arith.negf %63 : vector<2x32xf32>
    %65 = math.exp %64 : vector<2x32xf32>
    %cst_49 = arith.constant 1.000000e+00 : f32
    %66 = vector.broadcast %cst_49 : f32 to vector<2x32xf32>
    %67 = arith.addf %66, %65 : vector<2x32xf32>
    %68 = arith.divf %66, %67 : vector<2x32xf32>
    %69 = arith.mulf %56, %40 : vector<2x32xf32>
    %70 = arith.mulf %48, %60 : vector<2x32xf32>
    %71 = arith.addf %69, %70 : vector<2x32xf32>
    %72 = math.tanh %71 : vector<2x32xf32>
    %73 = arith.mulf %68, %72 : vector<2x32xf32>
    %c0_50 = arith.constant 0 : index
    %c0_51 = arith.constant 0 : index
    %74 = vector.load %arg14[%c0_50, %c0_51] : memref<16x32xf32, #tpu.memory_space<vmem>>, vector<2x32xf32>
    tpu.vector_store %arg14[%c0_50, %c0_51], %73 {strides = array<i32>} : memref<16x32xf32, #tpu.memory_space<vmem>>, vector<2x32xf32>,
    %75 = vector.extract_strided_slice %7 {offsets = [2, 0], sizes = [2, 32], strides = [1, 1]} : vector<16x32xf32> to vector<2x32xf32>
    %cst_52 = arith.constant dense<0.000000e+00> : vector<2x32xf32>
    %76 = tpu.matmul %73, %30, %cst_52 {dimension_numbers = #tpu.dot_dimension_numbers<[1], [0], [0], [1], [0, 0, 1, 1], [], []>} : vector<2x32xf32>, vector<32x32xf32>, vector<2x32xf32> -> vector<2x32xf32>
    %77 = arith.addf %75, %76 : vector<2x32xf32>
    %78 = arith.negf %77 : vector<2x32xf32>
    %79 = math.exp %78 : vector<2x32xf32>
    %cst_53 = arith.constant 1.000000e+00 : f32
    %80 = vector.broadcast %cst_53 : f32 to vector<2x32xf32>
    %81 = arith.addf %80, %79 : vector<2x32xf32>
    %82 = arith.divf %80, %81 : vector<2x32xf32>
    %83 = vector.extract_strided_slice %14 {offsets = [2, 0], sizes = [2, 32], strides = [1, 1]} : vector<16x32xf32> to vector<2x32xf32>
    %cst_54 = arith.constant dense<0.000000e+00> : vector<2x32xf32>
    %84 = tpu.matmul %73, %32, %cst_54 {dimension_numbers = #tpu.dot_dimension_numbers<[1], [0], [0], [1], [0, 0, 1, 1], [], []>} : vector<2x32xf32>, vector<32x32xf32>, vector<2x32xf32> -> vector<2x32xf32>
    %85 = arith.addf %83, %84 : vector<2x32xf32>
    %86 = arith.negf %85 : vector<2x32xf32>
    %87 = math.exp %86 : vector<2x32xf32>
    %cst_55 = arith.constant 1.000000e+00 : f32
    %88 = vector.broadcast %cst_55 : f32 to vector<2x32xf32>
    %89 = arith.addf %88, %87 : vector<2x32xf32>
    %90 = arith.divf %88, %89 : vector<2x32xf32>
    %91 = vector.extract_strided_slice %21 {offsets = [2, 0], sizes = [2, 32], strides = [1, 1]} : vector<16x32xf32> to vector<2x32xf32>
    %cst_56 = arith.constant dense<0.000000e+00> : vector<2x32xf32>
    %92 = tpu.matmul %73, %34, %cst_56 {dimension_numbers = #tpu.dot_dimension_numbers<[1], [0], [0], [1], [0, 0, 1, 1], [], []>} : vector<2x32xf32>, vector<32x32xf32>, vector<2x32xf32> -> vector<2x32xf32>
    %93 = arith.addf %91, %92 : vector<2x32xf32>
    %94 = math.tanh %93 : vector<2x32xf32>
    %95 = vector.extract_strided_slice %28 {offsets = [2, 0], sizes = [2, 32], strides = [1, 1]} : vector<16x32xf32> to vector<2x32xf32>
    %cst_57 = arith.constant dense<0.000000e+00> : vector<2x32xf32>
    %96 = tpu.matmul %73, %36, %cst_57 {dimension_numbers = #tpu.dot_dimension_numbers<[1], [0], [0], [1], [0, 0, 1, 1], [], []>} : vector<2x32xf32>, vector<32x32xf32>, vector<2x32xf32> -> vector<2x32xf32>
    %97 = arith.addf %95, %96 : vector<2x32xf32>
    %98 = arith.negf %97 : vector<2x32xf32>
    %99 = math.exp %98 : vector<2x32xf32>
    %cst_58 = arith.constant 1.000000e+00 : f32
    %100 = vector.broadcast %cst_58 : f32 to vector<2x32xf32>
    %101 = arith.addf %100, %99 : vector<2x32xf32>
    %102 = arith.divf %100, %101 : vector<2x32xf32>
    %103 = arith.mulf %90, %71 : vector<2x32xf32>
    %104 = arith.mulf %82, %94 : vector<2x32xf32>
    %105 = arith.addf %103, %104 : vector<2x32xf32>
    %106 = math.tanh %105 : vector<2x32xf32>
    %107 = arith.mulf %102, %106 : vector<2x32xf32>
    %c2_59 = arith.constant 2 : index
    %c0_60 = arith.constant 0 : index
    %108 = vector.load %arg14[%c2_59, %c0_60] : memref<16x32xf32, #tpu.memory_space<vmem>>, vector<2x32xf32>
    tpu.vector_store %arg14[%c2_59, %c0_60], %107 {strides = array<i32>} : memref<16x32xf32, #tpu.memory_space<vmem>>, vector<2x32xf32>,
    %109 = vector.extract_strided_slice %7 {offsets = [4, 0], sizes = [2, 32], strides = [1, 1]} : vector<16x32xf32> to vector<2x32xf32>
    %cst_61 = arith.constant dense<0.000000e+00> : vector<2x32xf32>
    %110 = tpu.matmul %107, %30, %cst_61 {dimension_numbers = #tpu.dot_dimension_numbers<[1], [0], [0], [1], [0, 0, 1, 1], [], []>} : vector<2x32xf32>, vector<32x32xf32>, vector<2x32xf32> -> vector<2x32xf32>
    %111 = arith.addf %109, %110 : vector<2x32xf32>
    %112 = arith.negf %111 : vector<2x32xf32>
    %113 = math.exp %112 : vector<2x32xf32>
    %cst_62 = arith.constant 1.000000e+00 : f32
    %114 = vector.broadcast %cst_62 : f32 to vector<2x32xf32>
    %115 = arith.addf %114, %113 : vector<2x32xf32>
    %116 = arith.divf %114, %115 : vector<2x32xf32>
    %117 = vector.extract_strided_slice %14 {offsets = [4, 0], sizes = [2, 32], strides = [1, 1]} : vector<16x32xf32> to vector<2x32xf32>
    %cst_63 = arith.constant dense<0.000000e+00> : vector<2x32xf32>
    %118 = tpu.matmul %107, %32, %cst_63 {dimension_numbers = #tpu.dot_dimension_numbers<[1], [0], [0], [1], [0, 0, 1, 1], [], []>} : vector<2x32xf32>, vector<32x32xf32>, vector<2x32xf32> -> vector<2x32xf32>
    %119 = arith.addf %117, %118 : vector<2x32xf32>
    %120 = arith.negf %119 : vector<2x32xf32>
    %121 = math.exp %120 : vector<2x32xf32>
    %cst_64 = arith.constant 1.000000e+00 : f32
    %122 = vector.broadcast %cst_64 : f32 to vector<2x32xf32>
    %123 = arith.addf %122, %121 : vector<2x32xf32>
    %124 = arith.divf %122, %123 : vector<2x32xf32>
    %125 = vector.extract_strided_slice %21 {offsets = [4, 0], sizes = [2, 32], strides = [1, 1]} : vector<16x32xf32> to vector<2x32xf32>
    %cst_65 = arith.constant dense<0.000000e+00> : vector<2x32xf32>
    %126 = tpu.matmul %107, %34, %cst_65 {dimension_numbers = #tpu.dot_dimension_numbers<[1], [0], [0], [1], [0, 0, 1, 1], [], []>} : vector<2x32xf32>, vector<32x32xf32>, vector<2x32xf32> -> vector<2x32xf32>
    %127 = arith.addf %125, %126 : vector<2x32xf32>
    %128 = math.tanh %127 : vector<2x32xf32>
    %129 = vector.extract_strided_slice %28 {offsets = [4, 0], sizes = [2, 32], strides = [1, 1]} : vector<16x32xf32> to vector<2x32xf32>
    %cst_66 = arith.constant dense<0.000000e+00> : vector<2x32xf32>
    %130 = tpu.matmul %107, %36, %cst_66 {dimension_numbers = #tpu.dot_dimension_numbers<[1], [0], [0], [1], [0, 0, 1, 1], [], []>} : vector<2x32xf32>, vector<32x32xf32>, vector<2x32xf32> -> vector<2x32xf32>
    %131 = arith.addf %129, %130 : vector<2x32xf32>
    %132 = arith.negf %131 : vector<2x32xf32>
    %133 = math.exp %132 : vector<2x32xf32>
    %cst_67 = arith.constant 1.000000e+00 : f32
    %134 = vector.broadcast %cst_67 : f32 to vector<2x32xf32>
    %135 = arith.addf %134, %133 : vector<2x32xf32>
    %136 = arith.divf %134, %135 : vector<2x32xf32>
    %137 = arith.mulf %124, %105 : vector<2x32xf32>
    %138 = arith.mulf %116, %128 : vector<2x32xf32>
    %139 = arith.addf %137, %138 : vector<2x32xf32>
    %140 = math.tanh %139 : vector<2x32xf32>
    %141 = arith.mulf %136, %140 : vector<2x32xf32>
    %c4 = arith.constant 4 : index
    %c0_68 = arith.constant 0 : index
    %142 = vector.load %arg14[%c4, %c0_68] : memref<16x32xf32, #tpu.memory_space<vmem>>, vector<2x32xf32>
    tpu.vector_store %arg14[%c4, %c0_68], %141 {strides = array<i32>} : memref<16x32xf32, #tpu.memory_space<vmem>>, vector<2x32xf32>,
    %143 = vector.extract_strided_slice %7 {offsets = [6, 0], sizes = [2, 32], strides = [1, 1]} : vector<16x32xf32> to vector<2x32xf32>
    %cst_69 = arith.constant dense<0.000000e+00> : vector<2x32xf32>
    %144 = tpu.matmul %141, %30, %cst_69 {dimension_numbers = #tpu.dot_dimension_numbers<[1], [0], [0], [1], [0, 0, 1, 1], [], []>} : vector<2x32xf32>, vector<32x32xf32>, vector<2x32xf32> -> vector<2x32xf32>
    %145 = arith.addf %143, %144 : vector<2x32xf32>
    %146 = arith.negf %145 : vector<2x32xf32>
    %147 = math.exp %146 : vector<2x32xf32>
    %cst_70 = arith.constant 1.000000e+00 : f32
    %148 = vector.broadcast %cst_70 : f32 to vector<2x32xf32>
    %149 = arith.addf %148, %147 : vector<2x32xf32>
    %150 = arith.divf %148, %149 : vector<2x32xf32>
    %151 = vector.extract_strided_slice %14 {offsets = [6, 0], sizes = [2, 32], strides = [1, 1]} : vector<16x32xf32> to vector<2x32xf32>
    %cst_71 = arith.constant dense<0.000000e+00> : vector<2x32xf32>
    %152 = tpu.matmul %141, %32, %cst_71 {dimension_numbers = #tpu.dot_dimension_numbers<[1], [0], [0], [1], [0, 0, 1, 1], [], []>} : vector<2x32xf32>, vector<32x32xf32>, vector<2x32xf32> -> vector<2x32xf32>
    %153 = arith.addf %151, %152 : vector<2x32xf32>
    %154 = arith.negf %153 : vector<2x32xf32>
    %155 = math.exp %154 : vector<2x32xf32>
    %cst_72 = arith.constant 1.000000e+00 : f32
    %156 = vector.broadcast %cst_72 : f32 to vector<2x32xf32>
    %157 = arith.addf %156, %155 : vector<2x32xf32>
    %158 = arith.divf %156, %157 : vector<2x32xf32>
    %159 = vector.extract_strided_slice %21 {offsets = [6, 0], sizes = [2, 32], strides = [1, 1]} : vector<16x32xf32> to vector<2x32xf32>
    %cst_73 = arith.constant dense<0.000000e+00> : vector<2x32xf32>
    %160 = tpu.matmul %141, %34, %cst_73 {dimension_numbers = #tpu.dot_dimension_numbers<[1], [0], [0], [1], [0, 0, 1, 1], [], []>} : vector<2x32xf32>, vector<32x32xf32>, vector<2x32xf32> -> vector<2x32xf32>
    %161 = arith.addf %159, %160 : vector<2x32xf32>
    %162 = math.tanh %161 : vector<2x32xf32>
    %163 = vector.extract_strided_slice %28 {offsets = [6, 0], sizes = [2, 32], strides = [1, 1]} : vector<16x32xf32> to vector<2x32xf32>
    %cst_74 = arith.constant dense<0.000000e+00> : vector<2x32xf32>
    %164 = tpu.matmul %141, %36, %cst_74 {dimension_numbers = #tpu.dot_dimension_numbers<[1], [0], [0], [1], [0, 0, 1, 1], [], []>} : vector<2x32xf32>, vector<32x32xf32>, vector<2x32xf32> -> vector<2x32xf32>
    %165 = arith.addf %163, %164 : vector<2x32xf32>
    %166 = arith.negf %165 : vector<2x32xf32>
    %167 = math.exp %166 : vector<2x32xf32>
    %cst_75 = arith.constant 1.000000e+00 : f32
    %168 = vector.broadcast %cst_75 : f32 to vector<2x32xf32>
    %169 = arith.addf %168, %167 : vector<2x32xf32>
    %170 = arith.divf %168, %169 : vector<2x32xf32>
    %171 = arith.mulf %158, %139 : vector<2x32xf32>
    %172 = arith.mulf %150, %162 : vector<2x32xf32>
    %173 = arith.addf %171, %172 : vector<2x32xf32>
    %174 = math.tanh %173 : vector<2x32xf32>
    %175 = arith.mulf %170, %174 : vector<2x32xf32>
    %c6 = arith.constant 6 : index
    %c0_76 = arith.constant 0 : index
    %176 = vector.load %arg14[%c6, %c0_76] : memref<16x32xf32, #tpu.memory_space<vmem>>, vector<2x32xf32>
    tpu.vector_store %arg14[%c6, %c0_76], %175 {strides = array<i32>} : memref<16x32xf32, #tpu.memory_space<vmem>>, vector<2x32xf32>,
    %177 = vector.extract_strided_slice %7 {offsets = [8, 0], sizes = [2, 32], strides = [1, 1]} : vector<16x32xf32> to vector<2x32xf32>
    %cst_77 = arith.constant dense<0.000000e+00> : vector<2x32xf32>
    %178 = tpu.matmul %175, %30, %cst_77 {dimension_numbers = #tpu.dot_dimension_numbers<[1], [0], [0], [1], [0, 0, 1, 1], [], []>} : vector<2x32xf32>, vector<32x32xf32>, vector<2x32xf32> -> vector<2x32xf32>
    %179 = arith.addf %177, %178 : vector<2x32xf32>
    %180 = arith.negf %179 : vector<2x32xf32>
    %181 = math.exp %180 : vector<2x32xf32>
    %cst_78 = arith.constant 1.000000e+00 : f32
    %182 = vector.broadcast %cst_78 : f32 to vector<2x32xf32>
    %183 = arith.addf %182, %181 : vector<2x32xf32>
    %184 = arith.divf %182, %183 : vector<2x32xf32>
    %185 = vector.extract_strided_slice %14 {offsets = [8, 0], sizes = [2, 32], strides = [1, 1]} : vector<16x32xf32> to vector<2x32xf32>
    %cst_79 = arith.constant dense<0.000000e+00> : vector<2x32xf32>
    %186 = tpu.matmul %175, %32, %cst_79 {dimension_numbers = #tpu.dot_dimension_numbers<[1], [0], [0], [1], [0, 0, 1, 1], [], []>} : vector<2x32xf32>, vector<32x32xf32>, vector<2x32xf32> -> vector<2x32xf32>
    %187 = arith.addf %185, %186 : vector<2x32xf32>
    %188 = arith.negf %187 : vector<2x32xf32>
    %189 = math.exp %188 : vector<2x32xf32>
    %cst_80 = arith.constant 1.000000e+00 : f32
    %190 = vector.broadcast %cst_80 : f32 to vector<2x32xf32>
    %191 = arith.addf %190, %189 : vector<2x32xf32>
    %192 = arith.divf %190, %191 : vector<2x32xf32>
    %193 = vector.extract_strided_slice %21 {offsets = [8, 0], sizes = [2, 32], strides = [1, 1]} : vector<16x32xf32> to vector<2x32xf32>
    %cst_81 = arith.constant dense<0.000000e+00> : vector<2x32xf32>
    %194 = tpu.matmul %175, %34, %cst_81 {dimension_numbers = #tpu.dot_dimension_numbers<[1], [0], [0], [1], [0, 0, 1, 1], [], []>} : vector<2x32xf32>, vector<32x32xf32>, vector<2x32xf32> -> vector<2x32xf32>
    %195 = arith.addf %193, %194 : vector<2x32xf32>
    %196 = math.tanh %195 : vector<2x32xf32>
    %197 = vector.extract_strided_slice %28 {offsets = [8, 0], sizes = [2, 32], strides = [1, 1]} : vector<16x32xf32> to vector<2x32xf32>
    %cst_82 = arith.constant dense<0.000000e+00> : vector<2x32xf32>
    %198 = tpu.matmul %175, %36, %cst_82 {dimension_numbers = #tpu.dot_dimension_numbers<[1], [0], [0], [1], [0, 0, 1, 1], [], []>} : vector<2x32xf32>, vector<32x32xf32>, vector<2x32xf32> -> vector<2x32xf32>
    %199 = arith.addf %197, %198 : vector<2x32xf32>
    %200 = arith.negf %199 : vector<2x32xf32>
    %201 = math.exp %200 : vector<2x32xf32>
    %cst_83 = arith.constant 1.000000e+00 : f32
    %202 = vector.broadcast %cst_83 : f32 to vector<2x32xf32>
    %203 = arith.addf %202, %201 : vector<2x32xf32>
    %204 = arith.divf %202, %203 : vector<2x32xf32>
    %205 = arith.mulf %192, %173 : vector<2x32xf32>
    %206 = arith.mulf %184, %196 : vector<2x32xf32>
    %207 = arith.addf %205, %206 : vector<2x32xf32>
    %208 = math.tanh %207 : vector<2x32xf32>
    %209 = arith.mulf %204, %208 : vector<2x32xf32>
    %c8 = arith.constant 8 : index
    %c0_84 = arith.constant 0 : index
    %210 = vector.load %arg14[%c8, %c0_84] : memref<16x32xf32, #tpu.memory_space<vmem>>, vector<2x32xf32>
    tpu.vector_store %arg14[%c8, %c0_84], %209 {strides = array<i32>} : memref<16x32xf32, #tpu.memory_space<vmem>>, vector<2x32xf32>,
    %211 = vector.extract_strided_slice %7 {offsets = [10, 0], sizes = [2, 32], strides = [1, 1]} : vector<16x32xf32> to vector<2x32xf32>
    %cst_85 = arith.constant dense<0.000000e+00> : vector<2x32xf32>
    %212 = tpu.matmul %209, %30, %cst_85 {dimension_numbers = #tpu.dot_dimension_numbers<[1], [0], [0], [1], [0, 0, 1, 1], [], []>} : vector<2x32xf32>, vector<32x32xf32>, vector<2x32xf32> -> vector<2x32xf32>
    %213 = arith.addf %211, %212 : vector<2x32xf32>
    %214 = arith.negf %213 : vector<2x32xf32>
    %215 = math.exp %214 : vector<2x32xf32>
    %cst_86 = arith.constant 1.000000e+00 : f32
    %216 = vector.broadcast %cst_86 : f32 to vector<2x32xf32>
    %217 = arith.addf %216, %215 : vector<2x32xf32>
    %218 = arith.divf %216, %217 : vector<2x32xf32>
    %219 = vector.extract_strided_slice %14 {offsets = [10, 0], sizes = [2, 32], strides = [1, 1]} : vector<16x32xf32> to vector<2x32xf32>
    %cst_87 = arith.constant dense<0.000000e+00> : vector<2x32xf32>
    %220 = tpu.matmul %209, %32, %cst_87 {dimension_numbers = #tpu.dot_dimension_numbers<[1], [0], [0], [1], [0, 0, 1, 1], [], []>} : vector<2x32xf32>, vector<32x32xf32>, vector<2x32xf32> -> vector<2x32xf32>
    %221 = arith.addf %219, %220 : vector<2x32xf32>
    %222 = arith.negf %221 : vector<2x32xf32>
    %223 = math.exp %222 : vector<2x32xf32>
    %cst_88 = arith.constant 1.000000e+00 : f32
    %224 = vector.broadcast %cst_88 : f32 to vector<2x32xf32>
    %225 = arith.addf %224, %223 : vector<2x32xf32>
    %226 = arith.divf %224, %225 : vector<2x32xf32>
    %227 = vector.extract_strided_slice %21 {offsets = [10, 0], sizes = [2, 32], strides = [1, 1]} : vector<16x32xf32> to vector<2x32xf32>
    %cst_89 = arith.constant dense<0.000000e+00> : vector<2x32xf32>
    %228 = tpu.matmul %209, %34, %cst_89 {dimension_numbers = #tpu.dot_dimension_numbers<[1], [0], [0], [1], [0, 0, 1, 1], [], []>} : vector<2x32xf32>, vector<32x32xf32>, vector<2x32xf32> -> vector<2x32xf32>
    %229 = arith.addf %227, %228 : vector<2x32xf32>
    %230 = math.tanh %229 : vector<2x32xf32>
    %231 = vector.extract_strided_slice %28 {offsets = [10, 0], sizes = [2, 32], strides = [1, 1]} : vector<16x32xf32> to vector<2x32xf32>
    %cst_90 = arith.constant dense<0.000000e+00> : vector<2x32xf32>
    %232 = tpu.matmul %209, %36, %cst_90 {dimension_numbers = #tpu.dot_dimension_numbers<[1], [0], [0], [1], [0, 0, 1, 1], [], []>} : vector<2x32xf32>, vector<32x32xf32>, vector<2x32xf32> -> vector<2x32xf32>
    %233 = arith.addf %231, %232 : vector<2x32xf32>
    %234 = arith.negf %233 : vector<2x32xf32>
    %235 = math.exp %234 : vector<2x32xf32>
    %cst_91 = arith.constant 1.000000e+00 : f32
    %236 = vector.broadcast %cst_91 : f32 to vector<2x32xf32>
    %237 = arith.addf %236, %235 : vector<2x32xf32>
    %238 = arith.divf %236, %237 : vector<2x32xf32>
    %239 = arith.mulf %226, %207 : vector<2x32xf32>
    %240 = arith.mulf %218, %230 : vector<2x32xf32>
    %241 = arith.addf %239, %240 : vector<2x32xf32>
    %242 = math.tanh %241 : vector<2x32xf32>
    %243 = arith.mulf %238, %242 : vector<2x32xf32>
    %c10 = arith.constant 10 : index
    %c0_92 = arith.constant 0 : index
    %244 = vector.load %arg14[%c10, %c0_92] : memref<16x32xf32, #tpu.memory_space<vmem>>, vector<2x32xf32>
    tpu.vector_store %arg14[%c10, %c0_92], %243 {strides = array<i32>} : memref<16x32xf32, #tpu.memory_space<vmem>>, vector<2x32xf32>,
    %245 = vector.extract_strided_slice %7 {offsets = [12, 0], sizes = [2, 32], strides = [1, 1]} : vector<16x32xf32> to vector<2x32xf32>
    %cst_93 = arith.constant dense<0.000000e+00> : vector<2x32xf32>
    %246 = tpu.matmul %243, %30, %cst_93 {dimension_numbers = #tpu.dot_dimension_numbers<[1], [0], [0], [1], [0, 0, 1, 1], [], []>} : vector<2x32xf32>, vector<32x32xf32>, vector<2x32xf32> -> vector<2x32xf32>
    %247 = arith.addf %245, %246 : vector<2x32xf32>
    %248 = arith.negf %247 : vector<2x32xf32>
    %249 = math.exp %248 : vector<2x32xf32>
    %cst_94 = arith.constant 1.000000e+00 : f32
    %250 = vector.broadcast %cst_94 : f32 to vector<2x32xf32>
    %251 = arith.addf %250, %249 : vector<2x32xf32>
    %252 = arith.divf %250, %251 : vector<2x32xf32>
    %253 = vector.extract_strided_slice %14 {offsets = [12, 0], sizes = [2, 32], strides = [1, 1]} : vector<16x32xf32> to vector<2x32xf32>
    %cst_95 = arith.constant dense<0.000000e+00> : vector<2x32xf32>
    %254 = tpu.matmul %243, %32, %cst_95 {dimension_numbers = #tpu.dot_dimension_numbers<[1], [0], [0], [1], [0, 0, 1, 1], [], []>} : vector<2x32xf32>, vector<32x32xf32>, vector<2x32xf32> -> vector<2x32xf32>
    %255 = arith.addf %253, %254 : vector<2x32xf32>
    %256 = arith.negf %255 : vector<2x32xf32>
    %257 = math.exp %256 : vector<2x32xf32>
    %cst_96 = arith.constant 1.000000e+00 : f32
    %258 = vector.broadcast %cst_96 : f32 to vector<2x32xf32>
    %259 = arith.addf %258, %257 : vector<2x32xf32>
    %260 = arith.divf %258, %259 : vector<2x32xf32>
    %261 = vector.extract_strided_slice %21 {offsets = [12, 0], sizes = [2, 32], strides = [1, 1]} : vector<16x32xf32> to vector<2x32xf32>
    %cst_97 = arith.constant dense<0.000000e+00> : vector<2x32xf32>
    %262 = tpu.matmul %243, %34, %cst_97 {dimension_numbers = #tpu.dot_dimension_numbers<[1], [0], [0], [1], [0, 0, 1, 1], [], []>} : vector<2x32xf32>, vector<32x32xf32>, vector<2x32xf32> -> vector<2x32xf32>
    %263 = arith.addf %261, %262 : vector<2x32xf32>
    %264 = math.tanh %263 : vector<2x32xf32>
    %265 = vector.extract_strided_slice %28 {offsets = [12, 0], sizes = [2, 32], strides = [1, 1]} : vector<16x32xf32> to vector<2x32xf32>
    %cst_98 = arith.constant dense<0.000000e+00> : vector<2x32xf32>
    %266 = tpu.matmul %243, %36, %cst_98 {dimension_numbers = #tpu.dot_dimension_numbers<[1], [0], [0], [1], [0, 0, 1, 1], [], []>} : vector<2x32xf32>, vector<32x32xf32>, vector<2x32xf32> -> vector<2x32xf32>
    %267 = arith.addf %265, %266 : vector<2x32xf32>
    %268 = arith.negf %267 : vector<2x32xf32>
    %269 = math.exp %268 : vector<2x32xf32>
    %cst_99 = arith.constant 1.000000e+00 : f32
    %270 = vector.broadcast %cst_99 : f32 to vector<2x32xf32>
    %271 = arith.addf %270, %269 : vector<2x32xf32>
    %272 = arith.divf %270, %271 : vector<2x32xf32>
    %273 = arith.mulf %260, %241 : vector<2x32xf32>
    %274 = arith.mulf %252, %264 : vector<2x32xf32>
    %275 = arith.addf %273, %274 : vector<2x32xf32>
    %276 = math.tanh %275 : vector<2x32xf32>
    %277 = arith.mulf %272, %276 : vector<2x32xf32>
    %c12 = arith.constant 12 : index
    %c0_100 = arith.constant 0 : index
    %278 = vector.load %arg14[%c12, %c0_100] : memref<16x32xf32, #tpu.memory_space<vmem>>, vector<2x32xf32>
    tpu.vector_store %arg14[%c12, %c0_100], %277 {strides = array<i32>} : memref<16x32xf32, #tpu.memory_space<vmem>>, vector<2x32xf32>,
    %279 = vector.extract_strided_slice %7 {offsets = [14, 0], sizes = [2, 32], strides = [1, 1]} : vector<16x32xf32> to vector<2x32xf32>
    %cst_101 = arith.constant dense<0.000000e+00> : vector<2x32xf32>
    %280 = tpu.matmul %277, %30, %cst_101 {dimension_numbers = #tpu.dot_dimension_numbers<[1], [0], [0], [1], [0, 0, 1, 1], [], []>} : vector<2x32xf32>, vector<32x32xf32>, vector<2x32xf32> -> vector<2x32xf32>
    %281 = arith.addf %279, %280 : vector<2x32xf32>
    %282 = arith.negf %281 : vector<2x32xf32>
    %283 = math.exp %282 : vector<2x32xf32>
    %cst_102 = arith.constant 1.000000e+00 : f32
    %284 = vector.broadcast %cst_102 : f32 to vector<2x32xf32>
    %285 = arith.addf %284, %283 : vector<2x32xf32>
    %286 = arith.divf %284, %285 : vector<2x32xf32>
    %287 = vector.extract_strided_slice %14 {offsets = [14, 0], sizes = [2, 32], strides = [1, 1]} : vector<16x32xf32> to vector<2x32xf32>
    %cst_103 = arith.constant dense<0.000000e+00> : vector<2x32xf32>
    %288 = tpu.matmul %277, %32, %cst_103 {dimension_numbers = #tpu.dot_dimension_numbers<[1], [0], [0], [1], [0, 0, 1, 1], [], []>} : vector<2x32xf32>, vector<32x32xf32>, vector<2x32xf32> -> vector<2x32xf32>
    %289 = arith.addf %287, %288 : vector<2x32xf32>
    %290 = arith.negf %289 : vector<2x32xf32>
    %291 = math.exp %290 : vector<2x32xf32>
    %cst_104 = arith.constant 1.000000e+00 : f32
    %292 = vector.broadcast %cst_104 : f32 to vector<2x32xf32>
    %293 = arith.addf %292, %291 : vector<2x32xf32>
    %294 = arith.divf %292, %293 : vector<2x32xf32>
    %295 = vector.extract_strided_slice %21 {offsets = [14, 0], sizes = [2, 32], strides = [1, 1]} : vector<16x32xf32> to vector<2x32xf32>
    %cst_105 = arith.constant dense<0.000000e+00> : vector<2x32xf32>
    %296 = tpu.matmul %277, %34, %cst_105 {dimension_numbers = #tpu.dot_dimension_numbers<[1], [0], [0], [1], [0, 0, 1, 1], [], []>} : vector<2x32xf32>, vector<32x32xf32>, vector<2x32xf32> -> vector<2x32xf32>
    %297 = arith.addf %295, %296 : vector<2x32xf32>
    %298 = math.tanh %297 : vector<2x32xf32>
    %299 = vector.extract_strided_slice %28 {offsets = [14, 0], sizes = [2, 32], strides = [1, 1]} : vector<16x32xf32> to vector<2x32xf32>
    %cst_106 = arith.constant dense<0.000000e+00> : vector<2x32xf32>
    %300 = tpu.matmul %277, %36, %cst_106 {dimension_numbers = #tpu.dot_dimension_numbers<[1], [0], [0], [1], [0, 0, 1, 1], [], []>} : vector<2x32xf32>, vector<32x32xf32>, vector<2x32xf32> -> vector<2x32xf32>
    %301 = arith.addf %299, %300 : vector<2x32xf32>
    %302 = arith.negf %301 : vector<2x32xf32>
    %303 = math.exp %302 : vector<2x32xf32>
    %cst_107 = arith.constant 1.000000e+00 : f32
    %304 = vector.broadcast %cst_107 : f32 to vector<2x32xf32>
    %305 = arith.addf %304, %303 : vector<2x32xf32>
    %306 = arith.divf %304, %305 : vector<2x32xf32>
    %307 = arith.mulf %294, %275 : vector<2x32xf32>
    %308 = arith.mulf %286, %298 : vector<2x32xf32>
    %309 = arith.addf %307, %308 : vector<2x32xf32>
    %310 = math.tanh %309 : vector<2x32xf32>
    %311 = arith.mulf %306, %310 : vector<2x32xf32>
    %c14 = arith.constant 14 : index
    %c0_108 = arith.constant 0 : index
    %312 = vector.load %arg14[%c14, %c0_108] : memref<16x32xf32, #tpu.memory_space<vmem>>, vector<2x32xf32>
    tpu.vector_store %arg14[%c14, %c0_108], %311 {strides = array<i32>} : memref<16x32xf32, #tpu.memory_space<vmem>>, vector<2x32xf32>,
    %c0_109 = arith.constant 0 : index
    %c0_110 = arith.constant 0 : index
    %c0_111 = arith.constant 0 : index
    %313 = vector.load %arg12[%c0_109, %c0_110, %c0_111] : memref<2x2x32xf32, #tpu.memory_space<vmem>>, vector<1x2x32xf32>
    %314 = vector.shape_cast %313 : vector<1x2x32xf32> to vector<2x32xf32>
    %315 = vector.shape_cast %311 : vector<2x32xf32> to vector<1x2x32xf32>
    tpu.vector_store %arg12[%c0_109, %c0_110, %c0_111], %315 {strides = array<i32>} : memref<2x2x32xf32, #tpu.memory_space<vmem>>, vector<1x2x32xf32>,
    %c0_112 = arith.constant 0 : index
    %c0_113 = arith.constant 0 : index
    %c0_114 = arith.constant 0 : index
    %316 = vector.load %arg13[%c0_112, %c0_113, %c0_114] : memref<2x2x32xf32, #tpu.memory_space<vmem>>, vector<1x2x32xf32>
    %317 = vector.shape_cast %316 : vector<1x2x32xf32> to vector<2x32xf32>
    %318 = vector.shape_cast %309 : vector<2x32xf32> to vector<1x2x32xf32>
    tpu.vector_store %arg13[%c0_112, %c0_113, %c0_114], %318 {strides = array<i32>} : memref<2x2x32xf32, #tpu.memory_space<vmem>>, vector<1x2x32xf32>,
    %c0_115 = arith.constant 0 : index
    %c0_116 = arith.constant 0 : index
    %319 = vector.load %arg14[%c0_115, %c0_116] : memref<16x32xf32, #tpu.memory_space<vmem>>, vector<16x32xf32>
    %c0_117 = arith.constant 0 : index
    %c0_118 = arith.constant 0 : index
    %c0_119 = arith.constant 0 : index
    %320 = vector.load %arg4[%c0_117, %c0_118, %c0_119] : memref<4x32x32xf32, #tpu.memory_space<vmem>>, vector<1x32x32xf32>
    %321 = vector.shape_cast %320 : vector<1x32x32xf32> to vector<32x32xf32>
    %cst_120 = arith.constant dense<0.000000e+00> : vector<16x32xf32>
    %322 = tpu.matmul %319, %321, %cst_120 {dimension_numbers = #tpu.dot_dimension_numbers<[1], [0], [0], [1], [0, 0, 1, 1], [], []>} : vector<16x32xf32>, vector<32x32xf32>, vector<16x32xf32> -> vector<16x32xf32>
    %c0_121 = arith.constant 0 : index
    %c0_122 = arith.constant 0 : index
    %c0_123 = arith.constant 0 : index
    %323 = vector.load %arg6[%c0_121, %c0_122, %c0_123] : memref<4x1x32xf32, #tpu.memory_space<vmem>>, vector<1x1x32xf32>
    %324 = vector.shape_cast %323 : vector<1x1x32xf32> to vector<1x32xf32>
    %325 = vector.broadcast %324 : vector<1x32xf32> to vector<16x32xf32>
    %326 = arith.addf %322, %325 : vector<16x32xf32>
    %c1_124 = arith.constant 1 : index
    %c0_125 = arith.constant 0 : index
    %c0_126 = arith.constant 0 : index
    %327 = vector.load %arg4[%c1_124, %c0_125, %c0_126] : memref<4x32x32xf32, #tpu.memory_space<vmem>>, vector<1x32x32xf32>
    %328 = vector.shape_cast %327 : vector<1x32x32xf32> to vector<32x32xf32>
    %cst_127 = arith.constant dense<0.000000e+00> : vector<16x32xf32>
    %329 = tpu.matmul %319, %328, %cst_127 {dimension_numbers = #tpu.dot_dimension_numbers<[1], [0], [0], [1], [0, 0, 1, 1], [], []>} : vector<16x32xf32>, vector<32x32xf32>, vector<16x32xf32> -> vector<16x32xf32>
    %c1_128 = arith.constant 1 : index
    %c0_129 = arith.constant 0 : index
    %c0_130 = arith.constant 0 : index
    %330 = vector.load %arg6[%c1_128, %c0_129, %c0_130] : memref<4x1x32xf32, #tpu.memory_space<vmem>>, vector<1x1x32xf32>
    %331 = vector.shape_cast %330 : vector<1x1x32xf32> to vector<1x32xf32>
    %332 = vector.broadcast %331 : vector<1x32xf32> to vector<16x32xf32>
    %333 = arith.addf %329, %332 : vector<16x32xf32>
    %c2_131 = arith.constant 2 : index
    %c0_132 = arith.constant 0 : index
    %c0_133 = arith.constant 0 : index
    %334 = vector.load %arg4[%c2_131, %c0_132, %c0_133] : memref<4x32x32xf32, #tpu.memory_space<vmem>>, vector<1x32x32xf32>
    %335 = vector.shape_cast %334 : vector<1x32x32xf32> to vector<32x32xf32>
    %cst_134 = arith.constant dense<0.000000e+00> : vector<16x32xf32>
    %336 = tpu.matmul %319, %335, %cst_134 {dimension_numbers = #tpu.dot_dimension_numbers<[1], [0], [0], [1], [0, 0, 1, 1], [], []>} : vector<16x32xf32>, vector<32x32xf32>, vector<16x32xf32> -> vector<16x32xf32>
    %c2_135 = arith.constant 2 : index
    %c0_136 = arith.constant 0 : index
    %c0_137 = arith.constant 0 : index
    %337 = vector.load %arg6[%c2_135, %c0_136, %c0_137] : memref<4x1x32xf32, #tpu.memory_space<vmem>>, vector<1x1x32xf32>
    %338 = vector.shape_cast %337 : vector<1x1x32xf32> to vector<1x32xf32>
    %339 = vector.broadcast %338 : vector<1x32xf32> to vector<16x32xf32>
    %340 = arith.addf %336, %339 : vector<16x32xf32>
    %c3_138 = arith.constant 3 : index
    %c0_139 = arith.constant 0 : index
    %c0_140 = arith.constant 0 : index
    %341 = vector.load %arg4[%c3_138, %c0_139, %c0_140] : memref<4x32x32xf32, #tpu.memory_space<vmem>>, vector<1x32x32xf32>
    %342 = vector.shape_cast %341 : vector<1x32x32xf32> to vector<32x32xf32>
    %cst_141 = arith.constant dense<0.000000e+00> : vector<16x32xf32>
    %343 = tpu.matmul %319, %342, %cst_141 {dimension_numbers = #tpu.dot_dimension_numbers<[1], [0], [0], [1], [0, 0, 1, 1], [], []>} : vector<16x32xf32>, vector<32x32xf32>, vector<16x32xf32> -> vector<16x32xf32>
    %c3_142 = arith.constant 3 : index
    %c0_143 = arith.constant 0 : index
    %c0_144 = arith.constant 0 : index
    %344 = vector.load %arg6[%c3_142, %c0_143, %c0_144] : memref<4x1x32xf32, #tpu.memory_space<vmem>>, vector<1x1x32xf32>
    %345 = vector.shape_cast %344 : vector<1x1x32xf32> to vector<1x32xf32>
    %346 = vector.broadcast %345 : vector<1x32xf32> to vector<16x32xf32>
    %347 = arith.addf %343, %346 : vector<16x32xf32>
    %c0_145 = arith.constant 0 : index
    %c0_146 = arith.constant 0 : index
    %c0_147 = arith.constant 0 : index
    %348 = vector.load %arg5[%c0_145, %c0_146, %c0_147] : memref<4x32x32xf32, #tpu.memory_space<vmem>>, vector<1x32x32xf32>
    %349 = vector.shape_cast %348 : vector<1x32x32xf32> to vector<32x32xf32>
    %c1_148 = arith.constant 1 : index
    %c0_149 = arith.constant 0 : index
    %c0_150 = arith.constant 0 : index
    %350 = vector.load %arg5[%c1_148, %c0_149, %c0_150] : memref<4x32x32xf32, #tpu.memory_space<vmem>>, vector<1x32x32xf32>
    %351 = vector.shape_cast %350 : vector<1x32x32xf32> to vector<32x32xf32>
    %c2_151 = arith.constant 2 : index
    %c0_152 = arith.constant 0 : index
    %c0_153 = arith.constant 0 : index
    %352 = vector.load %arg5[%c2_151, %c0_152, %c0_153] : memref<4x32x32xf32, #tpu.memory_space<vmem>>, vector<1x32x32xf32>
    %353 = vector.shape_cast %352 : vector<1x32x32xf32> to vector<32x32xf32>
    %c3_154 = arith.constant 3 : index
    %c0_155 = arith.constant 0 : index
    %c0_156 = arith.constant 0 : index
    %354 = vector.load %arg5[%c3_154, %c0_155, %c0_156] : memref<4x32x32xf32, #tpu.memory_space<vmem>>, vector<1x32x32xf32>
    %355 = vector.shape_cast %354 : vector<1x32x32xf32> to vector<32x32xf32>
    %c1_157 = arith.constant 1 : index
    %c0_158 = arith.constant 0 : index
    %c0_159 = arith.constant 0 : index
    %356 = vector.load %arg7[%c1_157, %c0_158, %c0_159] : memref<2x2x32xf32, #tpu.memory_space<vmem>>, vector<1x2x32xf32>
    %357 = vector.shape_cast %356 : vector<1x2x32xf32> to vector<2x32xf32>
    %c1_160 = arith.constant 1 : index
    %c0_161 = arith.constant 0 : index
    %c0_162 = arith.constant 0 : index
    %358 = vector.load %arg8[%c1_160, %c0_161, %c0_162] : memref<2x2x32xf32, #tpu.memory_space<vmem>>, vector<1x2x32xf32>
    %359 = vector.shape_cast %358 : vector<1x2x32xf32> to vector<2x32xf32>
    %360 = vector.extract_strided_slice %326 {offsets = [0, 0], sizes = [2, 32], strides = [1, 1]} : vector<16x32xf32> to vector<2x32xf32>
    %cst_163 = arith.constant dense<0.000000e+00> : vector<2x32xf32>
    %361 = tpu.matmul %357, %349, %cst_163 {dimension_numbers = #tpu.dot_dimension_numbers<[1], [0], [0], [1], [0, 0, 1, 1], [], []>} : vector<2x32xf32>, vector<32x32xf32>, vector<2x32xf32> -> vector<2x32xf32>
    %362 = arith.addf %360, %361 : vector<2x32xf32>
    %363 = arith.negf %362 : vector<2x32xf32>
    %364 = math.exp %363 : vector<2x32xf32>
    %cst_164 = arith.constant 1.000000e+00 : f32
    %365 = vector.broadcast %cst_164 : f32 to vector<2x32xf32>
    %366 = arith.addf %365, %364 : vector<2x32xf32>
    %367 = arith.divf %365, %366 : vector<2x32xf32>
    %368 = vector.extract_strided_slice %333 {offsets = [0, 0], sizes = [2, 32], strides = [1, 1]} : vector<16x32xf32> to vector<2x32xf32>
    %cst_165 = arith.constant dense<0.000000e+00> : vector<2x32xf32>
    %369 = tpu.matmul %357, %351, %cst_165 {dimension_numbers = #tpu.dot_dimension_numbers<[1], [0], [0], [1], [0, 0, 1, 1], [], []>} : vector<2x32xf32>, vector<32x32xf32>, vector<2x32xf32> -> vector<2x32xf32>
    %370 = arith.addf %368, %369 : vector<2x32xf32>
    %371 = arith.negf %370 : vector<2x32xf32>
    %372 = math.exp %371 : vector<2x32xf32>
    %cst_166 = arith.constant 1.000000e+00 : f32
    %373 = vector.broadcast %cst_166 : f32 to vector<2x32xf32>
    %374 = arith.addf %373, %372 : vector<2x32xf32>
    %375 = arith.divf %373, %374 : vector<2x32xf32>
    %376 = vector.extract_strided_slice %340 {offsets = [0, 0], sizes = [2, 32], strides = [1, 1]} : vector<16x32xf32> to vector<2x32xf32>
    %cst_167 = arith.constant dense<0.000000e+00> : vector<2x32xf32>
    %377 = tpu.matmul %357, %353, %cst_167 {dimension_numbers = #tpu.dot_dimension_numbers<[1], [0], [0], [1], [0, 0, 1, 1], [], []>} : vector<2x32xf32>, vector<32x32xf32>, vector<2x32xf32> -> vector<2x32xf32>
    %378 = arith.addf %376, %377 : vector<2x32xf32>
    %379 = math.tanh %378 : vector<2x32xf32>
    %380 = vector.extract_strided_slice %347 {offsets = [0, 0], sizes = [2, 32], strides = [1, 1]} : vector<16x32xf32> to vector<2x32xf32>
    %cst_168 = arith.constant dense<0.000000e+00> : vector<2x32xf32>
    %381 = tpu.matmul %357, %355, %cst_168 {dimension_numbers = #tpu.dot_dimension_numbers<[1], [0], [0], [1], [0, 0, 1, 1], [], []>} : vector<2x32xf32>, vector<32x32xf32>, vector<2x32xf32> -> vector<2x32xf32>
    %382 = arith.addf %380, %381 : vector<2x32xf32>
    %383 = arith.negf %382 : vector<2x32xf32>
    %384 = math.exp %383 : vector<2x32xf32>
    %cst_169 = arith.constant 1.000000e+00 : f32
    %385 = vector.broadcast %cst_169 : f32 to vector<2x32xf32>
    %386 = arith.addf %385, %384 : vector<2x32xf32>
    %387 = arith.divf %385, %386 : vector<2x32xf32>
    %388 = arith.mulf %375, %359 : vector<2x32xf32>
    %389 = arith.mulf %367, %379 : vector<2x32xf32>
    %390 = arith.addf %388, %389 : vector<2x32xf32>
    %391 = math.tanh %390 : vector<2x32xf32>
    %392 = arith.mulf %387, %391 : vector<2x32xf32>
    %393 = vector.extract_strided_slice %326 {offsets = [2, 0], sizes = [2, 32], strides = [1, 1]} : vector<16x32xf32> to vector<2x32xf32>
    %cst_170 = arith.constant dense<0.000000e+00> : vector<2x32xf32>
    %394 = tpu.matmul %392, %349, %cst_170 {dimension_numbers = #tpu.dot_dimension_numbers<[1], [0], [0], [1], [0, 0, 1, 1], [], []>} : vector<2x32xf32>, vector<32x32xf32>, vector<2x32xf32> -> vector<2x32xf32>
    %395 = arith.addf %393, %394 : vector<2x32xf32>
    %396 = arith.negf %395 : vector<2x32xf32>
    %397 = math.exp %396 : vector<2x32xf32>
    %cst_171 = arith.constant 1.000000e+00 : f32
    %398 = vector.broadcast %cst_171 : f32 to vector<2x32xf32>
    %399 = arith.addf %398, %397 : vector<2x32xf32>
    %400 = arith.divf %398, %399 : vector<2x32xf32>
    %401 = vector.extract_strided_slice %333 {offsets = [2, 0], sizes = [2, 32], strides = [1, 1]} : vector<16x32xf32> to vector<2x32xf32>
    %cst_172 = arith.constant dense<0.000000e+00> : vector<2x32xf32>
    %402 = tpu.matmul %392, %351, %cst_172 {dimension_numbers = #tpu.dot_dimension_numbers<[1], [0], [0], [1], [0, 0, 1, 1], [], []>} : vector<2x32xf32>, vector<32x32xf32>, vector<2x32xf32> -> vector<2x32xf32>
    %403 = arith.addf %401, %402 : vector<2x32xf32>
    %404 = arith.negf %403 : vector<2x32xf32>
    %405 = math.exp %404 : vector<2x32xf32>
    %cst_173 = arith.constant 1.000000e+00 : f32
    %406 = vector.broadcast %cst_173 : f32 to vector<2x32xf32>
    %407 = arith.addf %406, %405 : vector<2x32xf32>
    %408 = arith.divf %406, %407 : vector<2x32xf32>
    %409 = vector.extract_strided_slice %340 {offsets = [2, 0], sizes = [2, 32], strides = [1, 1]} : vector<16x32xf32> to vector<2x32xf32>
    %cst_174 = arith.constant dense<0.000000e+00> : vector<2x32xf32>
    %410 = tpu.matmul %392, %353, %cst_174 {dimension_numbers = #tpu.dot_dimension_numbers<[1], [0], [0], [1], [0, 0, 1, 1], [], []>} : vector<2x32xf32>, vector<32x32xf32>, vector<2x32xf32> -> vector<2x32xf32>
    %411 = arith.addf %409, %410 : vector<2x32xf32>
    %412 = math.tanh %411 : vector<2x32xf32>
    %413 = vector.extract_strided_slice %347 {offsets = [2, 0], sizes = [2, 32], strides = [1, 1]} : vector<16x32xf32> to vector<2x32xf32>
    %cst_175 = arith.constant dense<0.000000e+00> : vector<2x32xf32>
    %414 = tpu.matmul %392, %355, %cst_175 {dimension_numbers = #tpu.dot_dimension_numbers<[1], [0], [0], [1], [0, 0, 1, 1], [], []>} : vector<2x32xf32>, vector<32x32xf32>, vector<2x32xf32> -> vector<2x32xf32>
    %415 = arith.addf %413, %414 : vector<2x32xf32>
    %416 = arith.negf %415 : vector<2x32xf32>
    %417 = math.exp %416 : vector<2x32xf32>
    %cst_176 = arith.constant 1.000000e+00 : f32
    %418 = vector.broadcast %cst_176 : f32 to vector<2x32xf32>
    %419 = arith.addf %418, %417 : vector<2x32xf32>
    %420 = arith.divf %418, %419 : vector<2x32xf32>
    %421 = arith.mulf %408, %390 : vector<2x32xf32>
    %422 = arith.mulf %400, %412 : vector<2x32xf32>
    %423 = arith.addf %421, %422 : vector<2x32xf32>
    %424 = math.tanh %423 : vector<2x32xf32>
    %425 = arith.mulf %420, %424 : vector<2x32xf32>
    %426 = vector.extract_strided_slice %326 {offsets = [4, 0], sizes = [2, 32], strides = [1, 1]} : vector<16x32xf32> to vector<2x32xf32>
    %cst_177 = arith.constant dense<0.000000e+00> : vector<2x32xf32>
    %427 = tpu.matmul %425, %349, %cst_177 {dimension_numbers = #tpu.dot_dimension_numbers<[1], [0], [0], [1], [0, 0, 1, 1], [], []>} : vector<2x32xf32>, vector<32x32xf32>, vector<2x32xf32> -> vector<2x32xf32>
    %428 = arith.addf %426, %427 : vector<2x32xf32>
    %429 = arith.negf %428 : vector<2x32xf32>
    %430 = math.exp %429 : vector<2x32xf32>
    %cst_178 = arith.constant 1.000000e+00 : f32
    %431 = vector.broadcast %cst_178 : f32 to vector<2x32xf32>
    %432 = arith.addf %431, %430 : vector<2x32xf32>
    %433 = arith.divf %431, %432 : vector<2x32xf32>
    %434 = vector.extract_strided_slice %333 {offsets = [4, 0], sizes = [2, 32], strides = [1, 1]} : vector<16x32xf32> to vector<2x32xf32>
    %cst_179 = arith.constant dense<0.000000e+00> : vector<2x32xf32>
    %435 = tpu.matmul %425, %351, %cst_179 {dimension_numbers = #tpu.dot_dimension_numbers<[1], [0], [0], [1], [0, 0, 1, 1], [], []>} : vector<2x32xf32>, vector<32x32xf32>, vector<2x32xf32> -> vector<2x32xf32>
    %436 = arith.addf %434, %435 : vector<2x32xf32>
    %437 = arith.negf %436 : vector<2x32xf32>
    %438 = math.exp %437 : vector<2x32xf32>
    %cst_180 = arith.constant 1.000000e+00 : f32
    %439 = vector.broadcast %cst_180 : f32 to vector<2x32xf32>
    %440 = arith.addf %439, %438 : vector<2x32xf32>
    %441 = arith.divf %439, %440 : vector<2x32xf32>
    %442 = vector.extract_strided_slice %340 {offsets = [4, 0], sizes = [2, 32], strides = [1, 1]} : vector<16x32xf32> to vector<2x32xf32>
    %cst_181 = arith.constant dense<0.000000e+00> : vector<2x32xf32>
    %443 = tpu.matmul %425, %353, %cst_181 {dimension_numbers = #tpu.dot_dimension_numbers<[1], [0], [0], [1], [0, 0, 1, 1], [], []>} : vector<2x32xf32>, vector<32x32xf32>, vector<2x32xf32> -> vector<2x32xf32>
    %444 = arith.addf %442, %443 : vector<2x32xf32>
    %445 = math.tanh %444 : vector<2x32xf32>
    %446 = vector.extract_strided_slice %347 {offsets = [4, 0], sizes = [2, 32], strides = [1, 1]} : vector<16x32xf32> to vector<2x32xf32>
    %cst_182 = arith.constant dense<0.000000e+00> : vector<2x32xf32>
    %447 = tpu.matmul %425, %355, %cst_182 {dimension_numbers = #tpu.dot_dimension_numbers<[1], [0], [0], [1], [0, 0, 1, 1], [], []>} : vector<2x32xf32>, vector<32x32xf32>, vector<2x32xf32> -> vector<2x32xf32>
    %448 = arith.addf %446, %447 : vector<2x32xf32>
    %449 = arith.negf %448 : vector<2x32xf32>
    %450 = math.exp %449 : vector<2x32xf32>
    %cst_183 = arith.constant 1.000000e+00 : f32
    %451 = vector.broadcast %cst_183 : f32 to vector<2x32xf32>
    %452 = arith.addf %451, %450 : vector<2x32xf32>
    %453 = arith.divf %451, %452 : vector<2x32xf32>
    %454 = arith.mulf %441, %423 : vector<2x32xf32>
    %455 = arith.mulf %433, %445 : vector<2x32xf32>
    %456 = arith.addf %454, %455 : vector<2x32xf32>
    %457 = math.tanh %456 : vector<2x32xf32>
    %458 = arith.mulf %453, %457 : vector<2x32xf32>
    %459 = vector.extract_strided_slice %326 {offsets = [6, 0], sizes = [2, 32], strides = [1, 1]} : vector<16x32xf32> to vector<2x32xf32>
    %cst_184 = arith.constant dense<0.000000e+00> : vector<2x32xf32>
    %460 = tpu.matmul %458, %349, %cst_184 {dimension_numbers = #tpu.dot_dimension_numbers<[1], [0], [0], [1], [0, 0, 1, 1], [], []>} : vector<2x32xf32>, vector<32x32xf32>, vector<2x32xf32> -> vector<2x32xf32>
    %461 = arith.addf %459, %460 : vector<2x32xf32>
    %462 = arith.negf %461 : vector<2x32xf32>
    %463 = math.exp %462 : vector<2x32xf32>
    %cst_185 = arith.constant 1.000000e+00 : f32
    %464 = vector.broadcast %cst_185 : f32 to vector<2x32xf32>
    %465 = arith.addf %464, %463 : vector<2x32xf32>
    %466 = arith.divf %464, %465 : vector<2x32xf32>
    %467 = vector.extract_strided_slice %333 {offsets = [6, 0], sizes = [2, 32], strides = [1, 1]} : vector<16x32xf32> to vector<2x32xf32>
    %cst_186 = arith.constant dense<0.000000e+00> : vector<2x32xf32>
    %468 = tpu.matmul %458, %351, %cst_186 {dimension_numbers = #tpu.dot_dimension_numbers<[1], [0], [0], [1], [0, 0, 1, 1], [], []>} : vector<2x32xf32>, vector<32x32xf32>, vector<2x32xf32> -> vector<2x32xf32>
    %469 = arith.addf %467, %468 : vector<2x32xf32>
    %470 = arith.negf %469 : vector<2x32xf32>
    %471 = math.exp %470 : vector<2x32xf32>
    %cst_187 = arith.constant 1.000000e+00 : f32
    %472 = vector.broadcast %cst_187 : f32 to vector<2x32xf32>
    %473 = arith.addf %472, %471 : vector<2x32xf32>
    %474 = arith.divf %472, %473 : vector<2x32xf32>
    %475 = vector.extract_strided_slice %340 {offsets = [6, 0], sizes = [2, 32], strides = [1, 1]} : vector<16x32xf32> to vector<2x32xf32>
    %cst_188 = arith.constant dense<0.000000e+00> : vector<2x32xf32>
    %476 = tpu.matmul %458, %353, %cst_188 {dimension_numbers = #tpu.dot_dimension_numbers<[1], [0], [0], [1], [0, 0, 1, 1], [], []>} : vector<2x32xf32>, vector<32x32xf32>, vector<2x32xf32> -> vector<2x32xf32>
    %477 = arith.addf %475, %476 : vector<2x32xf32>
    %478 = math.tanh %477 : vector<2x32xf32>
    %479 = vector.extract_strided_slice %347 {offsets = [6, 0], sizes = [2, 32], strides = [1, 1]} : vector<16x32xf32> to vector<2x32xf32>
    %cst_189 = arith.constant dense<0.000000e+00> : vector<2x32xf32>
    %480 = tpu.matmul %458, %355, %cst_189 {dimension_numbers = #tpu.dot_dimension_numbers<[1], [0], [0], [1], [0, 0, 1, 1], [], []>} : vector<2x32xf32>, vector<32x32xf32>, vector<2x32xf32> -> vector<2x32xf32>
    %481 = arith.addf %479, %480 : vector<2x32xf32>
    %482 = arith.negf %481 : vector<2x32xf32>
    %483 = math.exp %482 : vector<2x32xf32>
    %cst_190 = arith.constant 1.000000e+00 : f32
    %484 = vector.broadcast %cst_190 : f32 to vector<2x32xf32>
    %485 = arith.addf %484, %483 : vector<2x32xf32>
    %486 = arith.divf %484, %485 : vector<2x32xf32>
    %487 = arith.mulf %474, %456 : vector<2x32xf32>
    %488 = arith.mulf %466, %478 : vector<2x32xf32>
    %489 = arith.addf %487, %488 : vector<2x32xf32>
    %490 = math.tanh %489 : vector<2x32xf32>
    %491 = arith.mulf %486, %490 : vector<2x32xf32>
    %492 = vector.extract_strided_slice %326 {offsets = [8, 0], sizes = [2, 32], strides = [1, 1]} : vector<16x32xf32> to vector<2x32xf32>
    %cst_191 = arith.constant dense<0.000000e+00> : vector<2x32xf32>
    %493 = tpu.matmul %491, %349, %cst_191 {dimension_numbers = #tpu.dot_dimension_numbers<[1], [0], [0], [1], [0, 0, 1, 1], [], []>} : vector<2x32xf32>, vector<32x32xf32>, vector<2x32xf32> -> vector<2x32xf32>
    %494 = arith.addf %492, %493 : vector<2x32xf32>
    %495 = arith.negf %494 : vector<2x32xf32>
    %496 = math.exp %495 : vector<2x32xf32>
    %cst_192 = arith.constant 1.000000e+00 : f32
    %497 = vector.broadcast %cst_192 : f32 to vector<2x32xf32>
    %498 = arith.addf %497, %496 : vector<2x32xf32>
    %499 = arith.divf %497, %498 : vector<2x32xf32>
    %500 = vector.extract_strided_slice %333 {offsets = [8, 0], sizes = [2, 32], strides = [1, 1]} : vector<16x32xf32> to vector<2x32xf32>
    %cst_193 = arith.constant dense<0.000000e+00> : vector<2x32xf32>
    %501 = tpu.matmul %491, %351, %cst_193 {dimension_numbers = #tpu.dot_dimension_numbers<[1], [0], [0], [1], [0, 0, 1, 1], [], []>} : vector<2x32xf32>, vector<32x32xf32>, vector<2x32xf32> -> vector<2x32xf32>
    %502 = arith.addf %500, %501 : vector<2x32xf32>
    %503 = arith.negf %502 : vector<2x32xf32>
    %504 = math.exp %503 : vector<2x32xf32>
    %cst_194 = arith.constant 1.000000e+00 : f32
    %505 = vector.broadcast %cst_194 : f32 to vector<2x32xf32>
    %506 = arith.addf %505, %504 : vector<2x32xf32>
    %507 = arith.divf %505, %506 : vector<2x32xf32>
    %508 = vector.extract_strided_slice %340 {offsets = [8, 0], sizes = [2, 32], strides = [1, 1]} : vector<16x32xf32> to vector<2x32xf32>
    %cst_195 = arith.constant dense<0.000000e+00> : vector<2x32xf32>
    %509 = tpu.matmul %491, %353, %cst_195 {dimension_numbers = #tpu.dot_dimension_numbers<[1], [0], [0], [1], [0, 0, 1, 1], [], []>} : vector<2x32xf32>, vector<32x32xf32>, vector<2x32xf32> -> vector<2x32xf32>
    %510 = arith.addf %508, %509 : vector<2x32xf32>
    %511 = math.tanh %510 : vector<2x32xf32>
    %512 = vector.extract_strided_slice %347 {offsets = [8, 0], sizes = [2, 32], strides = [1, 1]} : vector<16x32xf32> to vector<2x32xf32>
    %cst_196 = arith.constant dense<0.000000e+00> : vector<2x32xf32>
    %513 = tpu.matmul %491, %355, %cst_196 {dimension_numbers = #tpu.dot_dimension_numbers<[1], [0], [0], [1], [0, 0, 1, 1], [], []>} : vector<2x32xf32>, vector<32x32xf32>, vector<2x32xf32> -> vector<2x32xf32>
    %514 = arith.addf %512, %513 : vector<2x32xf32>
    %515 = arith.negf %514 : vector<2x32xf32>
    %516 = math.exp %515 : vector<2x32xf32>
    %cst_197 = arith.constant 1.000000e+00 : f32
    %517 = vector.broadcast %cst_197 : f32 to vector<2x32xf32>
    %518 = arith.addf %517, %516 : vector<2x32xf32>
    %519 = arith.divf %517, %518 : vector<2x32xf32>
    %520 = arith.mulf %507, %489 : vector<2x32xf32>
    %521 = arith.mulf %499, %511 : vector<2x32xf32>
    %522 = arith.addf %520, %521 : vector<2x32xf32>
    %523 = math.tanh %522 : vector<2x32xf32>
    %524 = arith.mulf %519, %523 : vector<2x32xf32>
    %525 = vector.extract_strided_slice %326 {offsets = [10, 0], sizes = [2, 32], strides = [1, 1]} : vector<16x32xf32> to vector<2x32xf32>
    %cst_198 = arith.constant dense<0.000000e+00> : vector<2x32xf32>
    %526 = tpu.matmul %524, %349, %cst_198 {dimension_numbers = #tpu.dot_dimension_numbers<[1], [0], [0], [1], [0, 0, 1, 1], [], []>} : vector<2x32xf32>, vector<32x32xf32>, vector<2x32xf32> -> vector<2x32xf32>
    %527 = arith.addf %525, %526 : vector<2x32xf32>
    %528 = arith.negf %527 : vector<2x32xf32>
    %529 = math.exp %528 : vector<2x32xf32>
    %cst_199 = arith.constant 1.000000e+00 : f32
    %530 = vector.broadcast %cst_199 : f32 to vector<2x32xf32>
    %531 = arith.addf %530, %529 : vector<2x32xf32>
    %532 = arith.divf %530, %531 : vector<2x32xf32>
    %533 = vector.extract_strided_slice %333 {offsets = [10, 0], sizes = [2, 32], strides = [1, 1]} : vector<16x32xf32> to vector<2x32xf32>
    %cst_200 = arith.constant dense<0.000000e+00> : vector<2x32xf32>
    %534 = tpu.matmul %524, %351, %cst_200 {dimension_numbers = #tpu.dot_dimension_numbers<[1], [0], [0], [1], [0, 0, 1, 1], [], []>} : vector<2x32xf32>, vector<32x32xf32>, vector<2x32xf32> -> vector<2x32xf32>
    %535 = arith.addf %533, %534 : vector<2x32xf32>
    %536 = arith.negf %535 : vector<2x32xf32>
    %537 = math.exp %536 : vector<2x32xf32>
    %cst_201 = arith.constant 1.000000e+00 : f32
    %538 = vector.broadcast %cst_201 : f32 to vector<2x32xf32>
    %539 = arith.addf %538, %537 : vector<2x32xf32>
    %540 = arith.divf %538, %539 : vector<2x32xf32>
    %541 = vector.extract_strided_slice %340 {offsets = [10, 0], sizes = [2, 32], strides = [1, 1]} : vector<16x32xf32> to vector<2x32xf32>
    %cst_202 = arith.constant dense<0.000000e+00> : vector<2x32xf32>
    %542 = tpu.matmul %524, %353, %cst_202 {dimension_numbers = #tpu.dot_dimension_numbers<[1], [0], [0], [1], [0, 0, 1, 1], [], []>} : vector<2x32xf32>, vector<32x32xf32>, vector<2x32xf32> -> vector<2x32xf32>
    %543 = arith.addf %541, %542 : vector<2x32xf32>
    %544 = math.tanh %543 : vector<2x32xf32>
    %545 = vector.extract_strided_slice %347 {offsets = [10, 0], sizes = [2, 32], strides = [1, 1]} : vector<16x32xf32> to vector<2x32xf32>
    %cst_203 = arith.constant dense<0.000000e+00> : vector<2x32xf32>
    %546 = tpu.matmul %524, %355, %cst_203 {dimension_numbers = #tpu.dot_dimension_numbers<[1], [0], [0], [1], [0, 0, 1, 1], [], []>} : vector<2x32xf32>, vector<32x32xf32>, vector<2x32xf32> -> vector<2x32xf32>
    %547 = arith.addf %545, %546 : vector<2x32xf32>
    %548 = arith.negf %547 : vector<2x32xf32>
    %549 = math.exp %548 : vector<2x32xf32>
    %cst_204 = arith.constant 1.000000e+00 : f32
    %550 = vector.broadcast %cst_204 : f32 to vector<2x32xf32>
    %551 = arith.addf %550, %549 : vector<2x32xf32>
    %552 = arith.divf %550, %551 : vector<2x32xf32>
    %553 = arith.mulf %540, %522 : vector<2x32xf32>
    %554 = arith.mulf %532, %544 : vector<2x32xf32>
    %555 = arith.addf %553, %554 : vector<2x32xf32>
    %556 = math.tanh %555 : vector<2x32xf32>
    %557 = arith.mulf %552, %556 : vector<2x32xf32>
    %558 = vector.extract_strided_slice %326 {offsets = [12, 0], sizes = [2, 32], strides = [1, 1]} : vector<16x32xf32> to vector<2x32xf32>
    %cst_205 = arith.constant dense<0.000000e+00> : vector<2x32xf32>
    %559 = tpu.matmul %557, %349, %cst_205 {dimension_numbers = #tpu.dot_dimension_numbers<[1], [0], [0], [1], [0, 0, 1, 1], [], []>} : vector<2x32xf32>, vector<32x32xf32>, vector<2x32xf32> -> vector<2x32xf32>
    %560 = arith.addf %558, %559 : vector<2x32xf32>
    %561 = arith.negf %560 : vector<2x32xf32>
    %562 = math.exp %561 : vector<2x32xf32>
    %cst_206 = arith.constant 1.000000e+00 : f32
    %563 = vector.broadcast %cst_206 : f32 to vector<2x32xf32>
    %564 = arith.addf %563, %562 : vector<2x32xf32>
    %565 = arith.divf %563, %564 : vector<2x32xf32>
    %566 = vector.extract_strided_slice %333 {offsets = [12, 0], sizes = [2, 32], strides = [1, 1]} : vector<16x32xf32> to vector<2x32xf32>
    %cst_207 = arith.constant dense<0.000000e+00> : vector<2x32xf32>
    %567 = tpu.matmul %557, %351, %cst_207 {dimension_numbers = #tpu.dot_dimension_numbers<[1], [0], [0], [1], [0, 0, 1, 1], [], []>} : vector<2x32xf32>, vector<32x32xf32>, vector<2x32xf32> -> vector<2x32xf32>
    %568 = arith.addf %566, %567 : vector<2x32xf32>
    %569 = arith.negf %568 : vector<2x32xf32>
    %570 = math.exp %569 : vector<2x32xf32>
    %cst_208 = arith.constant 1.000000e+00 : f32
    %571 = vector.broadcast %cst_208 : f32 to vector<2x32xf32>
    %572 = arith.addf %571, %570 : vector<2x32xf32>
    %573 = arith.divf %571, %572 : vector<2x32xf32>
    %574 = vector.extract_strided_slice %340 {offsets = [12, 0], sizes = [2, 32], strides = [1, 1]} : vector<16x32xf32> to vector<2x32xf32>
    %cst_209 = arith.constant dense<0.000000e+00> : vector<2x32xf32>
    %575 = tpu.matmul %557, %353, %cst_209 {dimension_numbers = #tpu.dot_dimension_numbers<[1], [0], [0], [1], [0, 0, 1, 1], [], []>} : vector<2x32xf32>, vector<32x32xf32>, vector<2x32xf32> -> vector<2x32xf32>
    %576 = arith.addf %574, %575 : vector<2x32xf32>
    %577 = math.tanh %576 : vector<2x32xf32>
    %578 = vector.extract_strided_slice %347 {offsets = [12, 0], sizes = [2, 32], strides = [1, 1]} : vector<16x32xf32> to vector<2x32xf32>
    %cst_210 = arith.constant dense<0.000000e+00> : vector<2x32xf32>
    %579 = tpu.matmul %557, %355, %cst_210 {dimension_numbers = #tpu.dot_dimension_numbers<[1], [0], [0], [1], [0, 0, 1, 1], [], []>} : vector<2x32xf32>, vector<32x32xf32>, vector<2x32xf32> -> vector<2x32xf32>
    %580 = arith.addf %578, %579 : vector<2x32xf32>
    %581 = arith.negf %580 : vector<2x32xf32>
    %582 = math.exp %581 : vector<2x32xf32>
    %cst_211 = arith.constant 1.000000e+00 : f32
    %583 = vector.broadcast %cst_211 : f32 to vector<2x32xf32>
    %584 = arith.addf %583, %582 : vector<2x32xf32>
    %585 = arith.divf %583, %584 : vector<2x32xf32>
    %586 = arith.mulf %573, %555 : vector<2x32xf32>
    %587 = arith.mulf %565, %577 : vector<2x32xf32>
    %588 = arith.addf %586, %587 : vector<2x32xf32>
    %589 = math.tanh %588 : vector<2x32xf32>
    %590 = arith.mulf %585, %589 : vector<2x32xf32>
    %591 = vector.extract_strided_slice %326 {offsets = [14, 0], sizes = [2, 32], strides = [1, 1]} : vector<16x32xf32> to vector<2x32xf32>
    %cst_212 = arith.constant dense<0.000000e+00> : vector<2x32xf32>
    %592 = tpu.matmul %590, %349, %cst_212 {dimension_numbers = #tpu.dot_dimension_numbers<[1], [0], [0], [1], [0, 0, 1, 1], [], []>} : vector<2x32xf32>, vector<32x32xf32>, vector<2x32xf32> -> vector<2x32xf32>
    %593 = arith.addf %591, %592 : vector<2x32xf32>
    %594 = arith.negf %593 : vector<2x32xf32>
    %595 = math.exp %594 : vector<2x32xf32>
    %cst_213 = arith.constant 1.000000e+00 : f32
    %596 = vector.broadcast %cst_213 : f32 to vector<2x32xf32>
    %597 = arith.addf %596, %595 : vector<2x32xf32>
    %598 = arith.divf %596, %597 : vector<2x32xf32>
    %599 = vector.extract_strided_slice %333 {offsets = [14, 0], sizes = [2, 32], strides = [1, 1]} : vector<16x32xf32> to vector<2x32xf32>
    %cst_214 = arith.constant dense<0.000000e+00> : vector<2x32xf32>
    %600 = tpu.matmul %590, %351, %cst_214 {dimension_numbers = #tpu.dot_dimension_numbers<[1], [0], [0], [1], [0, 0, 1, 1], [], []>} : vector<2x32xf32>, vector<32x32xf32>, vector<2x32xf32> -> vector<2x32xf32>
    %601 = arith.addf %599, %600 : vector<2x32xf32>
    %602 = arith.negf %601 : vector<2x32xf32>
    %603 = math.exp %602 : vector<2x32xf32>
    %cst_215 = arith.constant 1.000000e+00 : f32
    %604 = vector.broadcast %cst_215 : f32 to vector<2x32xf32>
    %605 = arith.addf %604, %603 : vector<2x32xf32>
    %606 = arith.divf %604, %605 : vector<2x32xf32>
    %607 = vector.extract_strided_slice %340 {offsets = [14, 0], sizes = [2, 32], strides = [1, 1]} : vector<16x32xf32> to vector<2x32xf32>
    %cst_216 = arith.constant dense<0.000000e+00> : vector<2x32xf32>
    %608 = tpu.matmul %590, %353, %cst_216 {dimension_numbers = #tpu.dot_dimension_numbers<[1], [0], [0], [1], [0, 0, 1, 1], [], []>} : vector<2x32xf32>, vector<32x32xf32>, vector<2x32xf32> -> vector<2x32xf32>
    %609 = arith.addf %607, %608 : vector<2x32xf32>
    %610 = math.tanh %609 : vector<2x32xf32>
    %611 = vector.extract_strided_slice %347 {offsets = [14, 0], sizes = [2, 32], strides = [1, 1]} : vector<16x32xf32> to vector<2x32xf32>
    %cst_217 = arith.constant dense<0.000000e+00> : vector<2x32xf32>
    %612 = tpu.matmul %590, %355, %cst_217 {dimension_numbers = #tpu.dot_dimension_numbers<[1], [0], [0], [1], [0, 0, 1, 1], [], []>} : vector<2x32xf32>, vector<32x32xf32>, vector<2x32xf32> -> vector<2x32xf32>
    %613 = arith.addf %611, %612 : vector<2x32xf32>
    %614 = arith.negf %613 : vector<2x32xf32>
    %615 = math.exp %614 : vector<2x32xf32>
    %cst_218 = arith.constant 1.000000e+00 : f32
    %616 = vector.broadcast %cst_218 : f32 to vector<2x32xf32>
    %617 = arith.addf %616, %615 : vector<2x32xf32>
    %618 = arith.divf %616, %617 : vector<2x32xf32>
    %619 = arith.mulf %606, %588 : vector<2x32xf32>
    %620 = arith.mulf %598, %610 : vector<2x32xf32>
    %621 = arith.addf %619, %620 : vector<2x32xf32>
    %622 = math.tanh %621 : vector<2x32xf32>
    %623 = arith.mulf %618, %622 : vector<2x32xf32>
    %c1_219 = arith.constant 1 : index
    %c0_220 = arith.constant 0 : index
    %c0_221 = arith.constant 0 : index
    %624 = vector.load %arg12[%c1_219, %c0_220, %c0_221] : memref<2x2x32xf32, #tpu.memory_space<vmem>>, vector<1x2x32xf32>
    %625 = vector.shape_cast %624 : vector<1x2x32xf32> to vector<2x32xf32>
    %626 = vector.shape_cast %623 : vector<2x32xf32> to vector<1x2x32xf32>
    tpu.vector_store %arg12[%c1_219, %c0_220, %c0_221], %626 {strides = array<i32>} : memref<2x2x32xf32, #tpu.memory_space<vmem>>, vector<1x2x32xf32>,
    %c1_222 = arith.constant 1 : index
    %c0_223 = arith.constant 0 : index
    %c0_224 = arith.constant 0 : index
    %627 = vector.load %arg13[%c1_222, %c0_223, %c0_224] : memref<2x2x32xf32, #tpu.memory_space<vmem>>, vector<1x2x32xf32>
    %628 = vector.shape_cast %627 : vector<1x2x32xf32> to vector<2x32xf32>
    %629 = vector.shape_cast %621 : vector<2x32xf32> to vector<1x2x32xf32>
    tpu.vector_store %arg13[%c1_222, %c0_223, %c0_224], %629 {strides = array<i32>} : memref<2x2x32xf32, #tpu.memory_space<vmem>>, vector<1x2x32xf32>,
    %c0_225 = arith.constant 0 : index
    %c0_226 = arith.constant 0 : index
    %630 = vector.load %arg9[%c0_225, %c0_226] : memref<32x16xf32, #tpu.memory_space<vmem>>, vector<32x16xf32>
    %cst_227 = arith.constant dense<0.000000e+00> : vector<2x16xf32>
    %631 = tpu.matmul %623, %630, %cst_227 {dimension_numbers = #tpu.dot_dimension_numbers<[1], [0], [0], [1], [0, 0, 1, 1], [], []>} : vector<2x32xf32>, vector<32x16xf32>, vector<2x16xf32> -> vector<2x16xf32>
    %c0_228 = arith.constant 0 : index
    %c0_229 = arith.constant 0 : index
    %632 = vector.load %arg10[%c0_228, %c0_229] : memref<1x16xf32, #tpu.memory_space<vmem>>, vector<1x16xf32>
    %633 = vector.broadcast %632 : vector<1x16xf32> to vector<2x16xf32>
    %634 = arith.addf %631, %633 : vector<2x16xf32>
    %cst_230 = arith.constant dense<0xFF800000> : vector<2xf32>
    %635 = vector.multi_reduction <maximumf>, %634, %cst_230 [1] : vector<2x16xf32> to vector<2xf32>
    %636 = vector.shape_cast %635 : vector<2xf32> to vector<2x1xf32>
    %637 = vector.broadcast %636 : vector<2x1xf32> to vector<2x16xf32>
    %638 = arith.subf %634, %637 : vector<2x16xf32>
    %639 = math.exp %638 : vector<2x16xf32>
    %cst_231 = arith.constant dense<0.000000e+00> : vector<2xf32>
    %640 = vector.multi_reduction <add>, %639, %cst_231 [1] : vector<2x16xf32> to vector<2xf32>
    %641 = vector.shape_cast %640 : vector<2xf32> to vector<2x1xf32>
    %642 = math.log %641 : vector<2x1xf32>
    %643 = vector.broadcast %642 : vector<2x1xf32> to vector<2x16xf32>
    %644 = arith.subf %638, %643 : vector<2x16xf32>
    %c0_232 = arith.constant 0 : index
    %c0_233 = arith.constant 0 : index
    %645 = vector.load %arg11[%c0_232, %c0_233] : memref<2x16xf32, #tpu.memory_space<vmem>>, vector<2x16xf32>
    tpu.vector_store %arg11[%c0_232, %c0_233], %644 {strides = array<i32>} : memref<2x16xf32, #tpu.memory_space<vmem>>, vector<2x16xf32>,
    return
  }
}

</mosaic_0001>

<bundles_post_ra>
// kernel: lstm_forward.1
= control target key start
LH: loop header
LB: loop body
LE: loop exit
PB: predicated region body
PF: predicated region fallthrough
CT: control target
= control target key end

     0   :  { %19 = vsyncpa [#allocation4], 0  ;;  %s9071_s0 = inlined_call_operand.vmem [shape: f32[16,8], index: 0, kind: input, shape index: {}]   ;;  %s9072_s1 = inlined_call_operand.vmem [shape: f32[4,8,32], index: 1, kind: input, shape index: {}]   ;;  %s9073_s2 = inlined_call_operand.hbm [shape: f32[4,32,32], index: 2, kind: input, shape index: {}]   ;;  %s9074_s3 = inlined_call_operand.vmem [shape: f32[4,1,32], index: 3, kind: input, shape index: {}]   ;;  %s9075_s4 = inlined_call_operand.hbm [shape: f32[4,32,32], index: 4, kind: input, shape index: {}]   ;;  %s9076_s5 = inlined_call_operand.hbm [shape: f32[4,32,32], index: 5, kind: input, shape index: {}]   ;;  %s9077_s6 = inlined_call_operand.hbm [shape: f32[4,1,32], index: 6, kind: input, shape index: {}]   ;;  %s9078_s7 = inlined_call_operand.vmem [shape: f32[2,2,32], index: 7, kind: input, shape index: {}, may-alias: {7,8}]   ;;  %s9079_s8 = inlined_call_operand.vmem [shape: f32[2,2,32], index: 8, kind: input, shape index: {}, may-alias: {7,8}]   ;;  %s9080_s9 = inlined_call_operand.vmem [shape: f32[32,16], index: 9, kind: input, shape index: {}]   ;;  %s9081_s10 = inlined_call_operand.vmem [shape: f32[1,16], index: 10, kind: input, shape index: {}]   ;;  %s9082_s11 = inlined_call_operand.hbm [shape: f32[2,16], index: 11, kind: output, shape index: {0}]   ;;  %s9083_s12 = inlined_call_operand.hbm [shape: f32[2,2,32], index: 12, kind: output, shape index: {1}]   ;;  %s9084_s13 = inlined_call_operand.hbm [shape: f32[2,2,32], index: 13, kind: output, shape index: {2}]  }
   0x1   :  { %20 = vsyncpa [#allocation7], 0 }
   0x2   :  { %21 = vsyncpa [#allocation10], 0 }
   0x3   :  { %22 = vsyncpa [#allocation5], 0 }
   0x4   :  { %23 = vsyncpa [#allocation13], 0  ;;  %s7928_s25 = smov [#allocation6]   ;;  %s7929_s27 = smov [#allocation3]  }
   0x5   :  { %s47_s26 = sshll.u32 %s7928_s25, 4  ;;  %s33_s28 = sshll.u32 %s7929_s27, 4  ;;  %s48_s26 = int_to_ptr.vmem [resolvable:$true] %s47_s26  ;;  %s34_s28 = int_to_ptr.vmem [resolvable:$true] %s33_s28 }
   0x6   :  { %s7786_s29 = scalar_lea.vmem %s48_s26, 2048  ;;  %p7791_p1 = scmp.lt.s32.totalorder %s48_s26, %s48_s26 }
   0x7   :  { %p7787_p0 = scmp.ne.s32.totalorder %s48_s26, %s7786_s29  ;;  %p7792_p2 = scmp.lt.s32.totalorder %s7786_s29, %s7786_s29 }
   0x9   :  { %p7793_p3 = por %p7792_p2, %p7791_p1 }
   0xb   :  { %p7794_p4 = pnand %p7793_p3, %p7787_p0 }
   0xd   :  { %7797 = shalt.err (!%p7794_p4)
}
   0xe   :  { %s7930_s30 = smov 128   ;;  %s7931_s14 = smov 8  }
   0xf   :  { %53 = dma.hbm_to_vmem [thread:$0]  %s9075_s4, 2048, %s48_s26, [#allocation7], %s7930_s30, %s7930_s30, %s7931_s14  }
  0x10   :  { %s7806_s17 = scalar_lea.vmem %s34_s28, 2048  ;;  %p7811_p6 = scmp.lt.s32.totalorder %s34_s28, %s34_s28 }
  0x11   :  { %p7807_p5 = scmp.ne.s32.totalorder %s34_s28, %s7806_s17  ;;  %p7812_p7 = scmp.lt.s32.totalorder %s7806_s17, %s7806_s17 }
  0x13   :  { %p7813_p8 = por %p7812_p7, %p7811_p6 }
  0x15   :  { %p7814_p9 = pnand %p7813_p8, %p7807_p5 }
  0x17   :  { %7817 = shalt.err (!%p7814_p9)
}
  0x18   :  { %39 = dma.hbm_to_vmem [thread:$0]  %s9073_s2, 2048, %s34_s28, [#allocation4], %s7930_s30, %s7930_s30, %s7931_s14  }
  0x19   :  { %s7932_s20 = smov [#allocation8]   ;;  %s7933_s22 = smov [#allocation9]  }
  0x1a   :  { %s59_s21 = sshll.u32 %s7932_s20, 4  ;;  %s71_s23 = sshll.u32 %s7933_s22, 4  ;;  %s60_s21 = int_to_ptr.vmem [resolvable:$true] %s59_s21  ;;  %s72_s23 = int_to_ptr.vmem [resolvable:$true] %s71_s23 }
  0x1b   :  { %s7826_s24 = scalar_lea.vmem %s60_s21, 2048  ;;  %p7831_p11 = scmp.lt.s32.totalorder %s60_s21, %s60_s21 }
  0x1c   :  { %p7827_p10 = scmp.ne.s32.totalorder %s60_s21, %s7826_s24  ;;  %p7832_p12 = scmp.lt.s32.totalorder %s7826_s24, %s7826_s24 }
  0x1e   :  { %p7833_p13 = por %p7832_p12, %p7831_p11 }
  0x20   :  { %p7834_p0 = pnand %p7833_p13, %p7827_p10 }
  0x22   :  { %7837 = shalt.err (!%p7834_p0)
}
  0x23   :  { %65 = dma.hbm_to_vmem [thread:$0]  %s9076_s5, 2048, %s60_s21, [#allocation7], %s7930_s30, %s7930_s30, %s7931_s14  }
  0x24   :  { %s7846_s26 = scalar_lea.vmem %s72_s23, 64  ;;  %p7851_p2 = scmp.lt.s32.totalorder %s72_s23, %s72_s23 }
  0x25   :  { %p7847_p1 = scmp.ne.s32.totalorder %s72_s23, %s7846_s26  ;;  %p7852_p3 = scmp.lt.s32.totalorder %s7846_s26, %s7846_s26 }
  0x27   :  { %p7853_p4 = por %p7852_p3, %p7851_p2 }
  0x29   :  { %p7854_p5 = pnand %p7853_p4, %p7847_p1 }
  0x2b   :  { %7857 = shalt.err (!%p7854_p5)
}
  0x2c   :  { %s7934_s2 = smov 16   ;;  %s7935_s27 = smov 1  }
  0x2d   :  { %77 = dma.hbm_to_vmem [thread:$0]  %s9077_s6, 64, %s72_s23, [#allocation10], %s7934_s2, %s7934_s2, %s7935_s27  }
  0x2e   :  { %7918 = dma.done.wait [#allocation4], 2048  }
  0x2f   :  { %7919 = vsyncadd [#allocation4], 4294965248 }
  0x30   :  { %7920 = dma.done.wait [#allocation7], 4096  }
  0x31   :  { %7921 = vsyncadd [#allocation7], 4294963200 }
  0x32   :  { %7922 = dma.done.wait [#allocation10], 64  }
  0x33   :  { %7923 = vsyncadd [#allocation10], 4294967232  ;;  %vm108_vm0 = vcmask 64512   ;;  %v100_v0 = vld [vmem:[%s9072_s1] sm:$0xff]  ;;  %v6193_v1 = vld [vmem:[%s9072_s1 + $0x10] sm:$0xff]  ;;  %v7936_v6 = vmov 0.0  }
  0x34   :  { %v98_v2 = vld [vmem:[%s9071_s0] sm:$0xff]  ;;  %6692 = vmatprep.subr.mxu1 %v100_v0  ;;  %6702 = vmatprep.subr.mxu0 %v6193_v1  ;;  %v99_v3 = vld [vmem:[%s9071_s0 + $0x8] sm:$0xff]  ;;  %v6198_v7 = vld [vmem:[%s9072_s1 + $0x18] sm:$0xff]  ;;  %vm7937_vm1 = vmmov 0   ;;  %vm466_vm2 = vcmask 261120   ;;  %vm778_vm3 = vcmask 254976  }
  0x35   :  { %v6188_v4 = vld [vmem:[%s9072_s1 + $0x8] sm:$0xff]  ;;  %6693 = vmatpush3.msra.mxu1 %v100_v0  ;;  %6694 = vmatprep.mubr.msk.f32.mxu1 %vm108_vm0, %v98_v2  ;;  %v8051_v8 = vld [vmem:[#allocation3 + $0x10] sm:$0xff]  ;;  %v8056_v9 = vld [vmem:[#allocation3 + $0x8] sm:$0xff]  ;;  %vm1106_vm4 = vcmask 257026   ;;  %vm1435_vm5 = vcmask 259076   ;;  %vm1764_vm6 = vcmask 261126  }
  0x36   :  { %6703 = vmatpush3.msra.mxu0 %v6193_v1  ;;  %6695 = vmatmul.mubr.msk.f32.vlgmr.msra.gmra.mxu1 %vm108_vm0, %v99_v3  ;;  %v8043_v5 = vld [vmem:[#allocation3 + $0x18] sm:$0xff]  ;;  %v8061_v10 = vld [vmem:[#allocation3] sm:$0xff]  ;;  %v464_v11 = vld [vmem:[%s9078_s7] sm:$0x3]  ;;  %vm6123_vm7 = vcmask 123904   ;;  %s7938_s21 = smov [#allocation12]  }
  0x37   :  { %6697 = vmatprep.subr.mxu1 %v6188_v4  ;;  %6704 = vmatprep.mubr.msk.f32.mxu0 %vm108_vm0, %v98_v2  ;;  %v8069_v12 = vld [vmem:[#allocation3 + $0x38] sm:$0xff]  ;;  %v8077_v14 = vld [vmem:[#allocation3 + $0x30] sm:$0xff]  ;;  %v8085_v16 = vld [vmem:[#allocation3 + $0x28] sm:$0xff]  ;;  %s6152_s1 = sshll.u32 %s7938_s21, 4  ;;  %s6153_s1 = int_to_ptr.vmem [resolvable:$true] %s6152_s1 }
  0x38   :  { %6712 = vmatprep.subr.mxu0 %v7936_v6  ;;  %6698 = vmatpush3.msra.mxu1 %v6188_v4  ;;  %v8075_v13 = vld [vmem:[#allocation3 + $0x58] sm:$0xff]  ;;  %v8083_v15 = vld [vmem:[#allocation3 + $0x50] sm:$0xff]  ;;  %v8091_v17 = vld [vmem:[#allocation3 + $0x48] sm:$0xff]  ;;  %s7858_s22 = scalar_lea.vmem %s6153_s1, 64  ;;  %p7863_p7 = scmp.lt.s32.totalorder %s6153_s1, %s6153_s1 }
  0x39   :  { %6705 = vmatmul.mubr.msk.f32.vlgmr.msra.gmra.mxu0 %vm108_vm0, %v99_v3  ;;  %6699 = vmatprep.mubr.msk.f32.mxu1 %vm108_vm0, %v98_v2  ;;  %v8093_v18 = vld [vmem:[#allocation3 + $0x20] sm:$0xff]  ;;  %v8106_v20 = vld [vmem:[#allocation3 + $0x78] sm:$0xff]  ;;  %v8113_v21 = vld [vmem:[#allocation3 + $0x70] sm:$0xff]  ;;  %p7859_p6 = scmp.ne.s32.totalorder %s6153_s1, %s7858_s22  ;;  %p7864_p8 = scmp.lt.s32.totalorder %s7858_s22, %s7858_s22 }
  0x3a   :  { %6713 = vmatpush3.msra.mxu0 %v8043_v5  ;;  %6700 = vmatmul.mubr.msk.f32.vlgmr.msra.gmra.mxu1 %vm108_vm0, %v99_v3  ;;  %v8099_v19 = vld [vmem:[#allocation3 + $0x40] sm:$0xff]  ;;  %v8118_v22 = vld [vmem:[#allocation3 + $0x68] sm:$0xff]  ;;  %v6185_v24 = vld [vmem:[%s9074_s3] ss:$0 sm:$0xff] }
  0x3b   :  { %6714 = vmatprep.subr.mxu0 %v7936_v6  ;;  %6707 = vmatprep.subr.mxu1 %v6198_v7  ;;  %v8125_v23 = vld [vmem:[#allocation3 + $0x60] sm:$0xff]  ;;  %v6195_v27 = vld [vmem:[%s9074_s3 + $0x2] ss:$0 sm:$0xff]  ;;  %v6190_v29 = vld [vmem:[%s9074_s3 + $0x1] ss:$0 sm:$0xff]  ;;  %p7865_p9 = por %p7864_p8, %p7863_p7 }
  0x3c   :  { %6715 = vmatpush3.msra.mxu0 %v8051_v8  ;;  %6708 = vmatpush3.msra.mxu1 %v6198_v7  ;;  %v6200_v36 = vld [vmem:[%s9074_s3 + $0x3] ss:$0 sm:$0xff]  ;;  %v465_v1 = vld [vmem:[%s9079_s8] sm:$0x3] }
  0x3d   :  { %6716 = vmatprep.subr.mxu0 %v7936_v6  ;;  %6709 = vmatprep.mubr.msk.f32.mxu1 %vm108_vm0, %v98_v2  ;;  %p7866_p10 = pnand %p7865_p9, %p7859_p6 }
  0x3e   :  { %6717 = vmatpush3.msra.mxu0 %v8056_v9  ;;  %6720 = vmatprep.mubr.msk.f32.mxu0 %vm7937_vm1, %v7936_v6 }
  0x3f   :  { %6718 = vmatprep.subr.mxu0 %v7936_v6  ;;  %6723 = vmatprep.subr.mxu1 %v7936_v6 }
  0x40   :  { %6719 = vmatpush3.msra.mxu0 %v8061_v10  ;;  %6710 = vmatmul.mubr.msk.f32.vlgmr.msra.gmra.mxu1 %vm108_vm0, %v99_v3 }
  0x41   :  { %6721 = vmatmul.mubr.msk.f32.vlgmr.msra.gmra.mxu0 %vm466_vm2, %v464_v11  ;;  %6724 = vmatpush3.msra.mxu1 %v8069_v12 }
  0x42   :  { %6734 = vmatprep.subr.mxu0 %v7936_v6  ;;  %6725 = vmatprep.subr.mxu1 %v7936_v6 }
  0x43   :  { %6735 = vmatpush3.msra.mxu0 %v8075_v13  ;;  %6726 = vmatpush3.msra.mxu1 %v8077_v14 }
  0x44   :  { %6736 = vmatprep.subr.mxu0 %v7936_v6  ;;  %6727 = vmatprep.subr.mxu1 %v7936_v6 }
  0x45   :  { %6737 = vmatpush3.msra.mxu0 %v8083_v15  ;;  %6728 = vmatpush3.msra.mxu1 %v8085_v16 }
  0x46   :  { %6738 = vmatprep.subr.mxu0 %v7936_v6  ;;  %6729 = vmatprep.subr.mxu1 %v7936_v6 }
  0x47   :  { %6739 = vmatpush3.msra.mxu0 %v8091_v17  ;;  %6730 = vmatpush3.msra.mxu1 %v8093_v18 }
  0x48   :  { %6731 = vmatprep.mubr.msk.f32.mxu1 %vm7937_vm1, %v7936_v6  ;;  %6740 = vmatprep.subr.mxu0 %v7936_v6 }
  0x49   :  { %6732 = vmatmul.mubr.msk.f32.vlgmr.msra.gmra.mxu1 %vm466_vm2, %v464_v11  ;;  %6741 = vmatpush3.msra.mxu0 %v8099_v19 }
  0x4a   :  { %6742 = vmatprep.mubr.msk.f32.mxu0 %vm7937_vm1, %v7936_v6  ;;  %6745 = vmatprep.subr.mxu1 %v7936_v6 }
  0x4b   :  { %6743 = vmatmul.mubr.msk.f32.vlgmr.msra.gmra.mxu0 %vm466_vm2, %v464_v11  ;;  %6746 = vmatpush3.msra.mxu1 %v8106_v20 }
  0x4c   :  { %6747 = vmatprep.subr.mxu1 %v7936_v6  ;;  %6753 = vmatprep.mubr.msk.f32.mxu1 %vm7937_vm1, %v7936_v6 }
  0x4d   :  { %6748 = vmatpush3.msra.mxu1 %v8113_v21  ;;  %6756 = vmatprep.subr.mxu0 %v7936_v6 }
  0x4e   :  { %6749 = vmatprep.subr.mxu1 %v7936_v6  ;;  %6757 = vmatpush3.msra.mxu0 %v8043_v5 }
  0x4f   :  { %6750 = vmatpush3.msra.mxu1 %v8118_v22  ;;  %6758 = vmatprep.subr.mxu0 %v7936_v6 }
  0x50   :  { %6751 = vmatprep.subr.mxu1 %v7936_v6  ;;  %6759 = vmatpush3.msra.mxu0 %v8051_v8 }
  0x51   :  { %6752 = vmatpush3.msra.mxu1 %v8125_v23  ;;  %6760 = vmatprep.subr.mxu0 %v7936_v6 }
  0x52   :  { %6754 = vmatmul.mubr.msk.f32.vlgmr.msra.gmra.mxu1 %vm466_vm2, %v464_v11  ;;  %6767 = vmatprep.subr.mxu1 %v7936_v6 }
  0x53   :  { %6768 = vmatpush3.msra.mxu1 %v8069_v12  ;;  %6761 = vmatpush3.msra.mxu0 %v8056_v9 }
  0x54   :  { %6769 = vmatprep.subr.mxu1 %v7936_v6  ;;  %6762 = vmatprep.subr.mxu0 %v7936_v6 }
  0x55   :  { %6770 = vmatpush3.msra.mxu1 %v8077_v14  ;;  %6763 = vmatpush3.msra.mxu0 %v8061_v10 }
  0x56   :  { %6771 = vmatprep.subr.mxu1 %v7936_v6  ;;  %6764 = vmatprep.mubr.msk.f32.mxu0 %vm7937_vm1, %v7936_v6 }
  0x57   :  { %6772 = vmatpush3.msra.mxu1 %v8085_v16  ;;  %6775 = vmatprep.mubr.msk.f32.mxu1 %vm7937_vm1, %v7936_v6 }
  0x58   :  { %6773 = vmatprep.subr.mxu1 %v7936_v6  ;;  %6778 = vmatprep.subr.mxu0 %v7936_v6 }
  0x59   :  { %6774 = vmatpush3.msra.mxu1 %v8093_v18 }
  0x5a   :  { %6789 = vmatprep.subr.mxu1 %v7936_v6 }
  0xf6   :  { %v6696_v25 = vpop.f32.mrf.mxu1 }
  0xf7   :  { %v8155_v26 = vadd.f32 %v6696_v25, %v6185_v24 }
  0xf8   :  { %v181_v28 = vpop.f32.mrf.mxu1 }
  0xf9   :  { %v6706_v30 = vpop.f32.mrf.mxu0  ;;  %v8170_v37 = vadd.f32 %v6185_v24, %v181_v28 }
  0xfa   :  { %v6701_v31 = vpop.f32.mrf.mxu1  ;;  %v8163_v32 = vadd.f32 %v6706_v30, %v6195_v27 }
  0xfb   :  { %v8165_v33 = vadd.f32 %v6701_v31, %v6190_v29  ;;  %v351_v35 = vpop.f32.mrf.mxu0 }
  0xfc   :  { %v266_v34 = vpop.f32.mrf.mxu1  ;;  %v8181_v57 = vadd.f32 %v6195_v27, %v351_v35 }
  0xfd   :  { %v8175_v45 = vadd.f32 %v6190_v29, %v266_v34 }
 0x100   :  { %v6711_v38 = vpop.f32.mrf.mxu1 }
 0x101   :  { %v8172_v39 = vadd.f32 %v6711_v38, %v6200_v36  ;;  %v536_v40 = vpop.f32.mrf.mxu0 }
 0x102   :  { %v540_v41 = vadd.f32 %v536_v40, %v8170_v37  ;;  %v436_v44 = vpop.f32.mrf.mxu1 }
 0x103   :  { %v6722_v42 = vpop.f32.mrf.mxu0  ;;  %v8178_v52 = vadd.f32 %v6200_v36, %v436_v44 }
 0x104   :  { %v6204_v43 = vmul.f32 -1.442695, %v540_v41 }
 0x106   :  { %7486 = vpow2.f32 %v6204_v43 }
 0x109   :  { %v613_v46 = vpop.f32.mrf.mxu1 }
 0x10a   :  { %v617_v47 = vadd.f32 %v613_v46, %v8175_v45 }
 0x10b   :  { %v690_v48 = vpop.f32.mrf.mxu0  ;;  %v6733_v49 = vpop.f32.mrf.mxu1 }
 0x10c   :  { %v6206_v50 = vmul.f32 -1.442695, %v617_v47  ;;  %v694_v60 = vadd.f32 %v690_v48, %v8181_v57 }
 0x10d   :  { %v6744_v51 = vpop.f32.mrf.mxu0 }
 0x10e   :  { %7488 = vpow2.f32 %v6206_v50 }
 0x112   :  { %v762_v53 = vpop.f32.mrf.mxu1 }
 0x113   :  { %v766_v54 = vadd.f32 %v762_v53, %v8178_v52  ;;  %v7487_v56 = vpop.eup %7486 }
 0x114   :  { %v6755_v55 = vpop.f32.mrf.mxu1  ;;  %v544_v59 = vadd.f32 1.0, %v7487_v56 }
 0x115   :  { %v6209_v58 = vmul.f32 -1.442695, %v766_v54 }
 0x117   :  { %7490 = vpow2.f32 %v6209_v58 }
 0x118   :  { %7492 = vrcp.f32 %v544_v59 }
 0x119   :  { %7494 = vtanh.f32 %v694_v60 }
 0x11b   :  { %v7489_v61 = vpop.eup %7488 }
 0x11c   :  { %v621_v62 = vadd.f32 1.0, %v7489_v61 }
 0x11e   :  { %7496 = vrcp.f32 %v621_v62 }
 0x124   :  { %v7491_v63 = vpop.eup %7490 }
 0x125   :  { %v7493_v0 = vpop.eup %7492  ;;  %v770_v4 = vadd.f32 1.0, %v7491_v63 }
 0x126   :  { %v7495_v2 = vpop.eup %7494 }
 0x127   :  { %v774_v11 = vmul.f32 %v7495_v2, %v7493_v0  ;;  %7498 = vrcp.f32 %v770_v4 }
 0x12b   :  { %v7497_v3 = vpop.eup %7496 }
 0x12c   :  { %v773_v7 = vmul.f32 %v7497_v3, %v465_v1 }
 0x12e   :  { %v8187_v24 = vadd.f32 %v774_v11, %v773_v7 }
 0x130   :  { %7500 = vtanh.f32 %v8187_v24  ;;  %v1099_v62 = vrot.slane %v8187_v24, 6 }
 0x134   :  { %v7499_v25 = vpop.eup %7498 }
 0x13d   :  { %v7501_v27 = vpop.eup %7500 }
 0x13e   :  { %v777_v28 = vmul.f32 %v7501_v27, %v7499_v25 }
 0x140   :  { %779 = vst.msk [vmem:[#allocation2] sm:$0x3] %vm778_vm3, %v777_v28  ;;  %6765 = vmatmul.mubr.msk.f32.vlgmr.msra.gmra.mxu0 %vm466_vm2, %v777_v28  ;;  %6776 = vmatmul.mubr.msk.f32.vlgmr.msra.gmra.mxu1 %vm466_vm2, %v777_v28 }
 0x141   :  { %6779 = vmatpush3.msra.mxu0 %v8075_v13  ;;  %6790 = vmatpush3.msra.mxu1 %v8106_v20 }
 0x142   :  { %6780 = vmatprep.subr.mxu0 %v7936_v6  ;;  %6791 = vmatprep.subr.mxu1 %v7936_v6 }
 0x143   :  { %6781 = vmatpush3.msra.mxu0 %v8083_v15  ;;  %6792 = vmatpush3.msra.mxu1 %v8113_v21 }
 0x144   :  { %6782 = vmatprep.subr.mxu0 %v7936_v6  ;;  %6793 = vmatprep.subr.mxu1 %v7936_v6 }
 0x145   :  { %6783 = vmatpush3.msra.mxu0 %v8091_v17  ;;  %6794 = vmatpush3.msra.mxu1 %v8118_v22 }
 0x146   :  { %6784 = vmatprep.subr.mxu0 %v7936_v6  ;;  %6795 = vmatprep.subr.mxu1 %v7936_v6 }
 0x147   :  { %6785 = vmatpush3.msra.mxu0 %v8099_v19  ;;  %6786 = vmatprep.mubr.msk.f32.mxu0 %vm7937_vm1, %v7936_v6 }
 0x148   :  { %6796 = vmatpush3.msra.mxu1 %v8125_v23  ;;  %6797 = vmatprep.mubr.msk.f32.mxu1 %vm7937_vm1, %v7936_v6 }
 0x149   :  { %6787 = vmatmul.mubr.msk.f32.vlgmr.msra.gmra.mxu0 %vm466_vm2, %v777_v28  ;;  %6798 = vmatmul.mubr.msk.f32.vlgmr.msra.gmra.mxu1 %vm466_vm2, %v777_v28 }
 0x14a   :  { %6800 = vmatprep.subr.mxu0 %v7936_v6  ;;  %6811 = vmatprep.subr.mxu1 %v7936_v6 }
 0x14b   :  { %6801 = vmatpush3.msra.mxu0 %v8043_v5  ;;  %6812 = vmatpush3.msra.mxu1 %v8069_v12 }
 0x14c   :  { %6802 = vmatprep.subr.mxu0 %v7936_v6  ;;  %6813 = vmatprep.subr.mxu1 %v7936_v6 }
 0x14d   :  { %6803 = vmatpush3.msra.mxu0 %v8051_v8  ;;  %6814 = vmatpush3.msra.mxu1 %v8077_v14 }
 0x14e   :  { %6804 = vmatprep.subr.mxu0 %v7936_v6  ;;  %6815 = vmatprep.subr.mxu1 %v7936_v6 }
 0x14f   :  { %6805 = vmatpush3.msra.mxu0 %v8056_v9  ;;  %6816 = vmatpush3.msra.mxu1 %v8085_v16 }
 0x150   :  { %6806 = vmatprep.subr.mxu0 %v7936_v6  ;;  %6817 = vmatprep.subr.mxu1 %v7936_v6 }
 0x151   :  { %6807 = vmatpush3.msra.mxu0 %v8061_v10  ;;  %6818 = vmatpush3.msra.mxu1 %v8093_v18 }
 0x152   :  { %6808 = vmatprep.mubr.msk.f32.mxu0 %vm7937_vm1, %v7936_v6  ;;  %6819 = vmatprep.mubr.msk.f32.mxu1 %vm7937_vm1, %v7936_v6 }
 0x153   :  { %6822 = vmatprep.subr.mxu0 %v7936_v6  ;;  %6833 = vmatprep.subr.mxu1 %v7936_v6 }
 0x200   :  { %v849_v29 = vpop.f32.mrf.mxu0  ;;  %v929_v30 = vpop.f32.mrf.mxu1 }
 0x201   :  { %v854_v31 = vrot.slane %v849_v29, 6  ;;  %v934_v34 = vrot.slane %v929_v30, 6 }
 0x202   :  { %v6766_v35 = vpop.f32.mrf.mxu0  ;;  %v6777_v36 = vpop.f32.mrf.mxu1 }
 0x203   :  { %v856_v38 = vadd.f32 %v854_v31, %v8170_v37  ;;  %v936_v40 = vadd.f32 %v934_v34, %v8175_v45 }
 0x205   :  { %v6211_v41 = vmul.f32 -1.442695, %v856_v38  ;;  %v6213_v42 = vmul.f32 -1.442695, %v936_v40 }
 0x207   :  { %7502 = vpow2.f32 %v6211_v41 }
 0x208   :  { %7504 = vpow2.f32 %v6213_v42 }
 0x209   :  { %v1009_v43 = vpop.f32.mrf.mxu0  ;;  %v1084_v44 = vpop.f32.mrf.mxu1 }
 0x20a   :  { %v1089_v46 = vrot.slane %v1084_v44, 6  ;;  %v1014_v50 = vrot.slane %v1009_v43, 6 }
 0x20b   :  { %v6788_v47 = vpop.f32.mrf.mxu0  ;;  %v6799_v48 = vpop.f32.mrf.mxu1 }
 0x20c   :  { %v1091_v49 = vadd.f32 %v1089_v46, %v8178_v52  ;;  %v1016_v53 = vadd.f32 %v1014_v50, %v8181_v57 }
 0x20e   :  { %v6216_v51 = vmul.f32 -1.442695, %v1091_v49 }
 0x210   :  { %7506 = vpow2.f32 %v6216_v51 }
 0x211   :  { %7508 = vtanh.f32 %v1016_v53 }
 0x214   :  { %v7503_v54 = vpop.eup %7502 }
 0x215   :  { %v7505_v55 = vpop.eup %7504  ;;  %v860_v56 = vadd.f32 1.0, %v7503_v54 }
 0x216   :  { %v940_v58 = vadd.f32 1.0, %v7505_v55 }
 0x217   :  { %7510 = vrcp.f32 %v860_v56 }
 0x218   :  { %7512 = vrcp.f32 %v940_v58 }
 0x21d   :  { %v7507_v59 = vpop.eup %7506 }
 0x21e   :  { %v7509_v60 = vpop.eup %7508  ;;  %v1095_v1 = vadd.f32 1.0, %v7507_v59 }
 0x220   :  { %7514 = vrcp.f32 %v1095_v1 }
 0x224   :  { %v7511_v61 = vpop.eup %7510 }
 0x225   :  { %v7513_v63 = vpop.eup %7512  ;;  %v1102_v0 = vmul.f32 %v7511_v61, %v7509_v60 }
 0x226   :  { %v1101_v2 = vmul.f32 %v7513_v63, %v1099_v62 }
 0x228   :  { %v8240_v3 = vadd.f32 %v1102_v0, %v1101_v2 }
 0x22a   :  { %7516 = vtanh.f32 %v8240_v3  ;;  %v1428_v59 = vrot.slane %v8240_v3, 6 }
 0x22d   :  { %v7515_v4 = vpop.eup %7514 }
 0x237   :  { %v7517_v7 = vpop.eup %7516 }
 0x238   :  { %v1105_v11 = vmul.f32 %v7517_v7, %v7515_v4 }
 0x23a   :  { %1107 = vst.msk [vmem:[#allocation2] sm:$0xc] %vm1106_vm4, %v1105_v11  ;;  %v1109_v25 = vrot.slane %v1105_v11, 2 }
 0x23c   :  { %6809 = vmatmul.mubr.msk.f32.vlgmr.msra.gmra.mxu0 %vm466_vm2, %v1109_v25  ;;  %6820 = vmatmul.mubr.msk.f32.vlgmr.msra.gmra.mxu1 %vm466_vm2, %v1109_v25 }
 0x23d   :  { %6823 = vmatpush3.msra.mxu0 %v8075_v13  ;;  %6834 = vmatpush3.msra.mxu1 %v8106_v20 }
 0x23e   :  { %6824 = vmatprep.subr.mxu0 %v7936_v6  ;;  %6835 = vmatprep.subr.mxu1 %v7936_v6 }
 0x23f   :  { %6825 = vmatpush3.msra.mxu0 %v8083_v15  ;;  %6836 = vmatpush3.msra.mxu1 %v8113_v21 }
 0x240   :  { %6826 = vmatprep.subr.mxu0 %v7936_v6  ;;  %6837 = vmatprep.subr.mxu1 %v7936_v6 }
 0x241   :  { %6827 = vmatpush3.msra.mxu0 %v8091_v17  ;;  %6838 = vmatpush3.msra.mxu1 %v8118_v22 }
 0x242   :  { %6828 = vmatprep.subr.mxu0 %v7936_v6  ;;  %6839 = vmatprep.subr.mxu1 %v7936_v6 }
 0x243   :  { %6829 = vmatpush3.msra.mxu0 %v8099_v19  ;;  %6830 = vmatprep.mubr.msk.f32.mxu0 %vm7937_vm1, %v7936_v6 }
 0x244   :  { %6840 = vmatpush3.msra.mxu1 %v8125_v23  ;;  %6841 = vmatprep.mubr.msk.f32.mxu1 %vm7937_vm1, %v7936_v6 }
 0x245   :  { %6831 = vmatmul.mubr.msk.f32.vlgmr.msra.gmra.mxu0 %vm466_vm2, %v1109_v25  ;;  %6842 = vmatmul.mubr.msk.f32.vlgmr.msra.gmra.mxu1 %vm466_vm2, %v1109_v25 }
 0x246   :  { %6844 = vmatprep.subr.mxu0 %v7936_v6  ;;  %6855 = vmatprep.subr.mxu1 %v7936_v6 }
 0x247   :  { %6845 = vmatpush3.msra.mxu0 %v8043_v5  ;;  %6856 = vmatpush3.msra.mxu1 %v8069_v12 }
 0x248   :  { %6846 = vmatprep.subr.mxu0 %v7936_v6  ;;  %6857 = vmatprep.subr.mxu1 %v7936_v6 }
 0x249   :  { %6847 = vmatpush3.msra.mxu0 %v8051_v8  ;;  %6858 = vmatpush3.msra.mxu1 %v8077_v14 }
 0x24a   :  { %6848 = vmatprep.subr.mxu0 %v7936_v6  ;;  %6859 = vmatprep.subr.mxu1 %v7936_v6 }
 0x24b   :  { %6849 = vmatpush3.msra.mxu0 %v8056_v9  ;;  %6860 = vmatpush3.msra.mxu1 %v8085_v16 }
 0x24c   :  { %6850 = vmatprep.subr.mxu0 %v7936_v6  ;;  %6861 = vmatprep.subr.mxu1 %v7936_v6 }
 0x24d   :  { %6851 = vmatpush3.msra.mxu0 %v8061_v10  ;;  %6862 = vmatpush3.msra.mxu1 %v8093_v18 }
 0x24e   :  { %6852 = vmatprep.mubr.msk.f32.mxu0 %vm7937_vm1, %v7936_v6  ;;  %6863 = vmatprep.mubr.msk.f32.mxu1 %vm7937_vm1, %v7936_v6 }
 0x24f   :  { %6866 = vmatprep.subr.mxu0 %v7936_v6  ;;  %6877 = vmatprep.subr.mxu1 %v7936_v6 }
 0x2fc   :  { %v1178_v24 = vpop.f32.mrf.mxu0  ;;  %v1258_v27 = vpop.f32.mrf.mxu1 }
 0x2fd   :  { %v1183_v28 = vrot.slane %v1178_v24, 4  ;;  %v1263_v29 = vrot.slane %v1258_v27, 4 }
 0x2fe   :  { %v6810_v30 = vpop.f32.mrf.mxu0  ;;  %v6821_v31 = vpop.f32.mrf.mxu1 }
 0x2ff   :  { %v1185_v34 = vadd.f32 %v1183_v28, %v8170_v37  ;;  %v1265_v35 = vadd.f32 %v1263_v29, %v8175_v45 }
 0x301   :  { %v6218_v36 = vmul.f32 -1.442695, %v1185_v34  ;;  %v6220_v38 = vmul.f32 -1.442695, %v1265_v35 }
 0x303   :  { %7518 = vpow2.f32 %v6218_v36 }
 0x304   :  { %7520 = vpow2.f32 %v6220_v38 }
 0x305   :  { %v1338_v40 = vpop.f32.mrf.mxu0  ;;  %v1413_v41 = vpop.f32.mrf.mxu1 }
 0x306   :  { %v1418_v42 = vrot.slane %v1413_v41, 4  ;;  %v1343_v47 = vrot.slane %v1338_v40, 4 }
 0x307   :  { %v6832_v43 = vpop.f32.mrf.mxu0  ;;  %v6843_v44 = vpop.f32.mrf.mxu1 }
 0x308   :  { %v1420_v46 = vadd.f32 %v1418_v42, %v8178_v52  ;;  %v1345_v49 = vadd.f32 %v1343_v47, %v8181_v57 }
 0x30a   :  { %v6223_v48 = vmul.f32 -1.442695, %v1420_v46 }
 0x30c   :  { %7522 = vpow2.f32 %v6223_v48 }
 0x30d   :  { %7524 = vtanh.f32 %v1345_v49 }
 0x310   :  { %v7519_v50 = vpop.eup %7518 }
 0x311   :  { %v7521_v51 = vpop.eup %7520  ;;  %v1189_v53 = vadd.f32 1.0, %v7519_v50 }
 0x312   :  { %v1269_v54 = vadd.f32 1.0, %v7521_v51 }
 0x313   :  { %7526 = vrcp.f32 %v1189_v53 }
 0x314   :  { %7528 = vrcp.f32 %v1269_v54 }
 0x319   :  { %v7523_v55 = vpop.eup %7522 }
 0x31a   :  { %v7525_v56 = vpop.eup %7524  ;;  %v1424_v62 = vadd.f32 1.0, %v7523_v55 }
 0x31c   :  { %7530 = vrcp.f32 %v1424_v62 }
 0x320   :  { %v7527_v58 = vpop.eup %7526 }
 0x321   :  { %v7529_v60 = vpop.eup %7528  ;;  %v1431_v61 = vmul.f32 %v7527_v58, %v7525_v56 }
 0x322   :  { %v1430_v63 = vmul.f32 %v7529_v60, %v1428_v59 }
 0x324   :  { %v8293_v0 = vadd.f32 %v1431_v61, %v1430_v63 }
 0x326   :  { %7532 = vtanh.f32 %v8293_v0  ;;  %v1757_v53 = vrot.slane %v8293_v0, 6 }
 0x329   :  { %v7531_v1 = vpop.eup %7530 }
 0x333   :  { %v7533_v2 = vpop.eup %7532 }
 0x334   :  { %v1434_v4 = vmul.f32 %v7533_v2, %v7531_v1 }
 0x336   :  { %1436 = vst.msk [vmem:[#allocation2] sm:$0x30] %vm1435_vm5, %v1434_v4  ;;  %v1438_v7 = vrot.slane %v1434_v4, 4 }
 0x338   :  { %6853 = vmatmul.mubr.msk.f32.vlgmr.msra.gmra.mxu0 %vm466_vm2, %v1438_v7  ;;  %6864 = vmatmul.mubr.msk.f32.vlgmr.msra.gmra.mxu1 %vm466_vm2, %v1438_v7 }
 0x339   :  { %6867 = vmatpush3.msra.mxu0 %v8075_v13  ;;  %6878 = vmatpush3.msra.mxu1 %v8106_v20 }
 0x33a   :  { %6868 = vmatprep.subr.mxu0 %v7936_v6  ;;  %6879 = vmatprep.subr.mxu1 %v7936_v6 }
 0x33b   :  { %6869 = vmatpush3.msra.mxu0 %v8083_v15  ;;  %6880 = vmatpush3.msra.mxu1 %v8113_v21 }
 0x33c   :  { %6870 = vmatprep.subr.mxu0 %v7936_v6  ;;  %6881 = vmatprep.subr.mxu1 %v7936_v6 }
 0x33d   :  { %6871 = vmatpush3.msra.mxu0 %v8091_v17  ;;  %6882 = vmatpush3.msra.mxu1 %v8118_v22 }
 0x33e   :  { %6872 = vmatprep.subr.mxu0 %v7936_v6  ;;  %6883 = vmatprep.subr.mxu1 %v7936_v6 }
 0x33f   :  { %6873 = vmatpush3.msra.mxu0 %v8099_v19  ;;  %6874 = vmatprep.mubr.msk.f32.mxu0 %vm7937_vm1, %v7936_v6 }
 0x340   :  { %6884 = vmatpush3.msra.mxu1 %v8125_v23  ;;  %6885 = vmatprep.mubr.msk.f32.mxu1 %vm7937_vm1, %v7936_v6 }
 0x341   :  { %6875 = vmatmul.mubr.msk.f32.vlgmr.msra.gmra.mxu0 %vm466_vm2, %v1438_v7  ;;  %6886 = vmatmul.mubr.msk.f32.vlgmr.msra.gmra.mxu1 %vm466_vm2, %v1438_v7 }
 0x342   :  { %6888 = vmatprep.subr.mxu0 %v7936_v6  ;;  %6899 = vmatprep.subr.mxu1 %v7936_v6 }
 0x343   :  { %6889 = vmatpush3.msra.mxu0 %v8043_v5  ;;  %6900 = vmatpush3.msra.mxu1 %v8069_v12 }
 0x344   :  { %6890 = vmatprep.subr.mxu0 %v7936_v6  ;;  %6901 = vmatprep.subr.mxu1 %v7936_v6 }
 0x345   :  { %6891 = vmatpush3.msra.mxu0 %v8051_v8  ;;  %6902 = vmatpush3.msra.mxu1 %v8077_v14 }
 0x346   :  { %6892 = vmatprep.subr.mxu0 %v7936_v6  ;;  %6903 = vmatprep.subr.mxu1 %v7936_v6 }
 0x347   :  { %6893 = vmatpush3.msra.mxu0 %v8056_v9  ;;  %6904 = vmatpush3.msra.mxu1 %v8085_v16 }
 0x348   :  { %6894 = vmatprep.subr.mxu0 %v7936_v6  ;;  %6905 = vmatprep.subr.mxu1 %v7936_v6 }
 0x349   :  { %6895 = vmatpush3.msra.mxu0 %v8061_v10  ;;  %6906 = vmatpush3.msra.mxu1 %v8093_v18 }
 0x34a   :  { %6896 = vmatprep.mubr.msk.f32.mxu0 %vm7937_vm1, %v7936_v6  ;;  %6907 = vmatprep.mubr.msk.f32.mxu1 %vm7937_vm1, %v7936_v6 }
 0x34b   :  { %6910 = vmatprep.subr.mxu0 %v7936_v6  ;;  %6921 = vmatprep.subr.mxu1 %v7936_v6 }
 0x3f8   :  { %v1507_v3 = vpop.f32.mrf.mxu0  ;;  %v1587_v11 = vpop.f32.mrf.mxu1 }
 0x3f9   :  { %v1512_v25 = vrot.slane %v1507_v3, 2  ;;  %v1592_v24 = vrot.slane %v1587_v11, 2 }
 0x3fa   :  { %v6854_v27 = vpop.f32.mrf.mxu0  ;;  %v6865_v28 = vpop.f32.mrf.mxu1 }
 0x3fb   :  { %v1514_v29 = vadd.f32 %v1512_v25, %v8170_v37  ;;  %v1594_v30 = vadd.f32 %v1592_v24, %v8175_v45 }
 0x3fd   :  { %v6225_v31 = vmul.f32 -1.442695, %v1514_v29  ;;  %v6227_v34 = vmul.f32 -1.442695, %v1594_v30 }
 0x3ff   :  { %7534 = vpow2.f32 %v6225_v31 }
 0x400   :  { %7536 = vpow2.f32 %v6227_v34 }
 0x401   :  { %v1667_v35 = vpop.f32.mrf.mxu0  ;;  %v1742_v36 = vpop.f32.mrf.mxu1 }
 0x402   :  { %v1747_v38 = vrot.slane %v1742_v36, 2  ;;  %v1672_v43 = vrot.slane %v1667_v35, 2 }
 0x403   :  { %v6876_v40 = vpop.f32.mrf.mxu0  ;;  %v6887_v41 = vpop.f32.mrf.mxu1 }
 0x404   :  { %v1749_v42 = vadd.f32 %v1747_v38, %v8178_v52  ;;  %v1674_v46 = vadd.f32 %v1672_v43, %v8181_v57 }
 0x406   :  { %v6230_v44 = vmul.f32 -1.442695, %v1749_v42 }
 0x408   :  { %7538 = vpow2.f32 %v6230_v44 }
 0x409   :  { %7540 = vtanh.f32 %v1674_v46 }
 0x40c   :  { %v7535_v47 = vpop.eup %7534 }
 0x40d   :  { %v7537_v48 = vpop.eup %7536  ;;  %v1518_v37 = vadd.f32 1.0, %v7535_v47 }
 0x40e   :  { %v1598_v45 = vadd.f32 1.0, %v7537_v48 }
 0x40f   :  { %7542 = vrcp.f32 %v1518_v37 }
 0x410   :  { %7544 = vrcp.f32 %v1598_v45 }
 0x415   :  { %v7539_v49 = vpop.eup %7538 }
 0x416   :  { %v7541_v50 = vpop.eup %7540  ;;  %v1753_v52 = vadd.f32 1.0, %v7539_v49 }
 0x418   :  { %7546 = vrcp.f32 %v1753_v52 }
 0x41c   :  { %v7543_v51 = vpop.eup %7542 }
 0x41d   :  { %v7545_v54 = vpop.eup %7544  ;;  %v1760_v55 = vmul.f32 %v7543_v51, %v7541_v50 }
 0x41e   :  { %v1759_v56 = vmul.f32 %v7545_v54, %v1757_v53 }
 0x420   :  { %v8346_v58 = vadd.f32 %v1760_v55, %v1759_v56 }
 0x422   :  { %7548 = vtanh.f32 %v8346_v58  ;;  %v2074_v42 = vrot.slane %v8346_v58, 6 }
 0x425   :  { %v7547_v57 = vpop.eup %7546 }
 0x42f   :  { %v7549_v59 = vpop.eup %7548 }
 0x430   :  { %v1763_v60 = vmul.f32 %v7549_v59, %v7547_v57 }
 0x432   :  { %1765 = vst.msk [vmem:[#allocation2] sm:$0xc0] %vm1764_vm6, %v1763_v60  ;;  %v1767_v61 = vrot.slane %v1763_v60, 6 }
 0x434   :  { %6897 = vmatmul.mubr.msk.f32.vlgmr.msra.gmra.mxu0 %vm466_vm2, %v1767_v61  ;;  %6908 = vmatmul.mubr.msk.f32.vlgmr.msra.gmra.mxu1 %vm466_vm2, %v1767_v61 }
 0x435   :  { %6911 = vmatpush3.msra.mxu0 %v8075_v13  ;;  %6922 = vmatpush3.msra.mxu1 %v8106_v20 }
 0x436   :  { %6912 = vmatprep.subr.mxu0 %v7936_v6  ;;  %6923 = vmatprep.subr.mxu1 %v7936_v6 }
 0x437   :  { %6913 = vmatpush3.msra.mxu0 %v8083_v15  ;;  %6924 = vmatpush3.msra.mxu1 %v8113_v21 }
 0x438   :  { %6914 = vmatprep.subr.mxu0 %v7936_v6  ;;  %6925 = vmatprep.subr.mxu1 %v7936_v6 }
 0x439   :  { %6915 = vmatpush3.msra.mxu0 %v8091_v17  ;;  %6926 = vmatpush3.msra.mxu1 %v8118_v22 }
 0x43a   :  { %6916 = vmatprep.subr.mxu0 %v7936_v6  ;;  %6927 = vmatprep.subr.mxu1 %v7936_v6 }
 0x43b   :  { %6917 = vmatpush3.msra.mxu0 %v8099_v19  ;;  %6918 = vmatprep.mubr.msk.f32.mxu0 %vm7937_vm1, %v7936_v6 }
 0x43c   :  { %6928 = vmatpush3.msra.mxu1 %v8125_v23  ;;  %6929 = vmatprep.mubr.msk.f32.mxu1 %vm7937_vm1, %v7936_v6 }
 0x43d   :  { %6919 = vmatmul.mubr.msk.f32.vlgmr.msra.gmra.mxu0 %vm466_vm2, %v1767_v61  ;;  %6930 = vmatmul.mubr.msk.f32.vlgmr.msra.gmra.mxu1 %vm466_vm2, %v1767_v61 }
 0x43e   :  { %6932 = vmatprep.subr.mxu0 %v7936_v6  ;;  %6943 = vmatprep.subr.mxu1 %v7936_v6 }
 0x43f   :  { %6933 = vmatpush3.msra.mxu0 %v8043_v5  ;;  %6944 = vmatpush3.msra.mxu1 %v8069_v12 }
 0x440   :  { %6934 = vmatprep.subr.mxu0 %v7936_v6  ;;  %6945 = vmatprep.subr.mxu1 %v7936_v6 }
 0x441   :  { %6935 = vmatpush3.msra.mxu0 %v8051_v8  ;;  %6946 = vmatpush3.msra.mxu1 %v8077_v14 }
 0x442   :  { %6936 = vmatprep.subr.mxu0 %v7936_v6  ;;  %6947 = vmatprep.subr.mxu1 %v7936_v6 }
 0x443   :  { %6937 = vmatpush3.msra.mxu0 %v8056_v9  ;;  %6948 = vmatpush3.msra.mxu1 %v8085_v16 }
 0x444   :  { %6938 = vmatprep.subr.mxu0 %v7936_v6  ;;  %6949 = vmatprep.subr.mxu1 %v7936_v6 }
 0x445   :  { %6939 = vmatpush3.msra.mxu0 %v8061_v10  ;;  %6950 = vmatpush3.msra.mxu1 %v8093_v18 }
 0x446   :  { %6940 = vmatprep.mubr.msk.f32.mxu0 %vm7937_vm1, %v7936_v6  ;;  %6951 = vmatprep.mubr.msk.f32.mxu1 %vm7937_vm1, %v7936_v6 }
 0x447   :  { %6954 = vmatprep.subr.mxu0 %v7936_v6  ;;  %6965 = vmatprep.subr.mxu1 %v7936_v6 }
 0x4f4   :  { %v1836_v62 = vpop.f32.mrf.mxu0  ;;  %v1913_v63 = vpop.f32.mrf.mxu1 }
 0x4f5   :  { %v1840_v0 = vadd.f32 %v1836_v62, %v8155_v26  ;;  %v1917_v1 = vadd.f32 %v1913_v63, %v8165_v33 }
 0x4f6   :  { %v6898_v2 = vpop.f32.mrf.mxu0  ;;  %v6909_v4 = vpop.f32.mrf.mxu1 }
 0x4f7   :  { %v6232_v7 = vmul.f32 -1.442695, %v1840_v0  ;;  %v6234_v3 = vmul.f32 -1.442695, %v1917_v1 }
 0x4f9   :  { %7550 = vpow2.f32 %v6232_v7 }
 0x4fa   :  { %7552 = vpow2.f32 %v6234_v3 }
 0x4fd   :  { %v1990_v11 = vpop.f32.mrf.mxu0  ;;  %v2062_v25 = vpop.f32.mrf.mxu1 }
 0x4fe   :  { %v2066_v24 = vadd.f32 %v2062_v25, %v8172_v39  ;;  %v1994_v30 = vadd.f32 %v1990_v11, %v8163_v32  ;;  %v8458_v11 = vld [vmem:[#allocation3 + $0x58] sm:$0xff] }
 0x4ff   :  { %v6920_v27 = vpop.f32.mrf.mxu0  ;;  %v6931_v28 = vpop.f32.mrf.mxu1  ;;  %v8461_v25 = vld [vmem:[#allocation3 + $0x78] sm:$0xff] }
 0x500   :  { %v6237_v29 = vmul.f32 -1.442695, %v2066_v24  ;;  %v8466_v24 = vld [vmem:[#allocation3 + $0x50] sm:$0xff]  ;;  %v8474_v28 = vld [vmem:[#allocation3 + $0x48] sm:$0xff] }
 0x501   :  { %v8469_v27 = vld [vmem:[#allocation3 + $0x70] sm:$0xff] }
 0x502   :  { %7554 = vpow2.f32 %v6237_v29  ;;  %v8477_v29 = vld [vmem:[#allocation3 + $0x68] sm:$0xff] }
 0x503   :  { %7556 = vtanh.f32 %v1994_v30  ;;  %v8482_v30 = vld [vmem:[#allocation3 + $0x40] sm:$0xff] }
 0x506   :  { %v7551_v31 = vpop.eup %7550 }
 0x507   :  { %v7553_v34 = vpop.eup %7552  ;;  %v1844_v35 = vadd.f32 1.0, %v7551_v31  ;;  %v8487_v31 = vld [vmem:[#allocation3 + $0x60] sm:$0xff] }
 0x508   :  { %v1921_v36 = vadd.f32 1.0, %v7553_v34  ;;  %v7754_v34 = vld [vmem:[#allocation3 + $0x18] sm:$0xff] }
 0x509   :  { %7558 = vrcp.f32 %v1844_v35  ;;  %v7755_v35 = vld [vmem:[#allocation3 + $0x38] sm:$0xff] }
 0x50a   :  { %7560 = vrcp.f32 %v1921_v36  ;;  %v7756_v36 = vld [vmem:[#allocation3 + $0x10] sm:$0xff] }
 0x50f   :  { %v7555_v38 = vpop.eup %7554 }
 0x510   :  { %v7557_v40 = vpop.eup %7556  ;;  %v2070_v46 = vadd.f32 1.0, %v7555_v38  ;;  %v7757_v38 = vld [vmem:[#allocation3 + $0x30] sm:$0xff] }
 0x512   :  { %7562 = vrcp.f32 %v2070_v46 }
 0x516   :  { %v7559_v41 = vpop.eup %7558 }
 0x517   :  { %v7561_v43 = vpop.eup %7560  ;;  %v2077_v44 = vmul.f32 %v7559_v41, %v7557_v40  ;;  %v7758_v40 = vld [vmem:[#allocation3 + $0x8] sm:$0xff] }
 0x518   :  { %v2076_v47 = vmul.f32 %v7561_v43, %v2074_v42  ;;  %v7759_v41 = vld [vmem:[#allocation3 + $0x28] sm:$0xff]  ;;  %v7760_v42 = vld [vmem:[#allocation3] sm:$0xff] }
 0x519   :  { %v7761_v43 = vld [vmem:[#allocation3 + $0x20] sm:$0xff] }
 0x51a   :  { %v8399_v48 = vadd.f32 %v2077_v44, %v2076_v47 }
 0x51c   :  { %7564 = vtanh.f32 %v8399_v48  ;;  %v2401_v60 = vrot.slane %v8399_v48, 6 }
 0x51f   :  { %v7563_v37 = vpop.eup %7562 }
 0x529   :  { %v7565_v45 = vpop.eup %7564 }
 0x52a   :  { %v2080_v49 = vmul.f32 %v7565_v45, %v7563_v37 }
 0x52c   :  { %2081 = vst.msk [vmem:[#allocation2 + $0x8] sm:$0x3] %vm778_vm3, %v2080_v49  ;;  %6941 = vmatmul.mubr.msk.f32.vlgmr.msra.gmra.mxu0 %vm466_vm2, %v2080_v49  ;;  %6952 = vmatmul.mubr.msk.f32.vlgmr.msra.gmra.mxu1 %vm466_vm2, %v2080_v49 }
 0x52d   :  { %6955 = vmatpush3.msra.mxu0 %v8075_v13  ;;  %6966 = vmatpush3.msra.mxu1 %v8106_v20 }
 0x52e   :  { %6956 = vmatprep.subr.mxu0 %v7936_v6  ;;  %6967 = vmatprep.subr.mxu1 %v7936_v6 }
 0x52f   :  { %6957 = vmatpush3.msra.mxu0 %v8083_v15  ;;  %6968 = vmatpush3.msra.mxu1 %v8113_v21 }
 0x530   :  { %6958 = vmatprep.subr.mxu0 %v7936_v6  ;;  %6969 = vmatprep.subr.mxu1 %v7936_v6 }
 0x531   :  { %6959 = vmatpush3.msra.mxu0 %v8091_v17  ;;  %6970 = vmatpush3.msra.mxu1 %v8118_v22 }
 0x532   :  { %6960 = vmatprep.subr.mxu0 %v7936_v6  ;;  %6971 = vmatprep.subr.mxu1 %v7936_v6 }
 0x533   :  { %6961 = vmatpush3.msra.mxu0 %v8099_v19  ;;  %6962 = vmatprep.mubr.msk.f32.mxu0 %vm7937_vm1, %v7936_v6 }
 0x534   :  { %6972 = vmatpush3.msra.mxu1 %v8125_v23  ;;  %6973 = vmatprep.mubr.msk.f32.mxu1 %vm7937_vm1, %v7936_v6 }
 0x535   :  { %6963 = vmatmul.mubr.msk.f32.vlgmr.msra.gmra.mxu0 %vm466_vm2, %v2080_v49  ;;  %6974 = vmatmul.mubr.msk.f32.vlgmr.msra.gmra.mxu1 %vm466_vm2, %v2080_v49 }
 0x536   :  { %6976 = vmatprep.subr.mxu0 %v7936_v6  ;;  %6987 = vmatprep.subr.mxu1 %v7936_v6 }
 0x537   :  { %6977 = vmatpush3.msra.mxu0 %v8043_v5  ;;  %6988 = vmatpush3.msra.mxu1 %v8069_v12 }
 0x538   :  { %6978 = vmatprep.subr.mxu0 %v7936_v6  ;;  %6989 = vmatprep.subr.mxu1 %v7936_v6 }
 0x539   :  { %6979 = vmatpush3.msra.mxu0 %v8051_v8  ;;  %6990 = vmatpush3.msra.mxu1 %v8077_v14 }
 0x53a   :  { %6980 = vmatprep.subr.mxu0 %v7936_v6  ;;  %6991 = vmatprep.subr.mxu1 %v7936_v6 }
 0x53b   :  { %6981 = vmatpush3.msra.mxu0 %v8056_v9  ;;  %6992 = vmatpush3.msra.mxu1 %v8085_v16 }
 0x53c   :  { %6982 = vmatprep.subr.mxu0 %v7936_v6  ;;  %6993 = vmatprep.subr.mxu1 %v7936_v6 }
 0x53d   :  { %6983 = vmatpush3.msra.mxu0 %v8061_v10  ;;  %6994 = vmatpush3.msra.mxu1 %v8093_v18 }
 0x53e   :  { %6984 = vmatprep.mubr.msk.f32.mxu0 %vm7937_vm1, %v7936_v6  ;;  %6995 = vmatprep.mubr.msk.f32.mxu1 %vm7937_vm1, %v7936_v6 }
 0x53f   :  { %6998 = vmatprep.subr.mxu0 %v7936_v6  ;;  %7009 = vmatprep.subr.mxu1 %v7936_v6 }
 0x5ec   :  { %v2151_v5 = vpop.f32.mrf.mxu0  ;;  %v2231_v8 = vpop.f32.mrf.mxu1 }
 0x5ed   :  { %v2156_v9 = vrot.slane %v2151_v5, 6  ;;  %v2236_v12 = vrot.slane %v2231_v8, 6 }
 0x5ee   :  { %v6942_v13 = vpop.f32.mrf.mxu0  ;;  %v6953_v14 = vpop.f32.mrf.mxu1 }
 0x5ef   :  { %v2158_v10 = vadd.f32 %v2156_v9, %v8155_v26  ;;  %v2238_v15 = vadd.f32 %v2236_v12, %v8165_v33 }
 0x5f1   :  { %v6239_v16 = vmul.f32 -1.442695, %v2158_v10  ;;  %v6241_v17 = vmul.f32 -1.442695, %v2238_v15 }
 0x5f3   :  { %7566 = vpow2.f32 %v6239_v16 }
 0x5f4   :  { %7568 = vpow2.f32 %v6241_v17 }
 0x5f5   :  { %v2311_v18 = vpop.f32.mrf.mxu0  ;;  %v2386_v19 = vpop.f32.mrf.mxu1 }
 0x5f6   :  { %v2391_v20 = vrot.slane %v2386_v19, 6  ;;  %v2316_v50 = vrot.slane %v2311_v18, 6 }
 0x5f7   :  { %v6964_v21 = vpop.f32.mrf.mxu0  ;;  %v6975_v22 = vpop.f32.mrf.mxu1 }
 0x5f8   :  { %v2393_v23 = vadd.f32 %v2391_v20, %v8172_v39  ;;  %v2318_v53 = vadd.f32 %v2316_v50, %v8163_v32 }
 0x5fa   :  { %v6244_v51 = vmul.f32 -1.442695, %v2393_v23 }
 0x5fc   :  { %7570 = vpow2.f32 %v6244_v51 }
 0x5fd   :  { %7572 = vtanh.f32 %v2318_v53 }
 0x600   :  { %v7567_v54 = vpop.eup %7566 }
 0x601   :  { %v7569_v55 = vpop.eup %7568  ;;  %v2162_v52 = vadd.f32 1.0, %v7567_v54 }
 0x602   :  { %v2242_v56 = vadd.f32 1.0, %v7569_v55 }
 0x603   :  { %7574 = vrcp.f32 %v2162_v52 }
 0x604   :  { %7576 = vrcp.f32 %v2242_v56 }
 0x609   :  { %v7571_v58 = vpop.eup %7570 }
 0x60a   :  { %v7573_v57 = vpop.eup %7572  ;;  %v2397_v63 = vadd.f32 1.0, %v7571_v58 }
 0x60c   :  { %7578 = vrcp.f32 %v2397_v63  ;;  %v8539_v63 = vld [vmem:[#allocation2] sm:$0xff] }
 0x610   :  { %v7575_v59 = vpop.eup %7574 }
 0x611   :  { %v7577_v61 = vpop.eup %7576  ;;  %v2404_v62 = vmul.f32 %v7575_v59, %v7573_v57 }
 0x612   :  { %v2403_v0 = vmul.f32 %v7577_v61, %v2401_v60 }
 0x614   :  { %v8452_v1 = vadd.f32 %v2404_v62, %v2403_v0  ;;  %v3072_v0 = vld [vmem:[#allocation6 + $0x18] sm:$0xff] }
 0x616   :  { %7580 = vtanh.f32 %v8452_v1  ;;  %v2729_v54 = vrot.slane %v8452_v1, 6  ;;  %v3165_v1 = vld [vmem:[#allocation6 + $0x38] sm:$0xff] }
 0x619   :  { %v7579_v2 = vpop.eup %7578 }
 0x623   :  { %v7581_v4 = vpop.eup %7580 }
 0x624   :  { %v2407_v7 = vmul.f32 %v7581_v4, %v7579_v2  ;;  %v3071_v2 = vld [vmem:[#allocation6 + $0x10] sm:$0xff] }
 0x625   :  { %v3164_v4 = vld [vmem:[#allocation6 + $0x30] sm:$0xff] }
 0x626   :  { %2408 = vst.msk [vmem:[#allocation2 + $0x8] sm:$0xc] %vm1106_vm4, %v2407_v7  ;;  %v2410_v3 = vrot.slane %v2407_v7, 2  ;;  %v3070_v7 = vld [vmem:[#allocation6 + $0x8] sm:$0xff] }
 0x628   :  { %6985 = vmatmul.mubr.msk.f32.vlgmr.msra.gmra.mxu0 %vm466_vm2, %v2410_v3  ;;  %6996 = vmatmul.mubr.msk.f32.vlgmr.msra.gmra.mxu1 %vm466_vm2, %v2410_v3 }
 0x629   :  { %6999 = vmatpush3.msra.mxu0 %v8458_v11  ;;  %7010 = vmatpush3.msra.mxu1 %v8461_v25 }
 0x62a   :  { %7000 = vmatprep.subr.mxu0 %v7936_v6  ;;  %7011 = vmatprep.subr.mxu1 %v7936_v6 }
 0x62b   :  { %7001 = vmatpush3.msra.mxu0 %v8466_v24  ;;  %7012 = vmatpush3.msra.mxu1 %v8469_v27 }
 0x62c   :  { %7002 = vmatprep.subr.mxu0 %v7936_v6  ;;  %7013 = vmatprep.subr.mxu1 %v7936_v6 }
 0x62d   :  { %7003 = vmatpush3.msra.mxu0 %v8474_v28  ;;  %7014 = vmatpush3.msra.mxu1 %v8477_v29 }
 0x62e   :  { %7004 = vmatprep.subr.mxu0 %v7936_v6  ;;  %7015 = vmatprep.subr.mxu1 %v7936_v6 }
 0x62f   :  { %7005 = vmatpush3.msra.mxu0 %v8482_v30  ;;  %7006 = vmatprep.mubr.msk.f32.mxu0 %vm7937_vm1, %v7936_v6 }
 0x630   :  { %7016 = vmatpush3.msra.mxu1 %v8487_v31  ;;  %7017 = vmatprep.mubr.msk.f32.mxu1 %vm7937_vm1, %v7936_v6 }
 0x631   :  { %7007 = vmatmul.mubr.msk.f32.vlgmr.msra.gmra.mxu0 %vm466_vm2, %v2410_v3  ;;  %7018 = vmatmul.mubr.msk.f32.vlgmr.msra.gmra.mxu1 %vm466_vm2, %v2410_v3  ;;  %v3163_v3 = vld [vmem:[#allocation6 + $0x28] sm:$0xff] }
 0x632   :  { %7020 = vmatprep.subr.mxu0 %v7936_v6  ;;  %7031 = vmatprep.subr.mxu1 %v7936_v6 }
 0x633   :  { %7021 = vmatpush3.msra.mxu0 %v7754_v34  ;;  %7032 = vmatpush3.msra.mxu1 %v7755_v35 }
 0x634   :  { %7022 = vmatprep.subr.mxu0 %v7936_v6  ;;  %7033 = vmatprep.subr.mxu1 %v7936_v6 }
 0x635   :  { %7023 = vmatpush3.msra.mxu0 %v7756_v36  ;;  %7034 = vmatpush3.msra.mxu1 %v7757_v38 }
 0x636   :  { %7024 = vmatprep.subr.mxu0 %v7936_v6  ;;  %7035 = vmatprep.subr.mxu1 %v7936_v6 }
 0x637   :  { %7025 = vmatpush3.msra.mxu0 %v7758_v40  ;;  %7036 = vmatpush3.msra.mxu1 %v7759_v41 }
 0x638   :  { %7026 = vmatprep.subr.mxu0 %v7936_v6  ;;  %7037 = vmatprep.subr.mxu1 %v7936_v6 }
 0x639   :  { %7027 = vmatpush3.msra.mxu0 %v7760_v42  ;;  %7038 = vmatpush3.msra.mxu1 %v7761_v43 }
 0x63a   :  { %7028 = vmatprep.mubr.msk.f32.mxu0 %vm7937_vm1, %v7936_v6  ;;  %7039 = vmatprep.mubr.msk.f32.mxu1 %vm7937_vm1, %v7936_v6 }
 0x63b   :  { %7042 = vmatprep.subr.mxu0 %v7936_v6  ;;  %7053 = vmatprep.subr.mxu1 %v7936_v6 }
 0x6e8   :  { %v2479_v44 = vpop.f32.mrf.mxu0  ;;  %v2559_v46 = vpop.f32.mrf.mxu1 }
 0x6e9   :  { %v2484_v47 = vrot.slane %v2479_v44, 4  ;;  %v2564_v48 = vrot.slane %v2559_v46, 4 }
 0x6ea   :  { %v6986_v37 = vpop.f32.mrf.mxu0  ;;  %v6997_v45 = vpop.f32.mrf.mxu1 }
 0x6eb   :  { %v2486_v49 = vadd.f32 %v2484_v47, %v8155_v26  ;;  %v2566_v5 = vadd.f32 %v2564_v48, %v8165_v33 }
 0x6ed   :  { %v6246_v8 = vmul.f32 -1.442695, %v2486_v49  ;;  %v6248_v9 = vmul.f32 -1.442695, %v2566_v5 }
 0x6ef   :  { %7582 = vpow2.f32 %v6246_v8 }
 0x6f0   :  { %7584 = vpow2.f32 %v6248_v9 }
 0x6f1   :  { %v2639_v12 = vpop.f32.mrf.mxu0  ;;  %v2714_v13 = vpop.f32.mrf.mxu1 }
 0x6f2   :  { %v2719_v14 = vrot.slane %v2714_v13, 4  ;;  %v2644_v17 = vrot.slane %v2639_v12, 4 }
 0x6f3   :  { %v7008_v10 = vpop.f32.mrf.mxu0  ;;  %v7019_v15 = vpop.f32.mrf.mxu1 }
 0x6f4   :  { %v2721_v16 = vadd.f32 %v2719_v14, %v8172_v39  ;;  %v2646_v19 = vadd.f32 %v2644_v17, %v8163_v32 }
 0x6f6   :  { %v6251_v18 = vmul.f32 -1.442695, %v2721_v16 }
 0x6f8   :  { %7586 = vpow2.f32 %v6251_v18 }
 0x6f9   :  { %7588 = vtanh.f32 %v2646_v19 }
 0x6fc   :  { %v7583_v20 = vpop.eup %7582 }
 0x6fd   :  { %v7585_v21 = vpop.eup %7584  ;;  %v2490_v22 = vadd.f32 1.0, %v7583_v20 }
 0x6fe   :  { %v2570_v23 = vadd.f32 1.0, %v7585_v21  ;;  %v3252_v21 = vld [vmem:[#allocation6 + $0x50] sm:$0xff] }
 0x6ff   :  { %7590 = vrcp.f32 %v2490_v22  ;;  %v3340_v22 = vld [vmem:[#allocation6 + $0x70] sm:$0xff] }
 0x700   :  { %7592 = vrcp.f32 %v2570_v23  ;;  %v3251_v23 = vld [vmem:[#allocation6 + $0x48] sm:$0xff] }
 0x705   :  { %v7587_v50 = vpop.eup %7586 }
 0x706   :  { %v7589_v51 = vpop.eup %7588  ;;  %v2725_v56 = vadd.f32 1.0, %v7587_v50  ;;  %v3339_v50 = vld [vmem:[#allocation6 + $0x68] sm:$0xff] }
 0x708   :  { %7594 = vrcp.f32 %v2725_v56  ;;  %v8569_v56 = vld [vmem:[#allocation8 + $0x30] sm:$0xff] }
 0x70c   :  { %v7591_v53 = vpop.eup %7590 }
 0x70d   :  { %v7593_v55 = vpop.eup %7592  ;;  %v2732_v52 = vmul.f32 %v7591_v53, %v7589_v51  ;;  %v3250_v51 = vld [vmem:[#allocation6 + $0x40] sm:$0xff] }
 0x70e   :  { %v2731_v58 = vmul.f32 %v7593_v55, %v2729_v54  ;;  %v3338_v53 = vld [vmem:[#allocation6 + $0x60] sm:$0xff]  ;;  %v8559_v54 = vld [vmem:[#allocation8 + $0x18] sm:$0xff] }
 0x70f   :  { %v8561_v55 = vld [vmem:[#allocation8 + $0x38] sm:$0xff] }
 0x710   :  { %v8513_v57 = vadd.f32 %v2732_v52, %v2731_v58  ;;  %v8567_v52 = vld [vmem:[#allocation8 + $0x10] sm:$0xff]  ;;  %v8575_v58 = vld [vmem:[#allocation8 + $0x8] sm:$0xff] }
 0x712   :  { %7596 = vtanh.f32 %v8513_v57  ;;  %v3057_v14 = vrot.slane %v8513_v57, 6  ;;  %v8577_v57 = vld [vmem:[#allocation8 + $0x28] sm:$0xff] }
 0x715   :  { %v7595_v59 = vpop.eup %7594 }
 0x71f   :  { %v7597_v60 = vpop.eup %7596 }
 0x720   :  { %v2735_v61 = vmul.f32 %v7597_v60, %v7595_v59  ;;  %v8583_v59 = vld [vmem:[#allocation8] sm:$0xff] }
 0x721   :  { %v8587_v60 = vld [vmem:[#allocation8 + $0x20] sm:$0xff] }
 0x722   :  { %2736 = vst.msk [vmem:[#allocation2 + $0x8] sm:$0x30] %vm1435_vm5, %v2735_v61  ;;  %v2738_v62 = vrot.slane %v2735_v61, 4  ;;  %v6271_v61 = vld [vmem:[%s9078_s7 + $0x2] sm:$0x3] }
 0x724   :  { %7029 = vmatmul.mubr.msk.f32.vlgmr.msra.gmra.mxu0 %vm466_vm2, %v2738_v62  ;;  %7040 = vmatmul.mubr.msk.f32.vlgmr.msra.gmra.mxu1 %vm466_vm2, %v2738_v62 }
 0x725   :  { %7043 = vmatpush3.msra.mxu0 %v8458_v11  ;;  %7054 = vmatpush3.msra.mxu1 %v8461_v25  ;;  %v3069_v11 = vld [vmem:[#allocation6] sm:$0xff] }
 0x726   :  { %7044 = vmatprep.subr.mxu0 %v7936_v6  ;;  %7055 = vmatprep.subr.mxu1 %v7936_v6  ;;  %v3162_v25 = vld [vmem:[#allocation6 + $0x20] sm:$0xff] }
 0x727   :  { %7045 = vmatpush3.msra.mxu0 %v8466_v24  ;;  %7056 = vmatpush3.msra.mxu1 %v8469_v27  ;;  %v3253_v24 = vld [vmem:[#allocation6 + $0x58] sm:$0xff] }
 0x728   :  { %7046 = vmatprep.subr.mxu0 %v7936_v6  ;;  %7057 = vmatprep.subr.mxu1 %v7936_v6  ;;  %v3341_v27 = vld [vmem:[#allocation6 + $0x78] sm:$0xff] }
 0x729   :  { %7047 = vmatpush3.msra.mxu0 %v8474_v28  ;;  %7058 = vmatpush3.msra.mxu1 %v8477_v29 }
 0x72a   :  { %7048 = vmatprep.subr.mxu0 %v7936_v6  ;;  %7059 = vmatprep.subr.mxu1 %v7936_v6 }
 0x72b   :  { %7049 = vmatpush3.msra.mxu0 %v8482_v30  ;;  %7050 = vmatprep.mubr.msk.f32.mxu0 %vm7937_vm1, %v7936_v6 }
 0x72c   :  { %7060 = vmatpush3.msra.mxu1 %v8487_v31  ;;  %7061 = vmatprep.mubr.msk.f32.mxu1 %vm7937_vm1, %v7936_v6 }
 0x72d   :  { %7051 = vmatmul.mubr.msk.f32.vlgmr.msra.gmra.mxu0 %vm466_vm2, %v2738_v62  ;;  %7062 = vmatmul.mubr.msk.f32.vlgmr.msra.gmra.mxu1 %vm466_vm2, %v2738_v62  ;;  %v8600_v62 = vld [vmem:[#allocation8 + $0x58] sm:$0xff] }
 0x72e   :  { %7072 = vmatprep.mubr.msk.f32.mxu0 %vm466_vm2, %v8539_v63  ;;  %7083 = vmatprep.mubr.msk.f32.mxu1 %vm466_vm2, %v8539_v63 }
 0x72f   :  { %7064 = vmatprep.subr.mxu0 %v3072_v0  ;;  %7075 = vmatprep.subr.mxu1 %v3165_v1 }
 0x730   :  { %7065 = vmatpush3.msra.mxu0 %v3072_v0  ;;  %7076 = vmatpush3.msra.mxu1 %v3165_v1  ;;  %v8608_v0 = vld [vmem:[#allocation8 + $0x50] sm:$0xff] }
 0x731   :  { %7066 = vmatprep.subr.mxu0 %v3071_v2  ;;  %7077 = vmatprep.subr.mxu1 %v3164_v4  ;;  %v8610_v1 = vld [vmem:[#allocation8 + $0x70] sm:$0xff] }
 0x732   :  { %7067 = vmatpush3.msra.mxu0 %v3071_v2  ;;  %7078 = vmatpush3.msra.mxu1 %v3164_v4  ;;  %v8616_v2 = vld [vmem:[#allocation8 + $0x48] sm:$0xff] }
 0x733   :  { %7068 = vmatprep.subr.mxu0 %v3070_v7  ;;  %7079 = vmatprep.subr.mxu1 %v3163_v3  ;;  %v8618_v4 = vld [vmem:[#allocation8 + $0x68] sm:$0xff] }
 0x734   :  { %7069 = vmatpush3.msra.mxu0 %v3070_v7  ;;  %7080 = vmatpush3.msra.mxu1 %v3163_v3  ;;  %v8624_v7 = vld [vmem:[#allocation8 + $0x40] sm:$0xff] }
 0x735   :  { %7070 = vmatprep.subr.mxu0 %v3069_v11  ;;  %7081 = vmatprep.subr.mxu1 %v3162_v25  ;;  %v8628_v3 = vld [vmem:[#allocation8 + $0x60] sm:$0xff] }
 0x736   :  { %7071 = vmatpush3.msra.mxu0 %v3069_v11  ;;  %7082 = vmatpush3.msra.mxu1 %v3162_v25  ;;  %v6259_v11 = vld [vmem:[#allocation9] ss:$0 sm:$0xff]  ;;  %v6262_v25 = vld [vmem:[#allocation9 + $0x1] ss:$0 sm:$0xff] }
 0x737   :  { %7086 = vmatprep.subr.mxu0 %v3253_v24  ;;  %7097 = vmatprep.subr.mxu1 %v3341_v27 }
 0x7e4   :  { %v2807_v28 = vpop.f32.mrf.mxu0  ;;  %v2887_v29 = vpop.f32.mrf.mxu1 }
 0x7e5   :  { %v2812_v30 = vrot.slane %v2807_v28, 2  ;;  %v2892_v31 = vrot.slane %v2887_v29, 2 }
 0x7e6   :  { %v7030_v34 = vpop.f32.mrf.mxu0  ;;  %v7041_v35 = vpop.f32.mrf.mxu1 }
 0x7e7   :  { %v2814_v36 = vadd.f32 %v2812_v30, %v8155_v26  ;;  %v2894_v38 = vadd.f32 %v2892_v31, %v8165_v33  ;;  %v6265_v34 = vld [vmem:[#allocation9 + $0x2] ss:$0 sm:$0xff]  ;;  %v6268_v35 = vld [vmem:[#allocation9 + $0x3] ss:$0 sm:$0xff] }
 0x7e9   :  { %v6253_v40 = vmul.f32 -1.442695, %v2814_v36  ;;  %v6255_v41 = vmul.f32 -1.442695, %v2894_v38 }
 0x7eb   :  { %7598 = vpow2.f32 %v6253_v40 }
 0x7ec   :  { %7600 = vpow2.f32 %v6255_v41 }
 0x7ed   :  { %v2967_v42 = vpop.f32.mrf.mxu0  ;;  %v3042_v43 = vpop.f32.mrf.mxu1 }
 0x7ee   :  { %v3047_v44 = vrot.slane %v3042_v43, 2  ;;  %v2972_v37 = vrot.slane %v2967_v42, 2 }
 0x7ef   :  { %v7052_v46 = vpop.f32.mrf.mxu0  ;;  %v7063_v47 = vpop.f32.mrf.mxu1 }
 0x7f0   :  { %v3049_v48 = vadd.f32 %v3047_v44, %v8172_v39  ;;  %v2974_v49 = vadd.f32 %v2972_v37, %v8163_v32 }
 0x7f2   :  { %v6258_v45 = vmul.f32 -1.442695, %v3049_v48 }
 0x7f4   :  { %7602 = vpow2.f32 %v6258_v45 }
 0x7f5   :  { %7604 = vtanh.f32 %v2974_v49 }
 0x7f8   :  { %v7599_v5 = vpop.eup %7598 }
 0x7f9   :  { %v7601_v8 = vpop.eup %7600  ;;  %v2818_v26 = vadd.f32 1.0, %v7599_v5 }
 0x7fa   :  { %v2898_v33 = vadd.f32 1.0, %v7601_v8 }
 0x7fb   :  { %7606 = vrcp.f32 %v2818_v26 }
 0x7fc   :  { %7608 = vrcp.f32 %v2898_v33 }
 0x801   :  { %v7603_v9 = vpop.eup %7602 }
 0x802   :  { %v7605_v12 = vpop.eup %7604  ;;  %v3053_v39 = vadd.f32 1.0, %v7603_v9 }
 0x804   :  { %7610 = vrcp.f32 %v3053_v39 }
 0x808   :  { %v7607_v13 = vpop.eup %7606 }
 0x809   :  { %v7609_v10 = vpop.eup %7608  ;;  %v3060_v15 = vmul.f32 %v7607_v13, %v7605_v12 }
 0x80a   :  { %v3059_v16 = vmul.f32 %v7609_v10, %v3057_v14 }
 0x80c   :  { %v3061_v17 = vadd.f32 %v3060_v15, %v3059_v16 }
 0x80e   :  { %7612 = vtanh.f32 %v3061_v17  ;;  %3066 = vst.msk [vmem:[#allocation14 - $0x6] sm:$0xc0] %vm1764_vm6, %v3061_v17 }
 0x811   :  { %v7611_v32 = vpop.eup %7610 }
 0x81b   :  { %v7613_v18 = vpop.eup %7612 }
 0x81c   :  { %v3063_v19 = vmul.f32 %v7613_v18, %v7611_v32 }
 0x81e   :  { %3064 = vst.msk [vmem:[#allocation2 + $0x8] sm:$0xc0] %vm1764_vm6, %v3063_v19  ;;  %3065 = vst.msk [vmem:[#allocation12 - $0x6] sm:$0xc0] %vm1764_vm6, %v3063_v19 }
 0x825   :  { %v3068_v20 = vld [vmem:[#allocation2 + $0x8] sm:$0xff] }
 0x826   :  { %7073 = vmatmul.mubr.msk.f32.vlgmr.msra.gmra.mxu0 %vm466_vm2, %v3068_v20  ;;  %7084 = vmatmul.mubr.msk.f32.vlgmr.msra.gmra.mxu1 %vm466_vm2, %v3068_v20 }
 0x827   :  { %7087 = vmatpush3.msra.mxu0 %v3253_v24  ;;  %7098 = vmatpush3.msra.mxu1 %v3341_v27 }
 0x828   :  { %7088 = vmatprep.subr.mxu0 %v3252_v21  ;;  %7094 = vmatprep.mubr.msk.f32.mxu0 %vm466_vm2, %v8539_v63 }
 0x829   :  { %7099 = vmatprep.subr.mxu1 %v3340_v22  ;;  %7105 = vmatprep.mubr.msk.f32.mxu1 %vm466_vm2, %v8539_v63  ;;  %v8602_v63 = vld [vmem:[#allocation8 + $0x78] sm:$0xff] }
 0x82a   :  { %7089 = vmatpush3.msra.mxu0 %v3252_v21  ;;  %7100 = vmatpush3.msra.mxu1 %v3340_v22  ;;  %v6272_v22 = vld [vmem:[%s9079_s8 + $0x2] sm:$0x3] }
 0x82b   :  { %7090 = vmatprep.subr.mxu0 %v3251_v23  ;;  %7101 = vmatprep.subr.mxu1 %v3339_v50 }
 0x82c   :  { %7091 = vmatpush3.msra.mxu0 %v3251_v23  ;;  %7102 = vmatpush3.msra.mxu1 %v3339_v50 }
 0x82d   :  { %7092 = vmatprep.subr.mxu0 %v3250_v51  ;;  %7103 = vmatprep.subr.mxu1 %v3338_v53 }
 0x82e   :  { %7093 = vmatpush3.msra.mxu0 %v3250_v51  ;;  %7104 = vmatpush3.msra.mxu1 %v3338_v53 }
 0x82f   :  { %7095 = vmatmul.mubr.msk.f32.vlgmr.msra.gmra.mxu0 %vm466_vm2, %v3068_v20  ;;  %7106 = vmatmul.mubr.msk.f32.vlgmr.msra.gmra.mxu1 %vm466_vm2, %v3068_v20 }
 0x830   :  { %7108 = vmatprep.subr.mxu0 %v7936_v6  ;;  %7119 = vmatprep.subr.mxu1 %v7936_v6 }
 0x831   :  { %7109 = vmatpush3.msra.mxu0 %v8559_v54  ;;  %7120 = vmatpush3.msra.mxu1 %v8561_v55 }
 0x832   :  { %7110 = vmatprep.subr.mxu0 %v7936_v6  ;;  %7121 = vmatprep.subr.mxu1 %v7936_v6 }
 0x833   :  { %7111 = vmatpush3.msra.mxu0 %v8567_v52  ;;  %7122 = vmatpush3.msra.mxu1 %v8569_v56 }
 0x834   :  { %7112 = vmatprep.subr.mxu0 %v7936_v6  ;;  %7123 = vmatprep.subr.mxu1 %v7936_v6 }
 0x835   :  { %7113 = vmatpush3.msra.mxu0 %v8575_v58  ;;  %7124 = vmatpush3.msra.mxu1 %v8577_v57 }
 0x836   :  { %7114 = vmatprep.subr.mxu0 %v7936_v6  ;;  %7125 = vmatprep.subr.mxu1 %v7936_v6 }
 0x837   :  { %7115 = vmatpush3.msra.mxu0 %v8583_v59  ;;  %7116 = vmatprep.mubr.msk.f32.mxu0 %vm7937_vm1, %v7936_v6 }
 0x838   :  { %7126 = vmatpush3.msra.mxu1 %v8587_v60  ;;  %7127 = vmatprep.mubr.msk.f32.mxu1 %vm7937_vm1, %v7936_v6 }
 0x839   :  { %7117 = vmatmul.mubr.msk.f32.vlgmr.msra.gmra.mxu0 %vm466_vm2, %v6271_v61  ;;  %7128 = vmatmul.mubr.msk.f32.vlgmr.msra.gmra.mxu1 %vm466_vm2, %v6271_v61 }
 0x83a   :  { %7130 = vmatprep.subr.mxu0 %v7936_v6  ;;  %7141 = vmatprep.subr.mxu1 %v7936_v6 }
 0x83b   :  { %7131 = vmatpush3.msra.mxu0 %v8600_v62  ;;  %7142 = vmatpush3.msra.mxu1 %v8602_v63 }
 0x83c   :  { %7132 = vmatprep.subr.mxu0 %v7936_v6  ;;  %7143 = vmatprep.subr.mxu1 %v7936_v6 }
 0x83d   :  { %7133 = vmatpush3.msra.mxu0 %v8608_v0  ;;  %7144 = vmatpush3.msra.mxu1 %v8610_v1 }
 0x83e   :  { %7134 = vmatprep.subr.mxu0 %v7936_v6  ;;  %7145 = vmatprep.subr.mxu1 %v7936_v6 }
 0x83f   :  { %7135 = vmatpush3.msra.mxu0 %v8616_v2  ;;  %7146 = vmatpush3.msra.mxu1 %v8618_v4 }
 0x840   :  { %7136 = vmatprep.subr.mxu0 %v7936_v6  ;;  %7147 = vmatprep.subr.mxu1 %v7936_v6 }
 0x841   :  { %7137 = vmatpush3.msra.mxu0 %v8624_v7  ;;  %7138 = vmatprep.mubr.msk.f32.mxu0 %vm7937_vm1, %v7936_v6 }
 0x842   :  { %7148 = vmatpush3.msra.mxu1 %v8628_v3  ;;  %7149 = vmatprep.mubr.msk.f32.mxu1 %vm7937_vm1, %v7936_v6 }
 0x843   :  { %7139 = vmatmul.mubr.msk.f32.vlgmr.msra.gmra.mxu0 %vm466_vm2, %v6271_v61  ;;  %7150 = vmatmul.mubr.msk.f32.vlgmr.msra.gmra.mxu1 %vm466_vm2, %v6271_v61 }
 0x844   :  { %7152 = vmatprep.subr.mxu0 %v7936_v6  ;;  %7163 = vmatprep.subr.mxu1 %v7936_v6 }
 0x845   :  { %7153 = vmatpush3.msra.mxu0 %v8559_v54  ;;  %7164 = vmatpush3.msra.mxu1 %v8561_v55 }
 0x846   :  { %7154 = vmatprep.subr.mxu0 %v7936_v6  ;;  %7165 = vmatprep.subr.mxu1 %v7936_v6 }
 0x847   :  { %7155 = vmatpush3.msra.mxu0 %v8567_v52  ;;  %7166 = vmatpush3.msra.mxu1 %v8569_v56 }
 0x848   :  { %7156 = vmatprep.subr.mxu0 %v7936_v6  ;;  %7167 = vmatprep.subr.mxu1 %v7936_v6 }
 0x849   :  { %7157 = vmatpush3.msra.mxu0 %v8575_v58  ;;  %7168 = vmatpush3.msra.mxu1 %v8577_v57 }
 0x84a   :  { %7158 = vmatprep.subr.mxu0 %v7936_v6  ;;  %7169 = vmatprep.subr.mxu1 %v7936_v6 }
 0x84b   :  { %7159 = vmatpush3.msra.mxu0 %v8583_v59  ;;  %7170 = vmatpush3.msra.mxu1 %v8587_v60 }
 0x84c   :  { %7160 = vmatprep.mubr.msk.f32.mxu0 %vm7937_vm1, %v7936_v6  ;;  %7171 = vmatprep.mubr.msk.f32.mxu1 %vm7937_vm1, %v7936_v6 }
 0x84d   :  { %7174 = vmatprep.subr.mxu0 %v7936_v6  ;;  %7185 = vmatprep.subr.mxu1 %v7936_v6 }
 0x8e6   :  { %v7074_v24 = vpop.f32.mrf.mxu0  ;;  %v7085_v27 = vpop.f32.mrf.mxu1 }
 0x8e7   :  { %v8662_v28 = vadd.f32 %v7074_v24, %v6259_v11  ;;  %v8664_v29 = vadd.f32 %v7085_v27, %v6262_v25 }
 0x8e8   :  { %v3152_v30 = vpop.f32.mrf.mxu0  ;;  %v3240_v31 = vpop.f32.mrf.mxu1 }
 0x8e9   :  { %v8670_v44 = vadd.f32 %v6259_v11, %v3152_v30  ;;  %v8672_v46 = vadd.f32 %v6262_v25, %v3240_v31 }
 0x8ef   :  { %v7096_v36 = vpop.f32.mrf.mxu0  ;;  %v7107_v38 = vpop.f32.mrf.mxu1 }
 0x8f0   :  { %v8666_v40 = vadd.f32 %v7096_v36, %v6265_v34  ;;  %v8668_v41 = vadd.f32 %v7107_v38, %v6268_v35 }
 0x8f1   :  { %v3328_v42 = vpop.f32.mrf.mxu0  ;;  %v3416_v43 = vpop.f32.mrf.mxu1 }
 0x8f2   :  { %v8676_v33 = vadd.f32 %v6268_v35, %v3416_v43  ;;  %v8679_v15 = vadd.f32 %v6265_v34, %v3328_v42 }
 0x8f9   :  { %v3517_v47 = vpop.f32.mrf.mxu0  ;;  %v3594_v48 = vpop.f32.mrf.mxu1 }
 0x8fa   :  { %v3521_v37 = vadd.f32 %v3517_v47, %v8670_v44  ;;  %v3598_v45 = vadd.f32 %v3594_v48, %v8672_v46 }
 0x8fb   :  { %v7118_v49 = vpop.f32.mrf.mxu0  ;;  %v7129_v5 = vpop.f32.mrf.mxu1 }
 0x8fc   :  { %v6274_v8 = vmul.f32 -1.442695, %v3521_v37  ;;  %v6276_v26 = vmul.f32 -1.442695, %v3598_v45 }
 0x8fe   :  { %7614 = vpow2.f32 %v6274_v8 }
 0x8ff   :  { %7616 = vpow2.f32 %v6276_v26 }
 0x903   :  { %v3671_v9 = vpop.f32.mrf.mxu0  ;;  %v3743_v12 = vpop.f32.mrf.mxu1 }
 0x904   :  { %v3747_v13 = vadd.f32 %v3743_v12, %v8676_v33  ;;  %v3675_v16 = vadd.f32 %v3671_v9, %v8679_v15 }
 0x905   :  { %v7140_v14 = vpop.f32.mrf.mxu0  ;;  %v7151_v10 = vpop.f32.mrf.mxu1 }
 0x906   :  { %v6279_v39 = vmul.f32 -1.442695, %v3747_v13 }
 0x908   :  { %7618 = vpow2.f32 %v6279_v39 }
 0x909   :  { %7620 = vtanh.f32 %v3675_v16 }
 0x90b   :  { %v7615_v17 = vpop.eup %7614 }
 0x90c   :  { %v7617_v32 = vpop.eup %7616  ;;  %v3525_v18 = vadd.f32 1.0, %v7615_v17 }
 0x90d   :  { %v3602_v19 = vadd.f32 1.0, %v7617_v32 }
 0x90e   :  { %7622 = vrcp.f32 %v3525_v18 }
 0x90f   :  { %7624 = vrcp.f32 %v3602_v19 }
 0x915   :  { %v7619_v20 = vpop.eup %7618 }
 0x916   :  { %v7621_v21 = vpop.eup %7620  ;;  %v3751_v53 = vadd.f32 1.0, %v7619_v20 }
 0x918   :  { %7626 = vrcp.f32 %v3751_v53 }
 0x91b   :  { %v7623_v23 = vpop.eup %7622 }
 0x91c   :  { %v7625_v50 = vpop.eup %7624  ;;  %v3755_v51 = vmul.f32 %v7623_v23, %v7621_v21 }
 0x91d   :  { %v3754_v61 = vmul.f32 %v7625_v50, %v6272_v22 }
 0x91f   :  { %v8685_v11 = vadd.f32 %v3755_v51, %v3754_v61 }
 0x921   :  { %7628 = vtanh.f32 %v8685_v11  ;;  %v4078_v19 = vrot.slane %v8685_v11, 6 }
 0x925   :  { %v7627_v25 = vpop.eup %7626 }
 0x92e   :  { %v7629_v24 = vpop.eup %7628 }
 0x92f   :  { %v3758_v27 = vmul.f32 %v7629_v24, %v7627_v25 }
 0x931   :  { %7161 = vmatmul.mubr.msk.f32.vlgmr.msra.gmra.mxu0 %vm466_vm2, %v3758_v27  ;;  %7172 = vmatmul.mubr.msk.f32.vlgmr.msra.gmra.mxu1 %vm466_vm2, %v3758_v27 }
 0x932   :  { %7175 = vmatpush3.msra.mxu0 %v8600_v62  ;;  %7186 = vmatpush3.msra.mxu1 %v8602_v63 }
 0x933   :  { %7176 = vmatprep.subr.mxu0 %v7936_v6  ;;  %7187 = vmatprep.subr.mxu1 %v7936_v6 }
 0x934   :  { %7177 = vmatpush3.msra.mxu0 %v8608_v0  ;;  %7188 = vmatpush3.msra.mxu1 %v8610_v1 }
 0x935   :  { %7178 = vmatprep.subr.mxu0 %v7936_v6  ;;  %7189 = vmatprep.subr.mxu1 %v7936_v6 }
 0x936   :  { %7179 = vmatpush3.msra.mxu0 %v8616_v2  ;;  %7190 = vmatpush3.msra.mxu1 %v8618_v4 }
 0x937   :  { %7180 = vmatprep.subr.mxu0 %v7936_v6  ;;  %7191 = vmatprep.subr.mxu1 %v7936_v6 }
 0x938   :  { %7181 = vmatpush3.msra.mxu0 %v8624_v7  ;;  %7182 = vmatprep.mubr.msk.f32.mxu0 %vm7937_vm1, %v7936_v6 }
 0x939   :  { %7192 = vmatpush3.msra.mxu1 %v8628_v3  ;;  %7193 = vmatprep.mubr.msk.f32.mxu1 %vm7937_vm1, %v7936_v6 }
 0x93a   :  { %7183 = vmatmul.mubr.msk.f32.vlgmr.msra.gmra.mxu0 %vm466_vm2, %v3758_v27  ;;  %7194 = vmatmul.mubr.msk.f32.vlgmr.msra.gmra.mxu1 %vm466_vm2, %v3758_v27 }
 0x93b   :  { %7196 = vmatprep.subr.mxu0 %v7936_v6  ;;  %7207 = vmatprep.subr.mxu1 %v7936_v6 }
 0x93c   :  { %7197 = vmatpush3.msra.mxu0 %v8559_v54  ;;  %7208 = vmatpush3.msra.mxu1 %v8561_v55 }
 0x93d   :  { %7198 = vmatprep.subr.mxu0 %v7936_v6  ;;  %7209 = vmatprep.subr.mxu1 %v7936_v6 }
 0x93e   :  { %7199 = vmatpush3.msra.mxu0 %v8567_v52  ;;  %7210 = vmatpush3.msra.mxu1 %v8569_v56 }
 0x93f   :  { %7200 = vmatprep.subr.mxu0 %v7936_v6  ;;  %7211 = vmatprep.subr.mxu1 %v7936_v6 }
 0x940   :  { %7201 = vmatpush3.msra.mxu0 %v8575_v58  ;;  %7212 = vmatpush3.msra.mxu1 %v8577_v57 }
 0x941   :  { %7202 = vmatprep.subr.mxu0 %v7936_v6  ;;  %7213 = vmatprep.subr.mxu1 %v7936_v6 }
 0x942   :  { %7203 = vmatpush3.msra.mxu0 %v8583_v59  ;;  %7214 = vmatpush3.msra.mxu1 %v8587_v60 }
 0x943   :  { %7204 = vmatprep.mubr.msk.f32.mxu0 %vm7937_vm1, %v7936_v6  ;;  %7215 = vmatprep.mubr.msk.f32.mxu1 %vm7937_vm1, %v7936_v6 }
 0x944   :  { %7218 = vmatprep.subr.mxu0 %v7936_v6  ;;  %7229 = vmatprep.subr.mxu1 %v7936_v6 }
 0x9f1   :  { %v3828_v30 = vpop.f32.mrf.mxu0  ;;  %v3908_v31 = vpop.f32.mrf.mxu1 }
 0x9f2   :  { %v3833_v34 = vrot.slane %v3828_v30, 6  ;;  %v3913_v35 = vrot.slane %v3908_v31, 6 }
 0x9f3   :  { %v7162_v36 = vpop.f32.mrf.mxu0  ;;  %v7173_v38 = vpop.f32.mrf.mxu1 }
 0x9f4   :  { %v3835_v42 = vadd.f32 %v3833_v34, %v8670_v44  ;;  %v3915_v43 = vadd.f32 %v3913_v35, %v8672_v46 }
 0x9f6   :  { %v6281_v47 = vmul.f32 -1.442695, %v3835_v42  ;;  %v6283_v48 = vmul.f32 -1.442695, %v3915_v43 }
 0x9f8   :  { %7630 = vpow2.f32 %v6281_v47 }
 0x9f9   :  { %7632 = vpow2.f32 %v6283_v48 }
 0x9fa   :  { %v3988_v37 = vpop.f32.mrf.mxu0  ;;  %v4063_v45 = vpop.f32.mrf.mxu1 }
 0x9fb   :  { %v4068_v49 = vrot.slane %v4063_v45, 6  ;;  %v3993_v9 = vrot.slane %v3988_v37, 6 }
 0x9fc   :  { %v7184_v5 = vpop.f32.mrf.mxu0  ;;  %v7195_v8 = vpop.f32.mrf.mxu1 }
 0x9fd   :  { %v4070_v26 = vadd.f32 %v4068_v49, %v8676_v33  ;;  %v3995_v13 = vadd.f32 %v3993_v9, %v8679_v15 }
 0x9ff   :  { %v6286_v12 = vmul.f32 -1.442695, %v4070_v26 }
 0xa01   :  { %7634 = vpow2.f32 %v6286_v12 }
 0xa02   :  { %7636 = vtanh.f32 %v3995_v13 }
 0xa05   :  { %v7631_v14 = vpop.eup %7630 }
 0xa06   :  { %v7633_v10 = vpop.eup %7632  ;;  %v3839_v39 = vadd.f32 1.0, %v7631_v14 }
 0xa07   :  { %v3919_v16 = vadd.f32 1.0, %v7633_v10 }
 0xa08   :  { %7638 = vrcp.f32 %v3839_v39 }
 0xa09   :  { %7640 = vrcp.f32 %v3919_v16 }
 0xa0e   :  { %v7635_v17 = vpop.eup %7634 }
 0xa0f   :  { %v7637_v32 = vpop.eup %7636  ;;  %v4074_v22 = vadd.f32 1.0, %v7635_v17 }
 0xa11   :  { %7642 = vrcp.f32 %v4074_v22 }
 0xa15   :  { %v7639_v18 = vpop.eup %7638 }
 0xa16   :  { %v7641_v20 = vpop.eup %7640  ;;  %v4081_v21 = vmul.f32 %v7639_v18, %v7637_v32 }
 0xa17   :  { %v4080_v23 = vmul.f32 %v7641_v20, %v4078_v19 }
 0xa19   :  { %v8737_v50 = vadd.f32 %v4081_v21, %v4080_v23 }
 0xa1b   :  { %7644 = vtanh.f32 %v8737_v50  ;;  %v4405_v17 = vrot.slane %v8737_v50, 6 }
 0xa1e   :  { %v7643_v51 = vpop.eup %7642 }
 0xa28   :  { %v7645_v53 = vpop.eup %7644 }
 0xa29   :  { %v4084_v61 = vmul.f32 %v7645_v53, %v7643_v51 }
 0xa2b   :  { %v4086_v25 = vrot.slane %v4084_v61, 2 }
 0xa2d   :  { %7205 = vmatmul.mubr.msk.f32.vlgmr.msra.gmra.mxu0 %vm466_vm2, %v4086_v25  ;;  %7216 = vmatmul.mubr.msk.f32.vlgmr.msra.gmra.mxu1 %vm466_vm2, %v4086_v25 }
 0xa2e   :  { %7219 = vmatpush3.msra.mxu0 %v8600_v62  ;;  %7230 = vmatpush3.msra.mxu1 %v8602_v63 }
 0xa2f   :  { %7220 = vmatprep.subr.mxu0 %v7936_v6  ;;  %7231 = vmatprep.subr.mxu1 %v7936_v6 }
 0xa30   :  { %7221 = vmatpush3.msra.mxu0 %v8608_v0  ;;  %7232 = vmatpush3.msra.mxu1 %v8610_v1 }
 0xa31   :  { %7222 = vmatprep.subr.mxu0 %v7936_v6  ;;  %7233 = vmatprep.subr.mxu1 %v7936_v6 }
 0xa32   :  { %7223 = vmatpush3.msra.mxu0 %v8616_v2  ;;  %7234 = vmatpush3.msra.mxu1 %v8618_v4 }
 0xa33   :  { %7224 = vmatprep.subr.mxu0 %v7936_v6  ;;  %7235 = vmatprep.subr.mxu1 %v7936_v6 }
 0xa34   :  { %7225 = vmatpush3.msra.mxu0 %v8624_v7  ;;  %7226 = vmatprep.mubr.msk.f32.mxu0 %vm7937_vm1, %v7936_v6 }
 0xa35   :  { %7236 = vmatpush3.msra.mxu1 %v8628_v3  ;;  %7237 = vmatprep.mubr.msk.f32.mxu1 %vm7937_vm1, %v7936_v6 }
 0xa36   :  { %7227 = vmatmul.mubr.msk.f32.vlgmr.msra.gmra.mxu0 %vm466_vm2, %v4086_v25  ;;  %7238 = vmatmul.mubr.msk.f32.vlgmr.msra.gmra.mxu1 %vm466_vm2, %v4086_v25 }
 0xa37   :  { %7240 = vmatprep.subr.mxu0 %v7936_v6  ;;  %7251 = vmatprep.subr.mxu1 %v7936_v6 }
 0xa38   :  { %7241 = vmatpush3.msra.mxu0 %v8559_v54  ;;  %7252 = vmatpush3.msra.mxu1 %v8561_v55 }
 0xa39   :  { %7242 = vmatprep.subr.mxu0 %v7936_v6  ;;  %7253 = vmatprep.subr.mxu1 %v7936_v6 }
 0xa3a   :  { %7243 = vmatpush3.msra.mxu0 %v8567_v52  ;;  %7254 = vmatpush3.msra.mxu1 %v8569_v56 }
 0xa3b   :  { %7244 = vmatprep.subr.mxu0 %v7936_v6  ;;  %7255 = vmatprep.subr.mxu1 %v7936_v6 }
 0xa3c   :  { %7245 = vmatpush3.msra.mxu0 %v8575_v58  ;;  %7256 = vmatpush3.msra.mxu1 %v8577_v57 }
 0xa3d   :  { %7246 = vmatprep.subr.mxu0 %v7936_v6  ;;  %7257 = vmatprep.subr.mxu1 %v7936_v6 }
 0xa3e   :  { %7247 = vmatpush3.msra.mxu0 %v8583_v59  ;;  %7258 = vmatpush3.msra.mxu1 %v8587_v60 }
 0xa3f   :  { %7248 = vmatprep.mubr.msk.f32.mxu0 %vm7937_vm1, %v7936_v6  ;;  %7259 = vmatprep.mubr.msk.f32.mxu1 %vm7937_vm1, %v7936_v6 }
 0xa40   :  { %7262 = vmatprep.subr.mxu0 %v7936_v6  ;;  %7273 = vmatprep.subr.mxu1 %v7936_v6 }
 0xaed   :  { %v4155_v11 = vpop.f32.mrf.mxu0  ;;  %v4235_v24 = vpop.f32.mrf.mxu1 }
 0xaee   :  { %v4160_v27 = vrot.slane %v4155_v11, 4  ;;  %v4240_v30 = vrot.slane %v4235_v24, 4 }
 0xaef   :  { %v7206_v31 = vpop.f32.mrf.mxu0  ;;  %v7217_v34 = vpop.f32.mrf.mxu1 }
 0xaf0   :  { %v4162_v35 = vadd.f32 %v4160_v27, %v8670_v44  ;;  %v4242_v36 = vadd.f32 %v4240_v30, %v8672_v46 }
 0xaf2   :  { %v6288_v38 = vmul.f32 -1.442695, %v4162_v35  ;;  %v6290_v42 = vmul.f32 -1.442695, %v4242_v36 }
 0xaf4   :  { %7646 = vpow2.f32 %v6288_v38 }
 0xaf5   :  { %7648 = vpow2.f32 %v6290_v42 }
 0xaf6   :  { %v4315_v43 = vpop.f32.mrf.mxu0  ;;  %v4390_v47 = vpop.f32.mrf.mxu1 }
 0xaf7   :  { %v4395_v48 = vrot.slane %v4390_v47, 4  ;;  %v4320_v5 = vrot.slane %v4315_v43, 4 }
 0xaf8   :  { %v7228_v37 = vpop.f32.mrf.mxu0  ;;  %v7239_v45 = vpop.f32.mrf.mxu1 }
 0xaf9   :  { %v4397_v49 = vadd.f32 %v4395_v48, %v8676_v33  ;;  %v4322_v26 = vadd.f32 %v4320_v5, %v8679_v15 }
 0xafb   :  { %v6293_v8 = vmul.f32 -1.442695, %v4397_v49 }
 0xafd   :  { %7650 = vpow2.f32 %v6293_v8 }
 0xafe   :  { %7652 = vtanh.f32 %v4322_v26 }
 0xb01   :  { %v7647_v9 = vpop.eup %7646 }
 0xb02   :  { %v7649_v12 = vpop.eup %7648  ;;  %v4166_v13 = vadd.f32 1.0, %v7647_v9 }
 0xb03   :  { %v4246_v14 = vadd.f32 1.0, %v7649_v12 }
 0xb04   :  { %7654 = vrcp.f32 %v4166_v13 }
 0xb05   :  { %7656 = vrcp.f32 %v4246_v14 }
 0xb0a   :  { %v7651_v10 = vpop.eup %7650 }
 0xb0b   :  { %v7653_v39 = vpop.eup %7652  ;;  %v4401_v19 = vadd.f32 1.0, %v7651_v10 }
 0xb0d   :  { %7658 = vrcp.f32 %v4401_v19 }
 0xb11   :  { %v7655_v16 = vpop.eup %7654 }
 0xb12   :  { %v7657_v32 = vpop.eup %7656  ;;  %v4408_v18 = vmul.f32 %v7655_v16, %v7653_v39 }
 0xb13   :  { %v4407_v20 = vmul.f32 %v7657_v32, %v4405_v17 }
 0xb15   :  { %v8789_v21 = vadd.f32 %v4408_v18, %v4407_v20 }
 0xb17   :  { %7660 = vtanh.f32 %v8789_v21  ;;  %v4732_v13 = vrot.slane %v8789_v21, 6 }
 0xb1a   :  { %v7659_v22 = vpop.eup %7658 }
 0xb24   :  { %v7661_v23 = vpop.eup %7660 }
 0xb25   :  { %v4411_v51 = vmul.f32 %v7661_v23, %v7659_v22 }
 0xb27   :  { %v4413_v53 = vrot.slane %v4411_v51, 4 }
 0xb29   :  { %7249 = vmatmul.mubr.msk.f32.vlgmr.msra.gmra.mxu0 %vm466_vm2, %v4413_v53  ;;  %7260 = vmatmul.mubr.msk.f32.vlgmr.msra.gmra.mxu1 %vm466_vm2, %v4413_v53 }
 0xb2a   :  { %7263 = vmatpush3.msra.mxu0 %v8600_v62  ;;  %7274 = vmatpush3.msra.mxu1 %v8602_v63 }
 0xb2b   :  { %7264 = vmatprep.subr.mxu0 %v7936_v6  ;;  %7275 = vmatprep.subr.mxu1 %v7936_v6 }
 0xb2c   :  { %7265 = vmatpush3.msra.mxu0 %v8608_v0  ;;  %7276 = vmatpush3.msra.mxu1 %v8610_v1 }
 0xb2d   :  { %7266 = vmatprep.subr.mxu0 %v7936_v6  ;;  %7277 = vmatprep.subr.mxu1 %v7936_v6 }
 0xb2e   :  { %7267 = vmatpush3.msra.mxu0 %v8616_v2  ;;  %7278 = vmatpush3.msra.mxu1 %v8618_v4 }
 0xb2f   :  { %7268 = vmatprep.subr.mxu0 %v7936_v6  ;;  %7279 = vmatprep.subr.mxu1 %v7936_v6 }
 0xb30   :  { %7269 = vmatpush3.msra.mxu0 %v8624_v7  ;;  %7270 = vmatprep.mubr.msk.f32.mxu0 %vm7937_vm1, %v7936_v6 }
 0xb31   :  { %7280 = vmatpush3.msra.mxu1 %v8628_v3  ;;  %7281 = vmatprep.mubr.msk.f32.mxu1 %vm7937_vm1, %v7936_v6 }
 0xb32   :  { %7271 = vmatmul.mubr.msk.f32.vlgmr.msra.gmra.mxu0 %vm466_vm2, %v4413_v53  ;;  %7282 = vmatmul.mubr.msk.f32.vlgmr.msra.gmra.mxu1 %vm466_vm2, %v4413_v53 }
 0xb33   :  { %7284 = vmatprep.subr.mxu0 %v7936_v6  ;;  %7295 = vmatprep.subr.mxu1 %v7936_v6 }
 0xb34   :  { %7285 = vmatpush3.msra.mxu0 %v8559_v54  ;;  %7296 = vmatpush3.msra.mxu1 %v8561_v55 }
 0xb35   :  { %7286 = vmatprep.subr.mxu0 %v7936_v6  ;;  %7297 = vmatprep.subr.mxu1 %v7936_v6 }
 0xb36   :  { %7287 = vmatpush3.msra.mxu0 %v8567_v52  ;;  %7298 = vmatpush3.msra.mxu1 %v8569_v56 }
 0xb37   :  { %7288 = vmatprep.subr.mxu0 %v7936_v6  ;;  %7299 = vmatprep.subr.mxu1 %v7936_v6 }
 0xb38   :  { %7289 = vmatpush3.msra.mxu0 %v8575_v58  ;;  %7300 = vmatpush3.msra.mxu1 %v8577_v57 }
 0xb39   :  { %7290 = vmatprep.subr.mxu0 %v7936_v6  ;;  %7301 = vmatprep.subr.mxu1 %v7936_v6 }
 0xb3a   :  { %7291 = vmatpush3.msra.mxu0 %v8583_v59  ;;  %7302 = vmatpush3.msra.mxu1 %v8587_v60 }
 0xb3b   :  { %7292 = vmatprep.mubr.msk.f32.mxu0 %vm7937_vm1, %v7936_v6  ;;  %7303 = vmatprep.mubr.msk.f32.mxu1 %vm7937_vm1, %v7936_v6 }
 0xb3c   :  { %7306 = vmatprep.subr.mxu0 %v7936_v6  ;;  %7317 = vmatprep.subr.mxu1 %v7936_v6 }
 0xbe9   :  { %v4482_v50 = vpop.f32.mrf.mxu0  ;;  %v4562_v61 = vpop.f32.mrf.mxu1 }
 0xbea   :  { %v4487_v25 = vrot.slane %v4482_v50, 2  ;;  %v4567_v11 = vrot.slane %v4562_v61, 2 }
 0xbeb   :  { %v7250_v24 = vpop.f32.mrf.mxu0  ;;  %v7261_v27 = vpop.f32.mrf.mxu1 }
 0xbec   :  { %v4489_v30 = vadd.f32 %v4487_v25, %v8670_v44  ;;  %v4569_v31 = vadd.f32 %v4567_v11, %v8672_v46 }
 0xbee   :  { %v6295_v34 = vmul.f32 -1.442695, %v4489_v30  ;;  %v6297_v35 = vmul.f32 -1.442695, %v4569_v31 }
 0xbf0   :  { %7662 = vpow2.f32 %v6295_v34 }
 0xbf1   :  { %7664 = vpow2.f32 %v6297_v35 }
 0xbf2   :  { %v4642_v36 = vpop.f32.mrf.mxu0  ;;  %v4717_v38 = vpop.f32.mrf.mxu1 }
 0xbf3   :  { %v4722_v42 = vrot.slane %v4717_v38, 2  ;;  %v4647_v37 = vrot.slane %v4642_v36, 2 }
 0xbf4   :  { %v7272_v43 = vpop.f32.mrf.mxu0  ;;  %v7283_v47 = vpop.f32.mrf.mxu1 }
 0xbf5   :  { %v4724_v48 = vadd.f32 %v4722_v42, %v8676_v33  ;;  %v4649_v49 = vadd.f32 %v4647_v37, %v8679_v15 }
 0xbf7   :  { %v6300_v45 = vmul.f32 -1.442695, %v4724_v48 }
 0xbf9   :  { %7666 = vpow2.f32 %v6300_v45 }
 0xbfa   :  { %7668 = vtanh.f32 %v4649_v49 }
 0xbfd   :  { %v7663_v5 = vpop.eup %7662 }
 0xbfe   :  { %v7665_v8 = vpop.eup %7664  ;;  %v4493_v44 = vadd.f32 1.0, %v7663_v5 }
 0xbff   :  { %v4573_v46 = vadd.f32 1.0, %v7665_v8 }
 0xc00   :  { %7670 = vrcp.f32 %v4493_v44 }
 0xc01   :  { %7672 = vrcp.f32 %v4573_v46 }
 0xc06   :  { %v7667_v26 = vpop.eup %7666 }
 0xc07   :  { %v7669_v9 = vpop.eup %7668  ;;  %v4728_v33 = vadd.f32 1.0, %v7667_v26 }
 0xc09   :  { %7674 = vrcp.f32 %v4728_v33 }
 0xc0d   :  { %v7671_v12 = vpop.eup %7670 }
 0xc0e   :  { %v7673_v14 = vpop.eup %7672  ;;  %v4735_v10 = vmul.f32 %v7671_v12, %v7669_v9 }
 0xc0f   :  { %v4734_v39 = vmul.f32 %v7673_v14, %v4732_v13 }
 0xc11   :  { %v8841_v16 = vadd.f32 %v4735_v10, %v4734_v39 }
 0xc13   :  { %7676 = vtanh.f32 %v8841_v16  ;;  %v5047_v48 = vrot.slane %v8841_v16, 6 }
 0xc16   :  { %v7675_v15 = vpop.eup %7674 }
 0xc20   :  { %v7677_v17 = vpop.eup %7676 }
 0xc21   :  { %v4738_v32 = vmul.f32 %v7677_v17, %v7675_v15 }
 0xc23   :  { %v4740_v18 = vrot.slane %v4738_v32, 6 }
 0xc25   :  { %7293 = vmatmul.mubr.msk.f32.vlgmr.msra.gmra.mxu0 %vm466_vm2, %v4740_v18  ;;  %7304 = vmatmul.mubr.msk.f32.vlgmr.msra.gmra.mxu1 %vm466_vm2, %v4740_v18 }
 0xc26   :  { %7307 = vmatpush3.msra.mxu0 %v8600_v62  ;;  %7318 = vmatpush3.msra.mxu1 %v8602_v63 }
 0xc27   :  { %7308 = vmatprep.subr.mxu0 %v7936_v6  ;;  %7319 = vmatprep.subr.mxu1 %v7936_v6 }
 0xc28   :  { %7309 = vmatpush3.msra.mxu0 %v8608_v0  ;;  %7320 = vmatpush3.msra.mxu1 %v8610_v1 }
 0xc29   :  { %7310 = vmatprep.subr.mxu0 %v7936_v6  ;;  %7321 = vmatprep.subr.mxu1 %v7936_v6 }
 0xc2a   :  { %7311 = vmatpush3.msra.mxu0 %v8616_v2  ;;  %7322 = vmatpush3.msra.mxu1 %v8618_v4 }
 0xc2b   :  { %7312 = vmatprep.subr.mxu0 %v7936_v6  ;;  %7323 = vmatprep.subr.mxu1 %v7936_v6 }
 0xc2c   :  { %7313 = vmatpush3.msra.mxu0 %v8624_v7  ;;  %7314 = vmatprep.mubr.msk.f32.mxu0 %vm7937_vm1, %v7936_v6 }
 0xc2d   :  { %7324 = vmatpush3.msra.mxu1 %v8628_v3  ;;  %7325 = vmatprep.mubr.msk.f32.mxu1 %vm7937_vm1, %v7936_v6 }
 0xc2e   :  { %7315 = vmatmul.mubr.msk.f32.vlgmr.msra.gmra.mxu0 %vm466_vm2, %v4740_v18  ;;  %7326 = vmatmul.mubr.msk.f32.vlgmr.msra.gmra.mxu1 %vm466_vm2, %v4740_v18 }
 0xc2f   :  { %7328 = vmatprep.subr.mxu0 %v7936_v6  ;;  %7339 = vmatprep.subr.mxu1 %v7936_v6 }
 0xc30   :  { %7329 = vmatpush3.msra.mxu0 %v8559_v54  ;;  %7340 = vmatpush3.msra.mxu1 %v8561_v55 }
 0xc31   :  { %7330 = vmatprep.subr.mxu0 %v7936_v6  ;;  %7341 = vmatprep.subr.mxu1 %v7936_v6 }
 0xc32   :  { %7331 = vmatpush3.msra.mxu0 %v8567_v52  ;;  %7342 = vmatpush3.msra.mxu1 %v8569_v56 }
 0xc33   :  { %7332 = vmatprep.subr.mxu0 %v7936_v6  ;;  %7343 = vmatprep.subr.mxu1 %v7936_v6 }
 0xc34   :  { %7333 = vmatpush3.msra.mxu0 %v8575_v58  ;;  %7344 = vmatpush3.msra.mxu1 %v8577_v57 }
 0xc35   :  { %7334 = vmatprep.subr.mxu0 %v7936_v6  ;;  %7345 = vmatprep.subr.mxu1 %v7936_v6 }
 0xc36   :  { %7335 = vmatpush3.msra.mxu0 %v8583_v59  ;;  %7346 = vmatpush3.msra.mxu1 %v8587_v60 }
 0xc37   :  { %7336 = vmatprep.mubr.msk.f32.mxu0 %vm7937_vm1, %v7936_v6  ;;  %7347 = vmatprep.mubr.msk.f32.mxu1 %vm7937_vm1, %v7936_v6 }
 0xc38   :  { %7350 = vmatprep.subr.mxu0 %v7936_v6  ;;  %7361 = vmatprep.subr.mxu1 %v7936_v6 }
 0xce5   :  { %v4809_v19 = vpop.f32.mrf.mxu0  ;;  %v4886_v20 = vpop.f32.mrf.mxu1 }
 0xce6   :  { %v4813_v21 = vadd.f32 %v4809_v19, %v8662_v28  ;;  %v4890_v22 = vadd.f32 %v4886_v20, %v8664_v29 }
 0xce7   :  { %v7294_v23 = vpop.f32.mrf.mxu0  ;;  %v7305_v51 = vpop.f32.mrf.mxu1 }
 0xce8   :  { %v6302_v53 = vmul.f32 -1.442695, %v4813_v21  ;;  %v6304_v50 = vmul.f32 -1.442695, %v4890_v22 }
 0xcea   :  { %7678 = vpow2.f32 %v6302_v53 }
 0xceb   :  { %7680 = vpow2.f32 %v6304_v50 }
 0xcee   :  { %v4963_v61 = vpop.f32.mrf.mxu0  ;;  %v5035_v25 = vpop.f32.mrf.mxu1 }
 0xcef   :  { %v5039_v11 = vadd.f32 %v5035_v25, %v8668_v41  ;;  %v4967_v31 = vadd.f32 %v4963_v61, %v8666_v40  ;;  %v8950_v61 = vld [vmem:[#allocation8 + $0x58] sm:$0xff] }
 0xcf0   :  { %v7316_v24 = vpop.f32.mrf.mxu0  ;;  %v7327_v27 = vpop.f32.mrf.mxu1  ;;  %v8953_v25 = vld [vmem:[#allocation8 + $0x78] sm:$0xff] }
 0xcf1   :  { %v6307_v30 = vmul.f32 -1.442695, %v5039_v11  ;;  %v8958_v11 = vld [vmem:[#allocation8 + $0x50] sm:$0xff]  ;;  %v8966_v27 = vld [vmem:[#allocation8 + $0x48] sm:$0xff] }
 0xcf2   :  { %v8961_v24 = vld [vmem:[#allocation8 + $0x70] sm:$0xff] }
 0xcf3   :  { %7682 = vpow2.f32 %v6307_v30  ;;  %v8969_v30 = vld [vmem:[#allocation8 + $0x68] sm:$0xff] }
 0xcf4   :  { %7684 = vtanh.f32 %v4967_v31  ;;  %v8974_v31 = vld [vmem:[#allocation8 + $0x40] sm:$0xff] }
 0xcf7   :  { %v7679_v34 = vpop.eup %7678 }
 0xcf8   :  { %v7681_v35 = vpop.eup %7680  ;;  %v4817_v36 = vadd.f32 1.0, %v7679_v34  ;;  %v8979_v34 = vld [vmem:[#allocation8 + $0x60] sm:$0xff] }
 0xcf9   :  { %v4894_v38 = vadd.f32 1.0, %v7681_v35  ;;  %v7770_v35 = vld [vmem:[#allocation8 + $0x18] sm:$0xff] }
 0xcfa   :  { %7686 = vrcp.f32 %v4817_v36  ;;  %v7771_v36 = vld [vmem:[#allocation8 + $0x38] sm:$0xff] }
 0xcfb   :  { %7688 = vrcp.f32 %v4894_v38  ;;  %v7772_v38 = vld [vmem:[#allocation8 + $0x10] sm:$0xff] }
 0xd00   :  { %v7683_v42 = vpop.eup %7682 }
 0xd01   :  { %v7685_v43 = vpop.eup %7684  ;;  %v5043_v49 = vadd.f32 1.0, %v7683_v42  ;;  %v7773_v42 = vld [vmem:[#allocation8 + $0x30] sm:$0xff] }
 0xd03   :  { %7690 = vrcp.f32 %v5043_v49 }
 0xd07   :  { %v7687_v47 = vpop.eup %7686 }
 0xd08   :  { %v7689_v37 = vpop.eup %7688  ;;  %v5050_v45 = vmul.f32 %v7687_v47, %v7685_v43  ;;  %v7774_v43 = vld [vmem:[#allocation8 + $0x8] sm:$0xff] }
 0xd09   :  { %v5049_v5 = vmul.f32 %v7689_v37, %v5047_v48  ;;  %v7775_v47 = vld [vmem:[#allocation8 + $0x28] sm:$0xff]  ;;  %v7776_v48 = vld [vmem:[#allocation8] sm:$0xff] }
 0xd0a   :  { %v7777_v37 = vld [vmem:[#allocation8 + $0x20] sm:$0xff] }
 0xd0b   :  { %v8893_v8 = vadd.f32 %v5050_v45, %v5049_v5 }
 0xd0d   :  { %7692 = vtanh.f32 %v8893_v8  ;;  %v5373_v32 = vrot.slane %v8893_v8, 6 }
 0xd10   :  { %v7691_v44 = vpop.eup %7690 }
 0xd1a   :  { %v7693_v46 = vpop.eup %7692 }
 0xd1b   :  { %v5053_v26 = vmul.f32 %v7693_v46, %v7691_v44 }
 0xd1d   :  { %7337 = vmatmul.mubr.msk.f32.vlgmr.msra.gmra.mxu0 %vm466_vm2, %v5053_v26  ;;  %7348 = vmatmul.mubr.msk.f32.vlgmr.msra.gmra.mxu1 %vm466_vm2, %v5053_v26 }
 0xd1e   :  { %7351 = vmatpush3.msra.mxu0 %v8600_v62  ;;  %7362 = vmatpush3.msra.mxu1 %v8602_v63 }
 0xd1f   :  { %7352 = vmatprep.subr.mxu0 %v7936_v6  ;;  %7363 = vmatprep.subr.mxu1 %v7936_v6 }
 0xd20   :  { %7353 = vmatpush3.msra.mxu0 %v8608_v0  ;;  %7364 = vmatpush3.msra.mxu1 %v8610_v1 }
 0xd21   :  { %7354 = vmatprep.subr.mxu0 %v7936_v6  ;;  %7365 = vmatprep.subr.mxu1 %v7936_v6 }
 0xd22   :  { %7355 = vmatpush3.msra.mxu0 %v8616_v2  ;;  %7366 = vmatpush3.msra.mxu1 %v8618_v4 }
 0xd23   :  { %7356 = vmatprep.subr.mxu0 %v7936_v6  ;;  %7367 = vmatprep.subr.mxu1 %v7936_v6 }
 0xd24   :  { %7357 = vmatpush3.msra.mxu0 %v8624_v7  ;;  %7358 = vmatprep.mubr.msk.f32.mxu0 %vm7937_vm1, %v7936_v6 }
 0xd25   :  { %7368 = vmatpush3.msra.mxu1 %v8628_v3  ;;  %7369 = vmatprep.mubr.msk.f32.mxu1 %vm7937_vm1, %v7936_v6 }
 0xd26   :  { %7359 = vmatmul.mubr.msk.f32.vlgmr.msra.gmra.mxu0 %vm466_vm2, %v5053_v26  ;;  %7370 = vmatmul.mubr.msk.f32.vlgmr.msra.gmra.mxu1 %vm466_vm2, %v5053_v26 }
 0xd27   :  { %7372 = vmatprep.subr.mxu0 %v7936_v6  ;;  %7383 = vmatprep.subr.mxu1 %v7936_v6 }
 0xd28   :  { %7373 = vmatpush3.msra.mxu0 %v8559_v54  ;;  %7384 = vmatpush3.msra.mxu1 %v8561_v55 }
 0xd29   :  { %7374 = vmatprep.subr.mxu0 %v7936_v6  ;;  %7385 = vmatprep.subr.mxu1 %v7936_v6 }
 0xd2a   :  { %7375 = vmatpush3.msra.mxu0 %v8567_v52  ;;  %7386 = vmatpush3.msra.mxu1 %v8569_v56 }
 0xd2b   :  { %7376 = vmatprep.subr.mxu0 %v7936_v6  ;;  %7387 = vmatprep.subr.mxu1 %v7936_v6 }
 0xd2c   :  { %7377 = vmatpush3.msra.mxu0 %v8575_v58  ;;  %7388 = vmatpush3.msra.mxu1 %v8577_v57 }
 0xd2d   :  { %7378 = vmatprep.subr.mxu0 %v7936_v6  ;;  %7389 = vmatprep.subr.mxu1 %v7936_v6 }
 0xd2e   :  { %7379 = vmatpush3.msra.mxu0 %v8583_v59  ;;  %7390 = vmatpush3.msra.mxu1 %v8587_v60 }
 0xd2f   :  { %7380 = vmatprep.mubr.msk.f32.mxu0 %vm7937_vm1, %v7936_v6  ;;  %7391 = vmatprep.mubr.msk.f32.mxu1 %vm7937_vm1, %v7936_v6 }
 0xd30   :  { %7394 = vmatprep.subr.mxu0 %v7936_v6  ;;  %7405 = vmatprep.subr.mxu1 %v7936_v6 }
 0xddd   :  { %v5123_v54 = vpop.f32.mrf.mxu0  ;;  %v5203_v55 = vpop.f32.mrf.mxu1 }
 0xdde   :  { %v5128_v52 = vrot.slane %v5123_v54, 6  ;;  %v5208_v56 = vrot.slane %v5203_v55, 6 }
 0xddf   :  { %v7338_v58 = vpop.f32.mrf.mxu0  ;;  %v7349_v57 = vpop.f32.mrf.mxu1 }
 0xde0   :  { %v5130_v59 = vadd.f32 %v5128_v52, %v8662_v28  ;;  %v5210_v60 = vadd.f32 %v5208_v56, %v8664_v29 }
 0xde2   :  { %v6309_v62 = vmul.f32 -1.442695, %v5130_v59  ;;  %v6311_v63 = vmul.f32 -1.442695, %v5210_v60 }
 0xde4   :  { %7694 = vpow2.f32 %v6309_v62 }
 0xde5   :  { %7696 = vpow2.f32 %v6311_v63 }
 0xde6   :  { %v5283_v0 = vpop.f32.mrf.mxu0  ;;  %v5358_v1 = vpop.f32.mrf.mxu1 }
 0xde7   :  { %v5363_v2 = vrot.slane %v5358_v1, 6  ;;  %v5288_v9 = vrot.slane %v5283_v0, 6 }
 0xde8   :  { %v7360_v4 = vpop.f32.mrf.mxu0  ;;  %v7371_v7 = vpop.f32.mrf.mxu1 }
 0xde9   :  { %v5365_v3 = vadd.f32 %v5363_v2, %v8668_v41  ;;  %v5290_v13 = vadd.f32 %v5288_v9, %v8666_v40 }
 0xdeb   :  { %v6314_v12 = vmul.f32 -1.442695, %v5365_v3 }
 0xded   :  { %7698 = vpow2.f32 %v6314_v12 }
 0xdee   :  { %7700 = vtanh.f32 %v5290_v13 }
 0xdf1   :  { %v7695_v14 = vpop.eup %7694 }
 0xdf2   :  { %v7697_v10 = vpop.eup %7696  ;;  %v5134_v33 = vadd.f32 1.0, %v7695_v14 }
 0xdf3   :  { %v5214_v39 = vadd.f32 1.0, %v7697_v10 }
 0xdf4   :  { %7702 = vrcp.f32 %v5134_v33 }
 0xdf5   :  { %7704 = vrcp.f32 %v5214_v39 }
 0xdfa   :  { %v7699_v16 = vpop.eup %7698 }
 0xdfb   :  { %v7701_v15 = vpop.eup %7700  ;;  %v5369_v20 = vadd.f32 1.0, %v7699_v16 }
 0xdfd   :  { %7706 = vrcp.f32 %v5369_v20  ;;  %v6041_v20 = vld [vmem:[%s9080_s9 + $0x18] sm:$0xff] }
 0xe01   :  { %v7703_v17 = vpop.eup %7702 }
 0xe02   :  { %v7705_v18 = vpop.eup %7704  ;;  %v5376_v19 = vmul.f32 %v7703_v17, %v7701_v15 }
 0xe03   :  { %v5375_v21 = vmul.f32 %v7705_v18, %v5373_v32 }
 0xe05   :  { %v8945_v22 = vadd.f32 %v5376_v19, %v5375_v21  ;;  %v6040_v21 = vld [vmem:[%s9080_s9 + $0x10] sm:$0xff] }
 0xe07   :  { %7708 = vtanh.f32 %v8945_v22  ;;  %v5700_v14 = vrot.slane %v8945_v22, 6  ;;  %v6039_v22 = vld [vmem:[%s9080_s9 + $0x8] sm:$0xff] }
 0xe0a   :  { %v7707_v23 = vpop.eup %7706 }
 0xe14   :  { %v7709_v51 = vpop.eup %7708 }
 0xe15   :  { %v5379_v53 = vmul.f32 %v7709_v51, %v7707_v23  ;;  %v6038_v23 = vld [vmem:[%s9080_s9] sm:$0xff] }
 0xe17   :  { %v5381_v50 = vrot.slane %v5379_v53, 2 }
 0xe19   :  { %7381 = vmatmul.mubr.msk.f32.vlgmr.msra.gmra.mxu0 %vm466_vm2, %v5381_v50  ;;  %7392 = vmatmul.mubr.msk.f32.vlgmr.msra.gmra.mxu1 %vm466_vm2, %v5381_v50 }
 0xe1a   :  { %7395 = vmatpush3.msra.mxu0 %v8950_v61  ;;  %7406 = vmatpush3.msra.mxu1 %v8953_v25 }
 0xe1b   :  { %7396 = vmatprep.subr.mxu0 %v7936_v6  ;;  %7407 = vmatprep.subr.mxu1 %v7936_v6 }
 0xe1c   :  { %7397 = vmatpush3.msra.mxu0 %v8958_v11  ;;  %7408 = vmatpush3.msra.mxu1 %v8961_v24 }
 0xe1d   :  { %7398 = vmatprep.subr.mxu0 %v7936_v6  ;;  %7409 = vmatprep.subr.mxu1 %v7936_v6 }
 0xe1e   :  { %7399 = vmatpush3.msra.mxu0 %v8966_v27  ;;  %7410 = vmatpush3.msra.mxu1 %v8969_v30 }
 0xe1f   :  { %7400 = vmatprep.subr.mxu0 %v7936_v6  ;;  %7411 = vmatprep.subr.mxu1 %v7936_v6 }
 0xe20   :  { %7401 = vmatpush3.msra.mxu0 %v8974_v31  ;;  %7402 = vmatprep.mubr.msk.f32.mxu0 %vm7937_vm1, %v7936_v6 }
 0xe21   :  { %7412 = vmatpush3.msra.mxu1 %v8979_v34  ;;  %7413 = vmatprep.mubr.msk.f32.mxu1 %vm7937_vm1, %v7936_v6 }
 0xe22   :  { %7403 = vmatmul.mubr.msk.f32.vlgmr.msra.gmra.mxu0 %vm466_vm2, %v5381_v50  ;;  %7414 = vmatmul.mubr.msk.f32.vlgmr.msra.gmra.mxu1 %vm466_vm2, %v5381_v50 }
 0xe23   :  { %7416 = vmatprep.subr.mxu0 %v7936_v6  ;;  %7427 = vmatprep.subr.mxu1 %v7936_v6 }
 0xe24   :  { %7417 = vmatpush3.msra.mxu0 %v7770_v35  ;;  %7428 = vmatpush3.msra.mxu1 %v7771_v36 }
 0xe25   :  { %7418 = vmatprep.subr.mxu0 %v7936_v6  ;;  %7429 = vmatprep.subr.mxu1 %v7936_v6 }
 0xe26   :  { %7419 = vmatpush3.msra.mxu0 %v7772_v38  ;;  %7430 = vmatpush3.msra.mxu1 %v7773_v42 }
 0xe27   :  { %7420 = vmatprep.subr.mxu0 %v7936_v6  ;;  %7431 = vmatprep.subr.mxu1 %v7936_v6 }
 0xe28   :  { %7421 = vmatpush3.msra.mxu0 %v7774_v43  ;;  %7432 = vmatpush3.msra.mxu1 %v7775_v47 }
 0xe29   :  { %7422 = vmatprep.subr.mxu0 %v7936_v6  ;;  %7433 = vmatprep.subr.mxu1 %v7936_v6 }
 0xe2a   :  { %7423 = vmatpush3.msra.mxu0 %v7776_v48  ;;  %7434 = vmatpush3.msra.mxu1 %v7777_v37 }
 0xe2b   :  { %7424 = vmatprep.mubr.msk.f32.mxu0 %vm7937_vm1, %v7936_v6  ;;  %7435 = vmatprep.mubr.msk.f32.mxu1 %vm7937_vm1, %v7936_v6 }
 0xe2c   :  { %7438 = vmatprep.subr.mxu0 %v7936_v6  ;;  %7449 = vmatprep.subr.mxu1 %v7936_v6 }
 0xed9   :  { %v5450_v45 = vpop.f32.mrf.mxu0  ;;  %v5530_v49 = vpop.f32.mrf.mxu1 }
 0xeda   :  { %v5455_v5 = vrot.slane %v5450_v45, 4  ;;  %v5535_v8 = vrot.slane %v5530_v49, 4 }
 0xedb   :  { %v7382_v44 = vpop.f32.mrf.mxu0  ;;  %v7393_v46 = vpop.f32.mrf.mxu1 }
 0xedc   :  { %v5457_v26 = vadd.f32 %v5455_v5, %v8662_v28  ;;  %v5537_v54 = vadd.f32 %v5535_v8, %v8664_v29 }
 0xede   :  { %v6316_v55 = vmul.f32 -1.442695, %v5457_v26  ;;  %v6318_v52 = vmul.f32 -1.442695, %v5537_v54 }
 0xee0   :  { %7710 = vpow2.f32 %v6316_v55 }
 0xee1   :  { %7712 = vpow2.f32 %v6318_v52 }
 0xee2   :  { %v5610_v56 = vpop.f32.mrf.mxu0  ;;  %v5685_v58 = vpop.f32.mrf.mxu1 }
 0xee3   :  { %v5690_v57 = vrot.slane %v5685_v58, 4  ;;  %v5615_v63 = vrot.slane %v5610_v56, 4 }
 0xee4   :  { %v7404_v59 = vpop.f32.mrf.mxu0  ;;  %v7415_v60 = vpop.f32.mrf.mxu1 }
 0xee5   :  { %v5692_v62 = vadd.f32 %v5690_v57, %v8668_v41  ;;  %v5617_v1 = vadd.f32 %v5615_v63, %v8666_v40  ;;  %v6329_v57 = vld [vmem:[%s9081_s10] ss:$0 sm:$0xff] }
 0xee7   :  { %v6321_v0 = vmul.f32 -1.442695, %v5692_v62 }
 0xee9   :  { %7714 = vpow2.f32 %v6321_v0 }
 0xeea   :  { %7716 = vtanh.f32 %v5617_v1 }
 0xeed   :  { %v7711_v2 = vpop.eup %7710 }
 0xeee   :  { %v7713_v4 = vpop.eup %7712  ;;  %v5461_v7 = vadd.f32 1.0, %v7711_v2 }
 0xeef   :  { %v5541_v3 = vadd.f32 1.0, %v7713_v4 }
 0xef0   :  { %7718 = vrcp.f32 %v5461_v7 }
 0xef1   :  { %7720 = vrcp.f32 %v5541_v3 }
 0xef6   :  { %v7715_v9 = vpop.eup %7714 }
 0xef7   :  { %v7717_v12 = vpop.eup %7716  ;;  %v5696_v39 = vadd.f32 1.0, %v7715_v9 }
 0xef9   :  { %7722 = vrcp.f32 %v5696_v39 }
 0xefd   :  { %v7719_v13 = vpop.eup %7718 }
 0xefe   :  { %v7721_v10 = vpop.eup %7720  ;;  %v5703_v33 = vmul.f32 %v7719_v13, %v7717_v12 }
 0xeff   :  { %v5702_v16 = vmul.f32 %v7721_v10, %v5700_v14 }
 0xf01   :  { %v9005_v15 = vadd.f32 %v5703_v33, %v5702_v16 }
 0xf03   :  { %7724 = vtanh.f32 %v9005_v15  ;;  %v6027_v44 = vrot.slane %v9005_v15, 6 }
 0xf06   :  { %v7723_v17 = vpop.eup %7722 }
 0xf10   :  { %v7725_v32 = vpop.eup %7724 }
 0xf11   :  { %v5706_v18 = vmul.f32 %v7725_v32, %v7723_v17 }
 0xf13   :  { %v5708_v19 = vrot.slane %v5706_v18, 4 }
 0xf15   :  { %7425 = vmatmul.mubr.msk.f32.vlgmr.msra.gmra.mxu0 %vm466_vm2, %v5708_v19  ;;  %7436 = vmatmul.mubr.msk.f32.vlgmr.msra.gmra.mxu1 %vm466_vm2, %v5708_v19 }
 0xf16   :  { %7439 = vmatpush3.msra.mxu0 %v8950_v61  ;;  %7450 = vmatpush3.msra.mxu1 %v8953_v25 }
 0xf17   :  { %7440 = vmatprep.subr.mxu0 %v7936_v6  ;;  %7451 = vmatprep.subr.mxu1 %v7936_v6 }
 0xf18   :  { %7441 = vmatpush3.msra.mxu0 %v8958_v11  ;;  %7452 = vmatpush3.msra.mxu1 %v8961_v24 }
 0xf19   :  { %7442 = vmatprep.subr.mxu0 %v7936_v6  ;;  %7453 = vmatprep.subr.mxu1 %v7936_v6 }
 0xf1a   :  { %7443 = vmatpush3.msra.mxu0 %v8966_v27  ;;  %7454 = vmatpush3.msra.mxu1 %v8969_v30 }
 0xf1b   :  { %7444 = vmatprep.subr.mxu0 %v7936_v6  ;;  %7455 = vmatprep.subr.mxu1 %v7936_v6 }
 0xf1c   :  { %7445 = vmatpush3.msra.mxu0 %v8974_v31  ;;  %7446 = vmatprep.mubr.msk.f32.mxu0 %vm7937_vm1, %v7936_v6 }
 0xf1d   :  { %7456 = vmatpush3.msra.mxu1 %v8979_v34  ;;  %7457 = vmatprep.mubr.msk.f32.mxu1 %vm7937_vm1, %v7936_v6 }
 0xf1e   :  { %7447 = vmatmul.mubr.msk.f32.vlgmr.msra.gmra.mxu0 %vm466_vm2, %v5708_v19  ;;  %7458 = vmatmul.mubr.msk.f32.vlgmr.msra.gmra.mxu1 %vm466_vm2, %v5708_v19 }
 0xf1f   :  { %7460 = vmatprep.subr.mxu0 %v7936_v6  ;;  %7468 = vmatprep.mubr.msk.f32.mxu0 %vm7937_vm1, %v7936_v6 }
 0xf20   :  { %7461 = vmatpush3.msra.mxu0 %v6041_v20 }
 0xf21   :  { %7462 = vmatprep.subr.mxu0 %v7936_v6 }
 0xf22   :  { %7463 = vmatpush3.msra.mxu0 %v6040_v21 }
 0xf23   :  { %7464 = vmatprep.subr.mxu0 %v7936_v6 }
 0xf24   :  { %7465 = vmatpush3.msra.mxu0 %v6039_v22 }
 0xf25   :  { %7466 = vmatprep.subr.mxu0 %v7936_v6 }
 0xf26   :  { %7467 = vmatpush3.msra.mxu0 %v6038_v23 }
 0xfd5   :  { %v5777_v51 = vpop.f32.mrf.mxu0  ;;  %v5857_v53 = vpop.f32.mrf.mxu1 }
 0xfd6   :  { %v5782_v50 = vrot.slane %v5777_v51, 2  ;;  %v5862_v61 = vrot.slane %v5857_v53, 2 }
 0xfd7   :  { %v7426_v25 = vpop.f32.mrf.mxu0  ;;  %v7437_v11 = vpop.f32.mrf.mxu1 }
 0xfd8   :  { %v5784_v24 = vadd.f32 %v5782_v50, %v8662_v28  ;;  %v5864_v27 = vadd.f32 %v5862_v61, %v8664_v29 }
 0xfda   :  { %v6323_v30 = vmul.f32 -1.442695, %v5784_v24  ;;  %v6325_v31 = vmul.f32 -1.442695, %v5864_v27 }
 0xfdc   :  { %7726 = vpow2.f32 %v6323_v30 }
 0xfdd   :  { %7728 = vpow2.f32 %v6325_v31 }
 0xfde   :  { %v5937_v34 = vpop.f32.mrf.mxu0  ;;  %v6012_v35 = vpop.f32.mrf.mxu1 }
 0xfdf   :  { %v6017_v36 = vrot.slane %v6012_v35, 2  ;;  %v5942_v43 = vrot.slane %v5937_v34, 2 }
 0xfe0   :  { %v7448_v38 = vpop.f32.mrf.mxu0  ;;  %v7459_v6 = vpop.f32.mrf.mxu1 }
 0xfe1   :  { %v6019_v42 = vadd.f32 %v6017_v36, %v8668_v41  ;;  %v5944_v48 = vadd.f32 %v5942_v43, %v8666_v40 }
 0xfe3   :  { %v6328_v47 = vmul.f32 -1.442695, %v6019_v42 }
 0xfe5   :  { %7730 = vpow2.f32 %v6328_v47 }
 0xfe6   :  { %7732 = vtanh.f32 %v5944_v48 }
 0xfe9   :  { %v7727_v37 = vpop.eup %7726 }
 0xfea   :  { %v7729_v45 = vpop.eup %7728  ;;  %v5788_v28 = vadd.f32 1.0, %v7727_v37 }
 0xfeb   :  { %v5868_v29 = vadd.f32 1.0, %v7729_v45 }
 0xfec   :  { %7734 = vrcp.f32 %v5788_v28 }
 0xfed   :  { %7736 = vrcp.f32 %v5868_v29 }
 0xff2   :  { %v7731_v49 = vpop.eup %7730 }
 0xff3   :  { %v7733_v5 = vpop.eup %7732  ;;  %v6023_v41 = vadd.f32 1.0, %v7731_v49 }
 0xff5   :  { %7738 = vrcp.f32 %v6023_v41 }
 0xff9   :  { %v7735_v8 = vpop.eup %7734 }
 0xffa   :  { %v7737_v46 = vpop.eup %7736  ;;  %v6030_v26 = vmul.f32 %v7735_v8, %v7733_v5 }
 0xffb   :  { %v6029_v54 = vmul.f32 %v7737_v46, %v6027_v44 }
 0xffd   :  { %v6031_v55 = vadd.f32 %v6030_v26, %v6029_v54 }
 0xfff   :  { %7740 = vtanh.f32 %v6031_v55  ;;  %6037 = vst.msk [vmem:[#allocation14 - $0x4] sm:$0xc0] %vm1764_vm6, %v6031_v55 }
0x1002   :  { %v7739_v40 = vpop.eup %7738 }
0x100c   :  { %v7741_v52 = vpop.eup %7740 }
0x100d   :  { %v6033_v56 = vmul.f32 %v7741_v52, %v7739_v40 }
0x100f   :  { %v6050_v58 = vrot.slane %v6033_v56, 6  ;;  %6035 = vst.msk [vmem:[#allocation12 - $0x4] sm:$0xc0] %vm1764_vm6, %v6033_v56 }
0x1011   :  { %7469 = vmatmul.mubr.msk.f32.vlgmr.msra.gmra.mxu0 %vm466_vm2, %v6050_v58 }
0x10d1   :  { %v6119_v59 = vpop.f32.mrf.mxu0 }
0x10d2   :  { %v6120_v60 = vadd.f32 %v6329_v57, %v6119_v59 }
0x10d3   :  { %v7470_v62 = vpop.f32.mrf.mxu0 }
0x10d4   :  { %v6124_v63 = vsel %vm6123_vm7, %v6120_v60, -inf }
0x10d5   :  { %6125 = vmax.xlane.f32.xlu0 %v6124_v63 }
0x115e   :  { %v6126_v0 = vpop.xlane.xlu0 %6125 }
0x115f   :  { %v6127_v1 = vsub.f32 %v6120_v60, %v6126_v0 }
0x1161   :  { %v6128_v2 = vmul.f32 1.442695, %v6127_v1 }
0x1163   :  { %7742 = vpow2.f32 %v6128_v2 }
0x1170   :  { %v7743_v4 = vpop.eup %7742 }
0x1171   :  { %v6130_v7 = vsel %vm6123_vm7, %v7743_v4, 0.0 }
0x1172   :  { %6131 = vadd.xlane.f32.xlu0 %v6130_v7 }
0x1173   :  { %7869 = shalt.err (!%p7866_p10)
}
0x1174   :  { %s7939_s10 = smov 32   ;;  %s7940_s23 = smov 2  }
0x1175   :  { %6158 = dma.vmem_to_hbm [thread:$0]  %s6153_s1, 64, %s9083_s12, [#allocation13], %s7939_s10, %s7939_s10, %s7940_s23  }
0x1176   :  { %s7941_s25 = smov [#allocation14]  }
0x1177   :  { %s6164_s26 = sshll.u32 %s7941_s25, 4  ;;  %s6165_s26 = int_to_ptr.vmem [resolvable:$true] %s6164_s26 }
0x1178   :  { %s7878_s2 = scalar_lea.vmem %s6165_s26, 64  ;;  %p7883_p12 = scmp.lt.s32.totalorder %s6165_s26, %s6165_s26 }
0x1179   :  { %p7879_p11 = scmp.ne.s32.totalorder %s6165_s26, %s7878_s2  ;;  %p7884_p13 = scmp.lt.s32.totalorder %s7878_s2, %s7878_s2 }
0x117b   :  { %p7885_p0 = por %p7884_p13, %p7883_p12 }
0x117d   :  { %p7886_p1 = pnand %p7885_p0, %p7879_p11 }
0x117f   :  { %7889 = shalt.err (!%p7886_p1)
}
0x1180   :  { %6170 = dma.vmem_to_hbm [thread:$0]  %s6165_s26, 64, %s9084_s13, [#allocation13], %s7939_s10, %s7939_s10, %s7940_s23  }
0x1181   :  { %s7942_s3 = smov [#allocation11]  }
0x1182   :  { %s6143_s29 = sshll.u32 %s7942_s3, 4  ;;  %s6144_s29 = int_to_ptr.vmem [resolvable:$true] %s6143_s29 }
0x1183   :  { %s7898_s12 = scalar_lea.vmem %s6144_s29, 32  ;;  %p7903_p3 = scmp.lt.s32.totalorder %s6144_s29, %s6144_s29 }
0x1184   :  { %p7899_p2 = scmp.ne.s32.totalorder %s6144_s29, %s7898_s12  ;;  %p7904_p4 = scmp.lt.s32.totalorder %s7898_s12, %s7898_s12 }
0x1186   :  { %p7905_p5 = por %p7904_p4, %p7903_p3 }
0x1188   :  { %p7906_p6 = pnand %p7905_p5, %p7899_p2 }
0x11fb   :  { %v6132_v3 = vpop.xlane.xlu0 %6131 }
0x11fc   :  { %7744 = vlog2.f32 %v6132_v3 }
0x1209   :  { %v7745_v9 = vpop.eup %7744 }
0x120a   :  { %v6134_v12 = vmul.f32 0.6931472, %v7745_v9 }
0x120c   :  { %v6135_v13 = vsub.f32 %v6127_v1, %v6134_v12 }
0x120e   :  { %6136 = vst.msk [vmem:[#allocation11] sm:$0x3] %vm6123_vm7, %v6135_v13 }
0x120f   :  { %7909 = shalt.err (!%p7906_p6)
}
0x1210   :  { %6146 = dma.vmem_to_hbm [thread:$0]  %s6144_s29, 32, %s9082_s11, [#allocation5]  }
0x1211   :  { %7924 = dma.done.wait [#allocation5], 32  }
0x1212   :  { %7925 = vsyncadd [#allocation5], 4294967264 }
0x1213   :  { %7926 = dma.done.wait [#allocation13], 128  }
0x1214   :  { %7927 = vsyncadd [#allocation13], 4294967168 }
0x1215   :  { %6180 = vsyncpa [#allocation4], 1 }
0x1216   :  { %6181 = vsyncpa [#allocation7], 1 }
0x1217   :  { %6182 = vsyncpa [#allocation10], 1 }
0x1218   :  { %6183 = vsyncpa [#allocation5], 1 }
0x1219   :  { %6184 = vsyncpa [#allocation13], 1 }

</bundles_post_ra>
